<compile_context>
chip_gen: v7x
topology: tpu7x:2x2x1
jax: 0.10.0
libtpu: 0.0.40
codegen_flags: <defaults>
</compile_context>

<pallas_src>
import functools

import jax
import jax.numpy as jnp
from jax import lax
from jax.experimental import pallas as pl
from jax.experimental.pallas import tpu as pltpu


# --------------------------------------------------------------------------- #
# Kernel 1: channel attention gate + fused per-pixel channel max/mean map.
# --------------------------------------------------------------------------- #
def _channel_attn_kernel(x_ref, w1t_ref, w2t_ref, ca_ref, cm_ref, *, inv_c):
    x = x_ref[0]                                            # (HW, C) f32
    pooled = jnp.concatenate(
        [jnp.max(x, axis=0, keepdims=True),
         jnp.mean(x, axis=0, keepdims=True)], axis=0)       # (2, C)
    # shared MLP, both pooled vectors in one MXU GEMM
    h = jnp.dot(pooled, w1t_ref[...], preferred_element_type=jnp.float32)  # (2, Cr)
    h = jnp.maximum(h, 0.0)
    z = jnp.dot(h, w2t_ref[...], preferred_element_type=jnp.float32)       # (2, C)
    ca = jax.nn.sigmoid(z[0:1, :] + z[1:2, :])              # (1, C)
    ca_ref[0] = ca

    x_ca = x * ca                                           # stays in VMEM only
    cmax = jnp.max(x_ca, axis=1, keepdims=True)             # (HW, 1)
    cmean = jnp.sum(x_ca, axis=1, keepdims=True) * inv_c    # (HW, 1)
    cm_ref[0] = jnp.concatenate([cmax, cmean], axis=1)      # (HW, 2)


def _channel_attention(xf, w1t, w2t):
    N, HW, C = xf.shape
    Cr = w1t.shape[1]
    return pl.pallas_call(
        functools.partial(_channel_attn_kernel, inv_c=1.0 / C),
        grid=(N,),
        in_specs=[
            pl.BlockSpec((1, HW, C), lambda n: (n, 0, 0)),
            pl.BlockSpec((C, Cr), lambda n: (0, 0)),
            pl.BlockSpec((Cr, C), lambda n: (0, 0)),
        ],
        out_specs=[
            pl.BlockSpec((1, 1, C), lambda n: (n, 0, 0)),
            pl.BlockSpec((1, HW, 2), lambda n: (n, 0, 0)),
        ],
        out_shape=[
            jax.ShapeDtypeStruct((N, 1, C), jnp.float32),
            jax.ShapeDtypeStruct((N, HW, 2), jnp.float32),
        ],
        compiler_params=pltpu.CompilerParams(dimension_semantics=("parallel",)),
    )(xf, w1t, w2t)


# --------------------------------------------------------------------------- #
# Kernel 2: fused spatial/channel gate apply + KxK conv (shifted bf16 MXU dots)
#           + conv bias + BatchNorm (inference affine) + ReLU.
#
# Works on the zero-padded, spatially-flattened image (HPW = (Hp+1)*Wp rows).
# For tap (kh, kw) the flat window starting at offset kh*Wp+kw of length
# M = Hf*Wp is contiguous in rows; its "wrapped" columns are garbage but are
# cropped by the wrapper (only j < Wf is kept), so every dot stays a clean 2-D
# MXU GEMM with no in-kernel reshapes.
# --------------------------------------------------------------------------- #
def _gate_conv_bn_relu_kernel(xp_ref, ca_ref, sl_ref, w_ref, b_ref, sc_ref, sh_ref,
                              out_ref, xg_ref, *, k, wp, m, c):
    # padded x is 0 at the borders, so the gate value there is irrelevant.
    gate = ca_ref[0] * jax.nn.sigmoid(sl_ref[0])            # (HPW, C)
    xg_ref[...] = xp_ref[0] * gate                          # x_sa (padded), VMEM only

    ocp = w_ref.shape[1]
    acc = jnp.zeros((m, ocp), jnp.float32)
    for kh in range(k):                                     # k*k shifted MXU dots
        for kw in range(k):
            t = kh * k + kw
            off = kh * wp + kw
            win = xg_ref[pl.ds(off, m), :].astype(jnp.bfloat16)   # (M, C)
            wt = w_ref[t * c:(t + 1) * c, :]                      # (C, OCp) bf16
            acc = acc + jnp.dot(win, wt, preferred_element_type=jnp.float32)

    y = acc + b_ref[...]                                    # conv bias
    y = y * sc_ref[...] + sh_ref[...]                       # BatchNorm (inference)
    out_ref[0] = jnp.maximum(y, 0.0)                        # ReLU (lane-dense store)


def _gate_conv_bn_relu(xp_f, ca, sl_f, wt, bias, scale, shift, *, k, wp, m):
    N, HPW, C = xp_f.shape
    KKC, OCp = wt.shape
    return pl.pallas_call(
        functools.partial(_gate_conv_bn_relu_kernel, k=k, wp=wp, m=m, c=C),
        grid=(N,),
        in_specs=[
            pl.BlockSpec((1, HPW, C), lambda n: (n, 0, 0)),
            pl.BlockSpec((1, 1, C), lambda n: (n, 0, 0)),
            pl.BlockSpec((1, HPW, 1), lambda n: (n, 0, 0)),
            pl.BlockSpec((KKC, OCp), lambda n: (0, 0)),
            pl.BlockSpec((1, OCp), lambda n: (0, 0)),
            pl.BlockSpec((1, OCp), lambda n: (0, 0)),
            pl.BlockSpec((1, OCp), lambda n: (0, 0)),
        ],
        out_specs=pl.BlockSpec((1, m, OCp), lambda n: (n, 0, 0)),
        out_shape=jax.ShapeDtypeStruct((N, m, OCp), jnp.float32),
        scratch_shapes=[pltpu.VMEM((HPW, C), jnp.float32)],
        compiler_params=pltpu.CompilerParams(dimension_semantics=("parallel",)),
    )(xp_f, ca, sl_f, wt, bias, scale, shift)


# --------------------------------------------------------------------------- #
# Forward wrapper (NCHW in / NCHW out, matching the PyTorch module).
# --------------------------------------------------------------------------- #
def cbam_conv_forward(x_nchw, params, *, kernel_size, stride, spatial_kernel):
    N, C, H, W = x_nchw.shape
    OC = params["conv_w"].shape[0]
    OCp = ((OC + 127) // 128) * 128
    k = kernel_size
    p = k // 2
    ps = spatial_kernel // 2

    x_nhwc = jnp.transpose(x_nchw, (0, 2, 3, 1))
    xf = x_nhwc.reshape(N, H * W, C)

    # ---- channel attention gate + channel max/mean map (Pallas kernel 1) ----
    w1t = jnp.transpose(params["mlp_w1"])                   # (C, Cr)
    w2t = jnp.transpose(params["mlp_w2"])                   # (Cr, C)
    ca, cm = _channel_attention(xf, w1t, w2t)

    # ---- 7x7 spatial-conv logits on the tiny 2-channel map (plain JAX) ----
    cm_map = cm.reshape(N, H, W, 2)
    w_sp = jnp.transpose(params["spatial_w"], (2, 3, 1, 0))  # (ks, ks, 2, 1)
    slog = lax.conv_general_dilated(
        cm_map, w_sp, (1, 1), [(ps, ps), (ps, ps)],
        dimension_numbers=("NHWC", "HWIO", "NHWC"))          # (N, H, W, 1)

    # ---- fused gate-apply + KxK conv + BN + ReLU (Pallas kernel 2) ----
    Hp, Wp = H + 2 * p, W + 2 * p
    Hf, Wf = Hp - k + 1, Wp - k + 1          # stride-1 ("full") output extent
    assert k - 1 <= Wp
    # one extra zero row at the bottom so every shifted flat window is in-bounds
    xp = jnp.pad(x_nhwc, ((0, 0), (p, p + 1), (p, p), (0, 0)))
    slp = jnp.pad(slog, ((0, 0), (p, p + 1), (p, p), (0, 0)))
    HPW = (Hp + 1) * Wp
    xp_f = xp.reshape(N, HPW, C)
    slp_f = slp.reshape(N, HPW, 1)

    # per-tap weight slab (k*k*C, OCp), zero-padded output channels, bf16 for MXU
    wt = jnp.transpose(params["conv_w"], (2, 3, 1, 0)).reshape(k * k * C, OC)
    wt = jnp.pad(wt, ((0, 0), (0, OCp - OC))).astype(jnp.bfloat16)
    bias = jnp.pad(params["conv_b"], (0, OCp - OC)).reshape(1, OCp)
    bn_scale = params["bn_gamma"] / jnp.sqrt(params["bn_var"] + 1e-5)
    bn_shift = params["bn_beta"] - params["bn_mean"] * bn_scale
    scale = jnp.pad(bn_scale, (0, OCp - OC), constant_values=1.0).reshape(1, OCp)
    shift = jnp.pad(bn_shift, (0, OCp - OC)).reshape(1, OCp)

    M = Hf * Wp
    y = _gate_conv_bn_relu(xp_f, ca, slp_f, wt, bias, scale, shift, k=k, wp=Wp, m=M)

    # crop the lane-dense padded output back to (N, Ho, Wo, OC) and apply stride.
    # TODO(synk): stride > 1 subsamples the stride-1 output (wasteful for large strides).
    y = y.reshape(N, Hf, Wp, OCp)[:, 0:Hf:stride, 0:Wf:stride, :OC]
    return jnp.transpose(y, (0, 3, 1, 2))                   # back to NCHW


# --------------------------------------------------------------------------- #
# Deterministic parameter init (shapes from CBAMConv.__init__)
# --------------------------------------------------------------------------- #
def init_params(key, channel, out_channel, kernel_size, reduction, spatial_kernel):
    ks = jax.random.split(key, 9)
    Cr = channel // reduction
    return {
        "mlp_w1": 0.1 * jax.random.normal(ks[0], (Cr, channel), jnp.float32),
        "mlp_w2": 0.1 * jax.random.normal(ks[1], (channel, Cr), jnp.float32),
        "spatial_w": 0.1 * jax.random.normal(
            ks[2], (1, 2, spatial_kernel, spatial_kernel), jnp.float32),
        "conv_w": 0.1 * jax.random.normal(
            ks[3], (out_channel, channel, kernel_size, kernel_size), jnp.float32),
        "conv_b": 0.1 * jax.random.normal(ks[4], (out_channel,), jnp.float32),
        "bn_gamma": 1.0 + 0.1 * jax.random.normal(ks[5], (out_channel,), jnp.float32),
        "bn_beta": 0.1 * jax.random.normal(ks[6], (out_channel,), jnp.float32),
        "bn_mean": 0.1 * jax.random.normal(ks[7], (out_channel,), jnp.float32),
        "bn_var": 0.5 + 0.25 * jnp.abs(jax.random.normal(ks[8], (out_channel,), jnp.float32)),
    }


# --------------------------------------------------------------------------- #
# Pure-JAX reference (mirrors the PyTorch forward) for a correctness check.
# --------------------------------------------------------------------------- #
def ref_forward(x, p, *, kernel_size, stride, spatial_kernel):
    mx = jnp.max(x, axis=(2, 3))
    av = jnp.mean(x, axis=(2, 3))

    def mlp(v):
        return jnp.maximum(v @ p["mlp_w1"].T, 0.0) @ p["mlp_w2"].T

    ca = jax.nn.sigmoid(mlp(mx) + mlp(av))[:, :, None, None]
    x1 = ca * x
    cmax = jnp.max(x1, axis=1, keepdims=True)
    cmean = jnp.mean(x1, axis=1, keepdims=True)
    sp_in = jnp.concatenate([cmax, cmean], axis=1)
    ps = spatial_kernel // 2
    sp = lax.conv_general_dilated(sp_in, p["spatial_w"], (1, 1),
                                  [(ps, ps), (ps, ps)],
                                  dimension_numbers=("NCHW", "OIHW", "NCHW"))
    x2 = jax.nn.sigmoid(sp) * x1
    pad = kernel_size // 2
    y = lax.conv_general_dilated(x2, p["conv_w"], (stride, stride),
                                 [(pad, pad), (pad, pad)],
                                 dimension_numbers=("NCHW", "OIHW", "NCHW"))
    y = y + p["conv_b"][None, :, None, None]
    scale = p["bn_gamma"] / jnp.sqrt(p["bn_var"] + 1e-5)
    shift = p["bn_beta"] - p["bn_mean"] * scale
    return jnp.maximum(y * scale[None, :, None, None] + shift[None, :, None, None], 0.0)


if __name__ == "__main__":
    channel, out_channel = 32, 16
    kernel_size, stride, reduction, spatial_kernel = 3, 1, 16, 7
    N, H, W = 2, 16, 16

    key = jax.random.PRNGKey(0)
    kx, kp = jax.random.split(key)
    x = jax.random.normal(kx, (N, channel, H, W), jnp.float32)
    params = init_params(kp, channel, out_channel, kernel_size, reduction, spatial_kernel)

    fwd = jax.jit(functools.partial(cbam_conv_forward,
                                    kernel_size=kernel_size,
                                    stride=stride,
                                    spatial_kernel=spatial_kernel))
    out = jax.block_until_ready(fwd(x, params))

    ref = ref_forward(x, params, kernel_size=kernel_size, stride=stride,
                      spatial_kernel=spatial_kernel)
    assert out.shape == ref.shape, (out.shape, ref.shape)
    # tolerance accounts for bf16 MXU operands in the main conv GEMM
    assert jnp.allclose(out, ref, atol=3e-2, rtol=3e-2), \
        float(jnp.max(jnp.abs(out - ref)))
    print("KERNEL_OK")
</pallas_src>

<mosaic_0001>
module attributes {stable_mosaic.version = 11 : i64} {
  func.func @_channel_attn_kernel(%arg0: i32, %arg1: memref<1x256x32xf32, #tpu.memory_space<vmem>>, %arg2: memref<32x2xf32, #tpu.memory_space<vmem>>, %arg3: memref<2x32xf32, #tpu.memory_space<vmem>>, %arg4: memref<1x1x32xf32, #tpu.memory_space<vmem>>, %arg5: memref<1x256x2xf32, #tpu.memory_space<vmem>>) attributes {dimension_semantics = [#tpu.dimension_semantics<parallel>], iteration_bounds = array<i64: 2>, scalar_prefetch = 0 : i64, scratch_operands = 0 : i64, tpu.core_type = #tpu.core_type<tc>, window_params = [{transform_indices = @transform_0, window_bounds = array<i64: 1, 256, 32>}, {pipeline_mode = #tpu.pipeline_mode<synchronous>, transform_indices = @transform_1, window_bounds = array<i64: 32, 2>}, {pipeline_mode = #tpu.pipeline_mode<synchronous>, transform_indices = @transform_2, window_bounds = array<i64: 2, 32>}, {transform_indices = @transform_3, window_bounds = array<i64: 1, 1, 32>}, {transform_indices = @transform_4, window_bounds = array<i64: 1, 256, 2>}]} {
    %c0 = arith.constant 0 : index
    %c0_0 = arith.constant 0 : index
    %c0_1 = arith.constant 0 : index
    %0 = vector.load %arg1[%c0, %c0_0, %c0_1] : memref<1x256x32xf32, #tpu.memory_space<vmem>>, vector<1x256x32xf32>
    %1 = vector.shape_cast %0 : vector<1x256x32xf32> to vector<256x32xf32>
    %cst = arith.constant dense<0xFF800000> : vector<32xf32>
    %2 = vector.multi_reduction <maximumf>, %1, %cst [0] : vector<256x32xf32> to vector<32xf32>
    %3 = vector.shape_cast %2 : vector<32xf32> to vector<1x32xf32>
    %cst_2 = arith.constant dense<0.000000e+00> : vector<32xf32>
    %4 = vector.multi_reduction <add>, %1, %cst_2 [0] : vector<256x32xf32> to vector<32xf32>
    %5 = vector.shape_cast %4 : vector<32xf32> to vector<1x32xf32>
    %cst_3 = arith.constant 2.560000e+02 : f32
    %6 = vector.broadcast %cst_3 : f32 to vector<1x32xf32>
    %7 = arith.divf %5, %6 : vector<1x32xf32>
    %8 = tpu.concatenate %3, %7 in 0 : vector<1x32xf32>, vector<1x32xf32> -> vector<2x32xf32>
    %c0_4 = arith.constant 0 : index
    %c0_5 = arith.constant 0 : index
    %9 = vector.load %arg2[%c0_4, %c0_5] : memref<32x2xf32, #tpu.memory_space<vmem>>, vector<32x2xf32>
    %cst_6 = arith.constant dense<0.000000e+00> : vector<2x2xf32>
    %10 = tpu.matmul %8, %9, %cst_6 {dimension_numbers = #tpu.dot_dimension_numbers<[1], [0], [0], [1], [0, 0, 1, 1], [], []>} : vector<2x32xf32>, vector<32x2xf32>, vector<2x2xf32> -> vector<2x2xf32>
    %cst_7 = arith.constant 0.000000e+00 : f32
    %11 = vector.broadcast %cst_7 : f32 to vector<2x2xf32>
    %12 = arith.maximumf %10, %11 : vector<2x2xf32>
    %c0_8 = arith.constant 0 : index
    %c0_9 = arith.constant 0 : index
    %13 = vector.load %arg3[%c0_8, %c0_9] : memref<2x32xf32, #tpu.memory_space<vmem>>, vector<2x32xf32>
    %cst_10 = arith.constant dense<0.000000e+00> : vector<2x32xf32>
    %14 = tpu.matmul %12, %13, %cst_10 {dimension_numbers = #tpu.dot_dimension_numbers<[1], [0], [0], [1], [0, 0, 1, 1], [], []>} : vector<2x2xf32>, vector<2x32xf32>, vector<2x32xf32> -> vector<2x32xf32>
    %15 = vector.extract_strided_slice %14 {offsets = [0, 0], sizes = [1, 32], strides = [1, 1]} : vector<2x32xf32> to vector<1x32xf32>
    %16 = vector.extract_strided_slice %14 {offsets = [1, 0], sizes = [1, 32], strides = [1, 1]} : vector<2x32xf32> to vector<1x32xf32>
    %17 = arith.addf %15, %16 : vector<1x32xf32>
    %18 = arith.negf %17 : vector<1x32xf32>
    %19 = math.exp %18 : vector<1x32xf32>
    %cst_11 = arith.constant 1.000000e+00 : f32
    %20 = vector.broadcast %cst_11 : f32 to vector<1x32xf32>
    %21 = arith.addf %20, %19 : vector<1x32xf32>
    %22 = arith.divf %20, %21 : vector<1x32xf32>
    %c0_12 = arith.constant 0 : index
    %c0_13 = arith.constant 0 : index
    %c0_14 = arith.constant 0 : index
    %23 = vector.load %arg4[%c0_12, %c0_13, %c0_14] : memref<1x1x32xf32, #tpu.memory_space<vmem>>, vector<1x1x32xf32>
    %24 = vector.shape_cast %23 : vector<1x1x32xf32> to vector<1x32xf32>
    %25 = vector.shape_cast %22 : vector<1x32xf32> to vector<1x1x32xf32>
    tpu.vector_store %arg4[%c0_12, %c0_13, %c0_14], %25 {strides = array<i32>} : memref<1x1x32xf32, #tpu.memory_space<vmem>>, vector<1x1x32xf32>,
    %26 = vector.broadcast %22 : vector<1x32xf32> to vector<256x32xf32>
    %27 = arith.mulf %1, %26 : vector<256x32xf32>
    %cst_15 = arith.constant dense<0xFF800000> : vector<256xf32>
    %28 = vector.multi_reduction <maximumf>, %27, %cst_15 [1] : vector<256x32xf32> to vector<256xf32>
    %29 = vector.shape_cast %28 : vector<256xf32> to vector<256x1xf32>
    %cst_16 = arith.constant dense<0.000000e+00> : vector<256xf32>
    %30 = vector.multi_reduction <add>, %27, %cst_16 [1] : vector<256x32xf32> to vector<256xf32>
    %31 = vector.shape_cast %30 : vector<256xf32> to vector<256x1xf32>
    %cst_17 = arith.constant 3.125000e-02 : f32
    %32 = vector.broadcast %cst_17 : f32 to vector<256x1xf32>
    %33 = arith.mulf %31, %32 : vector<256x1xf32>
    %34 = tpu.concatenate %29, %33 in 1 : vector<256x1xf32>, vector<256x1xf32> -> vector<256x2xf32>
    %c0_18 = arith.constant 0 : index
    %c0_19 = arith.constant 0 : index
    %c0_20 = arith.constant 0 : index
    %35 = vector.load %arg5[%c0_18, %c0_19, %c0_20] : memref<1x256x2xf32, #tpu.memory_space<vmem>>, vector<1x256x2xf32>
    %36 = vector.shape_cast %35 : vector<1x256x2xf32> to vector<256x2xf32>
    %37 = vector.shape_cast %34 : vector<256x2xf32> to vector<1x256x2xf32>
    tpu.vector_store %arg5[%c0_18, %c0_19, %c0_20], %37 {strides = array<i32>} : memref<1x256x2xf32, #tpu.memory_space<vmem>>, vector<1x256x2xf32>,
    return
  }
  func.func @transform_0(%arg0: i32) -> (i32, i32, i32) {
    %c0_i32 = arith.constant 0 : i32
    %c0_i32_0 = arith.constant 0 : i32
    %c0_i32_1 = arith.constant 0 : i32
    return %arg0, %c0_i32, %c0_i32_0 : i32, i32, i32
  }
  func.func @transform_1(%arg0: i32) -> (i32, i32) {
    %c0_i32 = arith.constant 0 : i32
    %c0_i32_0 = arith.constant 0 : i32
    %c0_i32_1 = arith.constant 0 : i32
    return %c0_i32, %c0_i32_0 : i32, i32
  }
  func.func @transform_2(%arg0: i32) -> (i32, i32) {
    %c0_i32 = arith.constant 0 : i32
    %c0_i32_0 = arith.constant 0 : i32
    %c0_i32_1 = arith.constant 0 : i32
    return %c0_i32, %c0_i32_0 : i32, i32
  }
  func.func @transform_3(%arg0: i32) -> (i32, i32, i32) {
    %c0_i32 = arith.constant 0 : i32
    %c0_i32_0 = arith.constant 0 : i32
    %c0_i32_1 = arith.constant 0 : i32
    return %arg0, %c0_i32, %c0_i32_0 : i32, i32, i32
  }
  func.func @transform_4(%arg0: i32) -> (i32, i32, i32) {
    %c0_i32 = arith.constant 0 : i32
    %c0_i32_0 = arith.constant 0 : i32
    %c0_i32_1 = arith.constant 0 : i32
    return %arg0, %c0_i32, %c0_i32_0 : i32, i32, i32
  }
}

module attributes {stable_mosaic.version = 11 : i64} {
  func.func @_gate_conv_bn_relu_kernel(%arg0: i32, %arg1: memref<1x342x32xf32, #tpu.memory_space<vmem>>, %arg2: memref<1x1x32xf32, #tpu.memory_space<vmem>>, %arg3: memref<1x342x1xf32, #tpu.memory_space<vmem>>, %arg4: memref<288x128xbf16, #tpu.memory_space<vmem>>, %arg5: memref<1x128xf32, #tpu.memory_space<vmem>>, %arg6: memref<1x128xf32, #tpu.memory_space<vmem>>, %arg7: memref<1x128xf32, #tpu.memory_space<vmem>>, %arg8: memref<1x288x128xf32, #tpu.memory_space<vmem>>, %arg9: memref<342x32xf32, #tpu.memory_space<vmem>>) attributes {dimension_semantics = [#tpu.dimension_semantics<parallel>], iteration_bounds = array<i64: 2>, scalar_prefetch = 0 : i64, scratch_operands = 1 : i64, tpu.core_type = #tpu.core_type<tc>, window_params = [{transform_indices = @transform_0, window_bounds = array<i64: 1, 342, 32>}, {transform_indices = @transform_1, window_bounds = array<i64: 1, 1, 32>}, {transform_indices = @transform_2, window_bounds = array<i64: 1, 342, 1>}, {pipeline_mode = #tpu.pipeline_mode<synchronous>, transform_indices = @transform_3, window_bounds = array<i64: 288, 128>}, {pipeline_mode = #tpu.pipeline_mode<synchronous>, transform_indices = @transform_4, window_bounds = array<i64: 1, 128>}, {pipeline_mode = #tpu.pipeline_mode<synchronous>, transform_indices = @transform_5, window_bounds = array<i64: 1, 128>}, {pipeline_mode = #tpu.pipeline_mode<synchronous>, transform_indices = @transform_6, window_bounds = array<i64: 1, 128>}, {transform_indices = @transform_7, window_bounds = array<i64: 1, 288, 128>}]} {
    %c0 = arith.constant 0 : index
    %c0_0 = arith.constant 0 : index
    %c0_1 = arith.constant 0 : index
    %0 = vector.load %arg2[%c0, %c0_0, %c0_1] : memref<1x1x32xf32, #tpu.memory_space<vmem>>, vector<1x1x32xf32>
    %1 = vector.shape_cast %0 : vector<1x1x32xf32> to vector<1x32xf32>
    %c0_2 = arith.constant 0 : index
    %c0_3 = arith.constant 0 : index
    %c0_4 = arith.constant 0 : index
    %2 = vector.load %arg3[%c0_2, %c0_3, %c0_4] : memref<1x342x1xf32, #tpu.memory_space<vmem>>, vector<1x342x1xf32>
    %3 = vector.shape_cast %2 : vector<1x342x1xf32> to vector<342x1xf32>
    %4 = arith.negf %3 : vector<342x1xf32>
    %5 = math.exp %4 : vector<342x1xf32>
    %cst = arith.constant 1.000000e+00 : f32
    %6 = vector.broadcast %cst : f32 to vector<342x1xf32>
    %7 = arith.addf %6, %5 : vector<342x1xf32>
    %8 = arith.divf %6, %7 : vector<342x1xf32>
    %9 = vector.broadcast %1 : vector<1x32xf32> to vector<342x32xf32>
    %10 = vector.broadcast %8 : vector<342x1xf32> to vector<342x32xf32>
    %11 = arith.mulf %9, %10 : vector<342x32xf32>
    %c0_5 = arith.constant 0 : index
    %c0_6 = arith.constant 0 : index
    %c0_7 = arith.constant 0 : index
    %12 = vector.load %arg1[%c0_5, %c0_6, %c0_7] : memref<1x342x32xf32, #tpu.memory_space<vmem>>, vector<1x342x32xf32>
    %13 = vector.shape_cast %12 : vector<1x342x32xf32> to vector<342x32xf32>
    %14 = arith.mulf %13, %11 : vector<342x32xf32>
    %c0_8 = arith.constant 0 : index
    %c0_9 = arith.constant 0 : index
    %15 = vector.load %arg9[%c0_8, %c0_9] : memref<342x32xf32, #tpu.memory_space<vmem>>, vector<342x32xf32>
    tpu.vector_store %arg9[%c0_8, %c0_9], %14 {strides = array<i32>} : memref<342x32xf32, #tpu.memory_space<vmem>>, vector<342x32xf32>,
    %cst_10 = arith.constant 0.000000e+00 : f32
    %16 = vector.broadcast %cst_10 : f32 to vector<288x128xf32>
    %c0_11 = arith.constant 0 : index
    %c0_12 = arith.constant 0 : index
    %17 = vector.load %arg9[%c0_11, %c0_12] : memref<342x32xf32, #tpu.memory_space<vmem>>, vector<288x32xf32>
    %18 = arith.truncf %17 : vector<288x32xf32> to vector<288x32xbf16>
    %c0_13 = arith.constant 0 : index
    %c0_14 = arith.constant 0 : index
    %19 = vector.load %arg4[%c0_13, %c0_14] : memref<288x128xbf16, #tpu.memory_space<vmem>>, vector<32x128xbf16>
    %cst_15 = arith.constant dense<0.000000e+00> : vector<288x128xf32>
    %20 = tpu.matmul %18, %19, %cst_15 {dimension_numbers = #tpu.dot_dimension_numbers<[1], [0], [0], [1], [0, 0, 1, 1], [], []>} : vector<288x32xbf16>, vector<32x128xbf16>, vector<288x128xf32> -> vector<288x128xf32>
    %21 = arith.addf %16, %20 : vector<288x128xf32>
    %c1 = arith.constant 1 : index
    %c0_16 = arith.constant 0 : index
    %22 = vector.load %arg9[%c1, %c0_16] : memref<342x32xf32, #tpu.memory_space<vmem>>, vector<288x32xf32>
    %23 = arith.truncf %22 : vector<288x32xf32> to vector<288x32xbf16>
    %c32 = arith.constant 32 : index
    %c0_17 = arith.constant 0 : index
    %24 = vector.load %arg4[%c32, %c0_17] : memref<288x128xbf16, #tpu.memory_space<vmem>>, vector<32x128xbf16>
    %cst_18 = arith.constant dense<0.000000e+00> : vector<288x128xf32>
    %25 = tpu.matmul %23, %24, %cst_18 {dimension_numbers = #tpu.dot_dimension_numbers<[1], [0], [0], [1], [0, 0, 1, 1], [], []>} : vector<288x32xbf16>, vector<32x128xbf16>, vector<288x128xf32> -> vector<288x128xf32>
    %26 = arith.addf %21, %25 : vector<288x128xf32>
    %c2 = arith.constant 2 : index
    %c0_19 = arith.constant 0 : index
    %27 = vector.load %arg9[%c2, %c0_19] : memref<342x32xf32, #tpu.memory_space<vmem>>, vector<288x32xf32>
    %28 = arith.truncf %27 : vector<288x32xf32> to vector<288x32xbf16>
    %c64 = arith.constant 64 : index
    %c0_20 = arith.constant 0 : index
    %29 = vector.load %arg4[%c64, %c0_20] : memref<288x128xbf16, #tpu.memory_space<vmem>>, vector<32x128xbf16>
    %cst_21 = arith.constant dense<0.000000e+00> : vector<288x128xf32>
    %30 = tpu.matmul %28, %29, %cst_21 {dimension_numbers = #tpu.dot_dimension_numbers<[1], [0], [0], [1], [0, 0, 1, 1], [], []>} : vector<288x32xbf16>, vector<32x128xbf16>, vector<288x128xf32> -> vector<288x128xf32>
    %31 = arith.addf %26, %30 : vector<288x128xf32>
    %c18 = arith.constant 18 : index
    %c0_22 = arith.constant 0 : index
    %32 = vector.load %arg9[%c18, %c0_22] : memref<342x32xf32, #tpu.memory_space<vmem>>, vector<288x32xf32>
    %33 = arith.truncf %32 : vector<288x32xf32> to vector<288x32xbf16>
    %c96 = arith.constant 96 : index
    %c0_23 = arith.constant 0 : index
    %34 = vector.load %arg4[%c96, %c0_23] : memref<288x128xbf16, #tpu.memory_space<vmem>>, vector<32x128xbf16>
    %cst_24 = arith.constant dense<0.000000e+00> : vector<288x128xf32>
    %35 = tpu.matmul %33, %34, %cst_24 {dimension_numbers = #tpu.dot_dimension_numbers<[1], [0], [0], [1], [0, 0, 1, 1], [], []>} : vector<288x32xbf16>, vector<32x128xbf16>, vector<288x128xf32> -> vector<288x128xf32>
    %36 = arith.addf %31, %35 : vector<288x128xf32>
    %c19 = arith.constant 19 : index
    %c0_25 = arith.constant 0 : index
    %37 = vector.load %arg9[%c19, %c0_25] : memref<342x32xf32, #tpu.memory_space<vmem>>, vector<288x32xf32>
    %38 = arith.truncf %37 : vector<288x32xf32> to vector<288x32xbf16>
    %c128 = arith.constant 128 : index
    %c0_26 = arith.constant 0 : index
    %39 = vector.load %arg4[%c128, %c0_26] : memref<288x128xbf16, #tpu.memory_space<vmem>>, vector<32x128xbf16>
    %cst_27 = arith.constant dense<0.000000e+00> : vector<288x128xf32>
    %40 = tpu.matmul %38, %39, %cst_27 {dimension_numbers = #tpu.dot_dimension_numbers<[1], [0], [0], [1], [0, 0, 1, 1], [], []>} : vector<288x32xbf16>, vector<32x128xbf16>, vector<288x128xf32> -> vector<288x128xf32>
    %41 = arith.addf %36, %40 : vector<288x128xf32>
    %c20 = arith.constant 20 : index
    %c0_28 = arith.constant 0 : index
    %42 = vector.load %arg9[%c20, %c0_28] : memref<342x32xf32, #tpu.memory_space<vmem>>, vector<288x32xf32>
    %43 = arith.truncf %42 : vector<288x32xf32> to vector<288x32xbf16>
    %c160 = arith.constant 160 : index
    %c0_29 = arith.constant 0 : index
    %44 = vector.load %arg4[%c160, %c0_29] : memref<288x128xbf16, #tpu.memory_space<vmem>>, vector<32x128xbf16>
    %cst_30 = arith.constant dense<0.000000e+00> : vector<288x128xf32>
    %45 = tpu.matmul %43, %44, %cst_30 {dimension_numbers = #tpu.dot_dimension_numbers<[1], [0], [0], [1], [0, 0, 1, 1], [], []>} : vector<288x32xbf16>, vector<32x128xbf16>, vector<288x128xf32> -> vector<288x128xf32>
    %46 = arith.addf %41, %45 : vector<288x128xf32>
    %c36 = arith.constant 36 : index
    %c0_31 = arith.constant 0 : index
    %47 = vector.load %arg9[%c36, %c0_31] : memref<342x32xf32, #tpu.memory_space<vmem>>, vector<288x32xf32>
    %48 = arith.truncf %47 : vector<288x32xf32> to vector<288x32xbf16>
    %c192 = arith.constant 192 : index
    %c0_32 = arith.constant 0 : index
    %49 = vector.load %arg4[%c192, %c0_32] : memref<288x128xbf16, #tpu.memory_space<vmem>>, vector<32x128xbf16>
    %cst_33 = arith.constant dense<0.000000e+00> : vector<288x128xf32>
    %50 = tpu.matmul %48, %49, %cst_33 {dimension_numbers = #tpu.dot_dimension_numbers<[1], [0], [0], [1], [0, 0, 1, 1], [], []>} : vector<288x32xbf16>, vector<32x128xbf16>, vector<288x128xf32> -> vector<288x128xf32>
    %51 = arith.addf %46, %50 : vector<288x128xf32>
    %c37 = arith.constant 37 : index
    %c0_34 = arith.constant 0 : index
    %52 = vector.load %arg9[%c37, %c0_34] : memref<342x32xf32, #tpu.memory_space<vmem>>, vector<288x32xf32>
    %53 = arith.truncf %52 : vector<288x32xf32> to vector<288x32xbf16>
    %c224 = arith.constant 224 : index
    %c0_35 = arith.constant 0 : index
    %54 = vector.load %arg4[%c224, %c0_35] : memref<288x128xbf16, #tpu.memory_space<vmem>>, vector<32x128xbf16>
    %cst_36 = arith.constant dense<0.000000e+00> : vector<288x128xf32>
    %55 = tpu.matmul %53, %54, %cst_36 {dimension_numbers = #tpu.dot_dimension_numbers<[1], [0], [0], [1], [0, 0, 1, 1], [], []>} : vector<288x32xbf16>, vector<32x128xbf16>, vector<288x128xf32> -> vector<288x128xf32>
    %56 = arith.addf %51, %55 : vector<288x128xf32>
    %c38 = arith.constant 38 : index
    %c0_37 = arith.constant 0 : index
    %57 = vector.load %arg9[%c38, %c0_37] : memref<342x32xf32, #tpu.memory_space<vmem>>, vector<288x32xf32>
    %58 = arith.truncf %57 : vector<288x32xf32> to vector<288x32xbf16>
    %c256 = arith.constant 256 : index
    %c0_38 = arith.constant 0 : index
    %59 = vector.load %arg4[%c256, %c0_38] : memref<288x128xbf16, #tpu.memory_space<vmem>>, vector<32x128xbf16>
    %cst_39 = arith.constant dense<0.000000e+00> : vector<288x128xf32>
    %60 = tpu.matmul %58, %59, %cst_39 {dimension_numbers = #tpu.dot_dimension_numbers<[1], [0], [0], [1], [0, 0, 1, 1], [], []>} : vector<288x32xbf16>, vector<32x128xbf16>, vector<288x128xf32> -> vector<288x128xf32>
    %61 = arith.addf %56, %60 : vector<288x128xf32>
    %c0_40 = arith.constant 0 : index
    %c0_41 = arith.constant 0 : index
    %62 = vector.load %arg5[%c0_40, %c0_41] : memref<1x128xf32, #tpu.memory_space<vmem>>, vector<1x128xf32>
    %63 = vector.broadcast %62 : vector<1x128xf32> to vector<288x128xf32>
    %64 = arith.addf %61, %63 : vector<288x128xf32>
    %c0_42 = arith.constant 0 : index
    %c0_43 = arith.constant 0 : index
    %65 = vector.load %arg6[%c0_42, %c0_43] : memref<1x128xf32, #tpu.memory_space<vmem>>, vector<1x128xf32>
    %66 = vector.broadcast %65 : vector<1x128xf32> to vector<288x128xf32>
    %67 = arith.mulf %64, %66 : vector<288x128xf32>
    %c0_44 = arith.constant 0 : index
    %c0_45 = arith.constant 0 : index
    %68 = vector.load %arg7[%c0_44, %c0_45] : memref<1x128xf32, #tpu.memory_space<vmem>>, vector<1x128xf32>
    %69 = vector.broadcast %68 : vector<1x128xf32> to vector<288x128xf32>
    %70 = arith.addf %67, %69 : vector<288x128xf32>
    %cst_46 = arith.constant 0.000000e+00 : f32
    %71 = vector.broadcast %cst_46 : f32 to vector<288x128xf32>
    %72 = arith.maximumf %70, %71 : vector<288x128xf32>
    %c0_47 = arith.constant 0 : index
    %c0_48 = arith.constant 0 : index
    %c0_49 = arith.constant 0 : index
    %73 = vector.load %arg8[%c0_47, %c0_48, %c0_49] : memref<1x288x128xf32, #tpu.memory_space<vmem>>, vector<1x288x128xf32>
    %74 = vector.shape_cast %73 : vector<1x288x128xf32> to vector<288x128xf32>
    %75 = vector.shape_cast %72 : vector<288x128xf32> to vector<1x288x128xf32>
    tpu.vector_store %arg8[%c0_47, %c0_48, %c0_49], %75 {strides = array<i32>} : memref<1x288x128xf32, #tpu.memory_space<vmem>>, vector<1x288x128xf32>,
    return
  }
  func.func @transform_0(%arg0: i32) -> (i32, i32, i32) {
    %c0_i32 = arith.constant 0 : i32
    %c0_i32_0 = arith.constant 0 : i32
    %c0_i32_1 = arith.constant 0 : i32
    return %arg0, %c0_i32, %c0_i32_0 : i32, i32, i32
  }
  func.func @transform_1(%arg0: i32) -> (i32, i32, i32) {
    %c0_i32 = arith.constant 0 : i32
    %c0_i32_0 = arith.constant 0 : i32
    %c0_i32_1 = arith.constant 0 : i32
    return %arg0, %c0_i32, %c0_i32_0 : i32, i32, i32
  }
  func.func @transform_2(%arg0: i32) -> (i32, i32, i32) {
    %c0_i32 = arith.constant 0 : i32
    %c0_i32_0 = arith.constant 0 : i32
    %c0_i32_1 = arith.constant 0 : i32
    return %arg0, %c0_i32, %c0_i32_0 : i32, i32, i32
  }
  func.func @transform_3(%arg0: i32) -> (i32, i32) {
    %c0_i32 = arith.constant 0 : i32
    %c0_i32_0 = arith.constant 0 : i32
    %c0_i32_1 = arith.constant 0 : i32
    return %c0_i32, %c0_i32_0 : i32, i32
  }
  func.func @transform_4(%arg0: i32) -> (i32, i32) {
    %c0_i32 = arith.constant 0 : i32
    %c0_i32_0 = arith.constant 0 : i32
    %c0_i32_1 = arith.constant 0 : i32
    return %c0_i32, %c0_i32_0 : i32, i32
  }
  func.func @transform_5(%arg0: i32) -> (i32, i32) {
    %c0_i32 = arith.constant 0 : i32
    %c0_i32_0 = arith.constant 0 : i32
    %c0_i32_1 = arith.constant 0 : i32
    return %c0_i32, %c0_i32_0 : i32, i32
  }
  func.func @transform_6(%arg0: i32) -> (i32, i32) {
    %c0_i32 = arith.constant 0 : i32
    %c0_i32_0 = arith.constant 0 : i32
    %c0_i32_1 = arith.constant 0 : i32
    return %c0_i32, %c0_i32_0 : i32, i32
  }
  func.func @transform_7(%arg0: i32) -> (i32, i32, i32) {
    %c0_i32 = arith.constant 0 : i32
    %c0_i32_0 = arith.constant 0 : i32
    %c0_i32_1 = arith.constant 0 : i32
    return %arg0, %c0_i32, %c0_i32_0 : i32, i32, i32
  }
}

</mosaic_0001>

<bundles_post_ra>
// kernel: cbam_conv_forward.2
= control target key start
LH: loop header
LB: loop body
LE: loop exit
PB: predicated region body
PF: predicated region fallthrough
CT: control target
= control target key end

     0   :  { %s1053_s15 = smov 0   ;;  %s1687_s0 = inlined_call_operand.vmem [shape: f32[2,256,32], index: 0, kind: input, shape index: {}]   ;;  %s1688_s1 = inlined_call_operand.vmem [shape: f32[32,2], index: 1, kind: input, shape index: {}]   ;;  %s1689_s2 = inlined_call_operand.vmem [shape: f32[2,32], index: 2, kind: input, shape index: {}]   ;;  %s1690_s3 = inlined_call_operand.vmem [shape: f32[2,1,32], index: 3, kind: output, shape index: {0}]   ;;  %s1691_s4 = inlined_call_operand.vmem [shape: f32[2,256,2], index: 4, kind: output, shape index: {1}]  }
   0x1 LB: > { %s956_s16 = sadd.s32 4294967295, %s1023_s15   ;;  %p960_p0 = scmp.ge.s32.totalorder %s1023_s15, 1  ;;  %s1023_s15 = sphi %s1053_s15, %s15_s15  }
   0x2   : > { %p165_p1 = scmp.lt.s32.totalorder %s1023_s15, 3 }
   0x4   : > { %p166_p2 = pnand %p960_p0, %p165_p1 }
   0x5   : > { %v382_v0 = vld [vmem:[%s1688_s1] sm:$0xff] (!%p166_p2)  ;;  %v383_v1 = vld [vmem:[%s1688_s1 + $0x8] sm:$0xff] (!%p166_p2)  ;;  %v384_v2 = vld [vmem:[%s1688_s1 + $0x10] sm:$0xff] (!%p166_p2)  ;;  %v1025_v3 = vmov (!%p166_p2), 0.0|0.0   ;;  %vm1026_vm0 = vmmov (!%p166_p2), 0   ;;  %v1027_v6 = vmov (!%p166_p2), 0.0  }
   0x6   : > { %169 = sbr.rel (%p166_p2) target bundleno = 824 (0x338), region = 32  ;;  %996 = vmatprep.subr.bf16.mxu0 (!%p166_p2), %v1025_v3  ;;  %v997_v4 = vpack.c.bf16 (!%p166_p2), %v383_v1, %v382_v0  ;;  %v385_v5 = vld [vmem:[%s1688_s1 + $0x18] sm:$0xff] (!%p166_p2)  ;;  %988 = vmatprep.mubr.msk.f32.mxu0 (!%p166_p2), %vm1026_vm0, %v1027_v6  ;;  %p194_p3 = scmp.lt.s32.totalorder (!%p166_p2), %s956_s16, 1  ;;  %vm239_vm1 = vcmask (!%p166_p2), 261120   ;;  %vm380_vm2 = vcmask (!%p166_p2), 1040384   ;;  %vm465_vm3 = vcmask (!%p166_p2), 1041408  }
   0x7   : > { %991 = vmatprep.subr.mxu1 (!%p166_p2), %v1027_v6  ;;  %993 = vmatprep.mubr.msk.f32.mxu1 (!%p166_p2), %vm1026_vm0, %v1027_v6  ;;  %v1000_v7 = vpack.c.bf16 (!%p166_p2), %v385_v5, %v384_v2  ;;  %vm461_vm4 = vcmask (!%p166_p2), 15360   ;;  %vm549_vm5 = vcmask (!%p166_p2), 253952   ;;  %vm811_vm6 = vcmask (!%p166_p2), 7168  }
   0x8   : > { %998 = vmatpush3.bf16.msra.mxu0 (!%p166_p2), %v997_v4 }
   0x9   : > { %999 = vmatprep.subr.bf16.mxu0 (!%p166_p2), %v1025_v3 }
   0xc   : > { %1001 = vmatpush3.bf16.msra.mxu0 (!%p166_p2), %v1000_v7 }
   0xd   : > { %s1693_s16 = smov (!%p194_p3, %s956_s16), 1 }
   0xe   : > { %s971_s25 = sshll.u32 %s1693_s16, 8  ;;  %s201_s7 = scalar_lea.vmem %s1690_s3, %s1693_s16 }
   0xf   : > { %s1081_s28 = scalar_lea.vmem %s1687_s0, %s971_s25  ;;  %s1569_s10 = scalar_lea.vmem %s1691_s4, %s971_s25 }
  0x10   : > { %v1084_v8 = vld [vmem:[%s1081_s28] sm:$0xff]  ;;  %v1087_v9 = vld [vmem:[%s1081_s28 + $0x8] sm:$0xff]  ;;  %v1090_v10 = vld [vmem:[%s1081_s28 + $0x10] sm:$0xff] }
  0x11   : > { %v1093_v11 = vld [vmem:[%s1081_s28 + $0x18] sm:$0xff]  ;;  %v309_v12 = vsel %vm239_vm1, %v1084_v8, 0.0  ;;  %v310_v13 = vsel %vm239_vm1, %v1087_v9, 0.0  ;;  %v1100_v14 = vld [vmem:[%s1081_s28 + $0x20] sm:$0xff]  ;;  %v312_v16 = vsel %vm239_vm1, %v1090_v10, 0.0  ;;  %v1107_v18 = vld [vmem:[%s1081_s28 + $0x28] sm:$0xff] }
  0x12   : > { %v311_v15 = vadd.f32 %v310_v13, %v309_v12  ;;  %v314_v17 = vsel %vm239_vm1, %v1093_v11, 0.0  ;;  %v316_v20 = vsel %vm239_vm1, %v1100_v14, 0.0  ;;  %v1112_v21 = vld [vmem:[%s1081_s28 + $0x30] sm:$0xff]  ;;  %v318_v23 = vsel %vm239_vm1, %v1107_v18, 0.0  ;;  %v1117_v24 = vld [vmem:[%s1081_s28 + $0x38] sm:$0xff]  ;;  %v1122_v27 = vld [vmem:[%s1081_s28 + $0x40] sm:$0xff] }
  0x13   : > { %v320_v26 = vsel %vm239_vm1, %v1112_v21, 0.0  ;;  %v240_v29 = vsel %vm239_vm1, %v1084_v8, -inf  ;;  %v241_v30 = vsel %vm239_vm1, %v1087_v9, -inf  ;;  %v322_v31 = vsel %vm239_vm1, %v1117_v24, 0.0  ;;  %v1131_v32 = vld [vmem:[%s1081_s28 + $0x48] sm:$0xff]  ;;  %v1148_v41 = vld [vmem:[%s1081_s28 + $0x50] sm:$0xff] }
  0x14   : > { %v313_v19 = vadd.f32 %v312_v16, %v311_v15  ;;  %v242_v33 = vsel %vm239_vm1, %v1090_v10, -inf  ;;  %v243_v34 = vsel %vm239_vm1, %v1093_v11, -inf  ;;  %v244_v35 = vsel %vm239_vm1, %v1100_v14, -inf  ;;  %v1153_v45 = vld [vmem:[%s1081_s28 + $0x58] sm:$0xff]  ;;  %v1164_v54 = vld [vmem:[%s1081_s28 + $0x60] sm:$0xff]  ;;  %v1171_v58 = vld [vmem:[%s1081_s28 + $0x68] sm:$0xff] }
  0x15   : > { %v246_v37 = vsel %vm239_vm1, %v1107_v18, -inf  ;;  %v248_v38 = vsel %vm239_vm1, %v1112_v21, -inf  ;;  %v250_v39 = vsel %vm239_vm1, %v1117_v24, -inf  ;;  %v324_v40 = vsel %vm239_vm1, %v1122_v27, 0.0  ;;  %v1174_v63 = vld [vmem:[%s1081_s28 + $0x70] sm:$0xff]  ;;  %v1177_v0 = vld [vmem:[%s1081_s28 + $0x78] sm:$0xff] }
  0x16   : > { %v315_v22 = vadd.f32 %v314_v17, %v313_v19  ;;  %v245_v43 = vmax.f32 %v240_v29, %v244_v35  ;;  %v326_v44 = vsel %vm239_vm1, %v1131_v32, 0.0  ;;  %v247_v46 = vmax.f32 %v241_v30, %v246_v37  ;;  %v1192_v13 = vld [vmem:[%s1081_s28 + $0x80] sm:$0xff]  ;;  %v1195_v19 = vld [vmem:[%s1081_s28 + $0x88] sm:$0xff] }
  0x17   : > { %v249_v47 = vmax.f32 %v242_v33, %v248_v38  ;;  %v251_v48 = vmax.f32 %v243_v34, %v250_v39  ;;  %v252_v50 = vsel %vm239_vm1, %v1122_v27, -inf  ;;  %v254_v51 = vsel %vm239_vm1, %v1131_v32, -inf  ;;  %v1216_v37 = vld [vmem:[%s1081_s28 + $0xa0] sm:$0xff]  ;;  %v1219_v38 = vld [vmem:[%s1081_s28 + $0xa8] sm:$0xff]  ;;  %v1222_v39 = vld [vmem:[%s1081_s28 + $0xb0] sm:$0xff] }
  0x18   : > { %v317_v25 = vadd.f32 %v316_v20, %v315_v22  ;;  %v256_v52 = vsel %vm239_vm1, %v1148_v41, -inf  ;;  %v328_v53 = vsel %vm239_vm1, %v1148_v41, 0.0  ;;  %v258_v55 = vsel %vm239_vm1, %v1153_v45, -inf  ;;  %v1198_v20 = vld [vmem:[%s1081_s28 + $0x90] sm:$0xff]  ;;  %v1201_v22 = vld [vmem:[%s1081_s28 + $0x98] sm:$0xff] }
  0x19   : > { %v330_v57 = vsel %vm239_vm1, %v1153_v45, 0.0  ;;  %v253_v59 = vmax.f32 %v245_v43, %v252_v50  ;;  %v255_v60 = vmax.f32 %v247_v46, %v254_v51  ;;  %v257_v61 = vmax.f32 %v249_v47, %v256_v52  ;;  %v1227_v46 = vld [vmem:[%s1081_s28 + $0xb8] sm:$0xff] }
  0x1a   : > { %v319_v28 = vadd.f32 %v318_v23, %v317_v25  ;;  %v259_v1 = vmax.f32 %v251_v48, %v258_v55  ;;  %v260_v2 = vsel %vm239_vm1, %v1164_v54, -inf  ;;  %v262_v3 = vsel %vm239_vm1, %v1171_v58, -inf  ;;  %v1240_v55 = vld [vmem:[%s1081_s28 + $0xc0] sm:$0xff] }
  0x1b   : > { %v332_v4 = vsel %vm239_vm1, %v1164_v54, 0.0  ;;  %v264_v5 = vsel %vm239_vm1, %v1174_v63, -inf  ;;  %v266_v6 = vsel %vm239_vm1, %v1177_v0, -inf  ;;  %v334_v12 = vsel %vm239_vm1, %v1171_v58, 0.0 }
  0x1c   : > { %v321_v36 = vadd.f32 %v320_v26, %v319_v28  ;;  %v261_v15 = vmax.f32 %v253_v59, %v260_v2  ;;  %v263_v16 = vmax.f32 %v255_v60, %v262_v3  ;;  %v265_v23 = vmax.f32 %v257_v61, %v264_v5 }
  0x1d   : > { %v267_v25 = vmax.f32 %v259_v1, %v266_v6  ;;  %v268_v26 = vsel %vm239_vm1, %v1192_v13, -inf  ;;  %v336_v28 = vsel %vm239_vm1, %v1174_v63, 0.0  ;;  %v270_v29 = vsel %vm239_vm1, %v1195_v19, -inf  ;;  %v1251_v1 = vld [vmem:[%s1081_s28 + $0xd8] sm:$0xff] }
  0x1e   : > { %v323_v42 = vadd.f32 %v322_v31, %v321_v36  ;;  %v272_v30 = vsel %vm239_vm1, %v1198_v20, -inf  ;;  %v274_v31 = vsel %vm239_vm1, %v1201_v22, -inf  ;;  %v338_v34 = vsel %vm239_vm1, %v1177_v0, 0.0 }
  0x1f   : > { %v269_v35 = vmax.f32 %v261_v15, %v268_v26  ;;  %v275_v43 = vmax.f32 %v267_v25, %v274_v31  ;;  %v276_v47 = vsel %vm239_vm1, %v1216_v37, -inf  ;;  %v278_v48 = vsel %vm239_vm1, %v1219_v38, -inf  ;;  %v1264_v15 = vld [vmem:[%s1081_s28 + $0xf0] sm:$0xff] }
  0x20   : > { %v325_v49 = vadd.f32 %v324_v40, %v323_v42  ;;  %v271_v40 = vmax.f32 %v263_v16, %v270_v29  ;;  %v273_v42 = vmax.f32 %v265_v23, %v272_v30  ;;  %v282_v51 = vsel %vm239_vm1, %v1227_v46, -inf  ;;  %v1267_v16 = vld [vmem:[%s1081_s28 + $0xf8] sm:$0xff]  ;;  %v1270_v23 = vld [vmem:[%s1081_s28 + $0xe0] sm:$0xff]  ;;  %v1275_v29 = vld [vmem:[%s1081_s28 + $0xe8] sm:$0xff] }
  0x21   : > { %v342_v52 = vsel %vm239_vm1, %v1195_v19, 0.0  ;;  %v344_v61 = vsel %vm239_vm1, %v1198_v20, 0.0  ;;  %v283_v2 = vmax.f32 %v275_v43, %v282_v51  ;;  %v284_v3 = vsel %vm239_vm1, %v1240_v55, -inf }
  0x22   : > { %v327_v56 = vadd.f32 %v326_v44, %v325_v49  ;;  %v340_v44 = vsel %vm239_vm1, %v1192_v13, 0.0  ;;  %v280_v49 = vsel %vm239_vm1, %v1222_v39, -inf  ;;  %v279_v59 = vmax.f32 %v271_v40, %v278_v48 }
  0x23   : > { %v281_v60 = vmax.f32 %v273_v42, %v280_v49  ;;  %v298_v40 = vsel %vm239_vm1, %v1267_v16, -inf  ;;  %v350_v42 = vsel %vm239_vm1, %v1219_v38, 0.0 }
  0x24   : > { %v329_v62 = vadd.f32 %v328_v53, %v327_v56  ;;  %v1243_v56 = vld [vmem:[%s1081_s28 + $0xc8] sm:$0xff] }
  0x26   : > { %v331_v7 = vadd.f32 %v330_v57, %v329_v62  ;;  %v277_v57 = vmax.f32 %v269_v35, %v276_v47  ;;  %v1248_v62 = vld [vmem:[%s1081_s28 + $0xd0] sm:$0xff]  ;;  %v294_v35 = vsel %vm239_vm1, %v1275_v29, -inf  ;;  %v352_v47 = vsel %vm239_vm1, %v1222_v39, 0.0 }
  0x27   : > { %v288_v6 = vsel %vm239_vm1, %v1248_v62, -inf }
  0x28   : > { %v333_v17 = vadd.f32 %v332_v4, %v331_v7  ;;  %v286_v4 = vsel %vm239_vm1, %v1243_v56, -inf  ;;  %v290_v7 = vsel %vm239_vm1, %v1251_v1, -inf  ;;  %v285_v25 = vmax.f32 %v277_v57, %v284_v3 }
  0x29   : > { %v287_v26 = vmax.f32 %v279_v59, %v286_v4  ;;  %v289_v30 = vmax.f32 %v281_v60, %v288_v6  ;;  %v291_v31 = vmax.f32 %v283_v2, %v290_v7  ;;  %v356_v57 = vsel %vm239_vm1, %v1240_v55, 0.0 }
  0x2a   : > { %v335_v33 = vadd.f32 %v334_v12, %v333_v17  ;;  %v346_v12 = vsel %vm239_vm1, %v1201_v22, 0.0  ;;  %v358_v2 = vsel %vm239_vm1, %v1243_v56, 0.0  ;;  %v360_v4 = vsel %vm239_vm1, %v1248_v62, 0.0 }
  0x2b   : > { %v295_v48 = vmax.f32 %v287_v26, %v294_v35  ;;  %v362_v7 = vsel %vm239_vm1, %v1251_v1, 0.0  ;;  %v370_v35 = vsel %vm239_vm1, %v1267_v16, 0.0 }
  0x2c   : > { %v337_v36 = vadd.f32 %v336_v28, %v335_v33  ;;  %v348_v28 = vsel %vm239_vm1, %v1216_v37, 0.0  ;;  %v292_v33 = vsel %vm239_vm1, %v1270_v23, -inf }
  0x2e   : > { %v339_v50 = vadd.f32 %v338_v34, %v337_v36  ;;  %v296_v36 = vsel %vm239_vm1, %v1264_v15, -inf }
  0x2f   : > { %v297_v49 = vmax.f32 %v289_v30, %v296_v36 }
  0x30   : > { %v341_v53 = vadd.f32 %v340_v44, %v339_v50  ;;  %v293_v44 = vmax.f32 %v285_v25, %v292_v33  ;;  %v299_v50 = vmax.f32 %v291_v31, %v298_v40  ;;  %v368_v31 = vsel %vm239_vm1, %v1264_v15, 0.0 }
  0x32   : > { %v343_v5 = vadd.f32 %v342_v52, %v341_v53  ;;  %v354_v52 = vsel %vm239_vm1, %v1227_v46, 0.0  ;;  %v300_v59 = vmax.f32 %v293_v44, %v295_v48  ;;  %v301_v60 = vmax.f32 %v297_v49, %v299_v50 }
  0x34   : > { %v345_v17 = vadd.f32 %v344_v61, %v343_v5  ;;  %v302_v5 = vmax.f32 %v300_v59, %v301_v60  ;;  %v460_v60 = vld [vmem:[%s1689_s2] sm:$0x3] }
  0x35   : > { %992 = vmatpush3.msk.msra.mxu1 %vm465_vm3, %v460_v60 }
  0x36   : > { %v347_v34 = vadd.f32 %v346_v12, %v345_v17  ;;  %v364_v17 = vsel %vm239_vm1, %v1270_v23, 0.0  ;;  %v303_v25 = vrot.slane %v302_v5, 4 }
  0x38   : > { %v349_v43 = vadd.f32 %v348_v28, %v347_v34  ;;  %v366_v28 = vsel %vm239_vm1, %v1275_v29, 0.0  ;;  %v304_v33 = vmax.f32 %v302_v5, %v303_v25 }
  0x3a   : > { %v351_v51 = vadd.f32 %v350_v42, %v349_v43  ;;  %v305_v40 = vrot.slane %v304_v33, 2 }
  0x3c   : > { %v353_v53 = vadd.f32 %v352_v47, %v351_v51  ;;  %v306_v44 = vmax.f32 %v304_v33, %v305_v40 }
  0x3e   : > { %v355_v61 = vadd.f32 %v354_v52, %v353_v53  ;;  %v307_v49 = vrot.slane %v306_v44, 1 }
  0x40   : > { %v357_v3 = vadd.f32 %v356_v57, %v355_v61  ;;  %v308_v52 = vmax.f32 %v306_v44, %v307_v49 }
  0x42   : > { %v359_v6 = vadd.f32 %v358_v2, %v357_v3 }
  0x44   : > { %v361_v12 = vadd.f32 %v360_v4, %v359_v6 }
  0x46   : > { %v363_v26 = vadd.f32 %v362_v7, %v361_v12 }
  0x48   : > { %v365_v30 = vadd.f32 %v364_v17, %v363_v26  ;;  %v551_v26 = vlaneseq }
  0x4a   : > { %v367_v34 = vadd.f32 %v366_v28, %v365_v30  ;;  %v552_v28 = vshrl.u32 %v551_v26, 7 }
  0x4c   : > { %v369_v36 = vadd.f32 %v368_v31, %v367_v34  ;;  %v553_v30 = vsub.s32 0, %v552_v28 }
  0x4e   : > { %v371_v42 = vadd.f32 %v370_v35, %v369_v36 }
  0x50   : > { %v372_v43 = vrot.slane %v371_v42, 4 }
  0x52   : > { %v373_v47 = vadd.f32 %v372_v43, %v371_v42 }
  0x54   : > { %v374_v48 = vrot.slane %v373_v47, 2 }
  0x56   : > { %v375_v50 = vadd.f32 %v374_v48, %v373_v47 }
  0x58   : > { %v376_v51 = vrot.slane %v375_v50, 1 }
  0x5a   : > { %v377_v53 = vadd.f32 %v376_v51, %v375_v50 }
  0x5c   : > { %v379_v57 = vmul.f32 0.00390625, %v377_v53 }
  0x5e   : > { %v381_v59 = vsel %vm380_vm2, %v308_v52, %v379_v57 }
  0x5f   : > { %989 = vmatmul.mubr.msk.f32.vlgmr.msra.gmra.mrb[0].mxu0 %vm239_vm1, %v381_v59 }
 0x132   : > { %v455_v61 = vpop.f32.mrb[0].mxu0 }
 0x133   : > { %v459_v2 = vmax.f32 %v455_v61, 0.0  ;;  %v990_v3 = vpop.f32.mrb[1].mxu0 }
 0x135   : > { %994 = vmatmul.mubr.msk.f32.vlgmr.msra.gmra.mrb[0].mxu1 %vm461_vm4, %v459_v2 }
 0x208   : > { %v535_v4 = vpop.f32.mrb[0].mxu1 }
 0x209   : > { %v540_v5 = vrot.slane %v535_v4, 1  ;;  %v995_v6 = vpop.f32.mrb[1].mxu1 }
 0x20b   : > { %v542_v7 = vadd.f32 %v540_v5, %v535_v4 }
 0x20d   : > { %v968_v12 = vmul.f32 -1.442695, %v542_v7 }
 0x20f   : > { %1013 = vpow2.f32 %v968_v12 }
 0x219   : > { %v1014_v17 = vpop.eup %1013 }
 0x21a   : > { %v546_v25 = vadd.f32 1.0, %v1014_v17 }
 0x21c   : > { %1015 = vrcp.f32 %v546_v25 }
 0x226   : > { %v1016_v31 = vpop.eup %1015 }
 0x227   : > { %550 = vst.msk [vmem:[%s201_s7] sm:$0x1] %vm549_vm5, %v1016_v31  ;;  %v1316_v33 = vrot.slane %v1016_v31, %v553_v30 }
 0x229   : > { %v1320_v34 = vmul.f32 %v1316_v33, %v1090_v10  ;;  %v1324_v35 = vmul.f32 %v1316_v33, %v1084_v8  ;;  %v1332_v42 = vmul.f32 %v1316_v33, %v1093_v11  ;;  %v1336_v43 = vmul.f32 %v1316_v33, %v1087_v9 }
 0x22a   : > { %v1344_v44 = vmul.f32 %v1316_v33, %v1107_v18  ;;  %v1348_v11 = vmul.f32 %v1316_v33, %v1100_v14  ;;  %v1356_v48 = vmul.f32 %v1316_v33, %v1117_v24  ;;  %v1360_v18 = vmul.f32 %v1316_v33, %v1112_v21 }
 0x22b   : > { %v593_v36 = vsel %vm239_vm1, %v1320_v34, -inf  ;;  %v587_v40 = vsel %vm239_vm1, %v1324_v35, -inf  ;;  %v596_v8 = vsel %vm239_vm1, %v1332_v42, -inf  ;;  %v590_v10 = vsel %vm239_vm1, %v1336_v43, -inf }
 0x22c   : > { %594 = vmax.xlane.f32.xlu1 %v593_v36  ;;  %588 = vmax.xlane.f32.xlu0 %v587_v40  ;;  %v602_v9 = vsel %vm239_vm1, %v1344_v44, -inf  ;;  %v599_v47 = vsel %vm239_vm1, %v1348_v11, -inf  ;;  %v608_v14 = vsel %vm239_vm1, %v1356_v48, -inf  ;;  %v605_v49 = vsel %vm239_vm1, %v1360_v18, -inf }
 0x22d   : > { %v1368_v50 = vmul.f32 %v1316_v33, %v1131_v32  ;;  %v1372_v24 = vmul.f32 %v1316_v33, %v1122_v27  ;;  %v1380_v52 = vmul.f32 %v1316_v33, %v1153_v45  ;;  %v1384_v32 = vmul.f32 %v1316_v33, %v1148_v41 }
 0x22e   : > { %v1392_v57 = vmul.f32 %v1316_v33, %v1171_v58  ;;  %v1396_v45 = vmul.f32 %v1316_v33, %v1164_v54  ;;  %v1404_v60 = vmul.f32 %v1316_v33, %v1177_v0  ;;  %v1408_v58 = vmul.f32 %v1316_v33, %v1174_v63 }
 0x22f   : > { %v614_v21 = vsel %vm239_vm1, %v1368_v50, -inf  ;;  %v611_v51 = vsel %vm239_vm1, %v1372_v24, -inf  ;;  %v620_v27 = vsel %vm239_vm1, %v1380_v52, -inf  ;;  %v617_v53 = vsel %vm239_vm1, %v1384_v32, -inf }
 0x230   : > { %597 = vmax.xlane.f32.xlu1 %v596_v8  ;;  %591 = vmax.xlane.f32.xlu0 %v590_v10  ;;  %v626_v41 = vsel %vm239_vm1, %v1392_v57, -inf  ;;  %v623_v59 = vsel %vm239_vm1, %v1396_v45, -inf  ;;  %v632_v54 = vsel %vm239_vm1, %v1404_v60, -inf  ;;  %v629_v61 = vsel %vm239_vm1, %v1408_v58, -inf }
 0x231   : > { %v1416_v2 = vmul.f32 %v1316_v33, %v1195_v19  ;;  %v1420_v0 = vmul.f32 %v1316_v33, %v1192_v13  ;;  %v1428_v4 = vmul.f32 %v1316_v33, %v1201_v22  ;;  %v573_v19 = vmul.f32 %v1316_v33, %v1198_v20 }
 0x232   : > { %v1437_v6 = vmul.f32 %v1316_v33, %v1219_v38  ;;  %v575_v7 = vmul.f32 %v1316_v33, %v1216_v37  ;;  %v1446_v12 = vmul.f32 %v1316_v33, %v1227_v46  ;;  %v577_v17 = vmul.f32 %v1316_v33, %v1222_v39 }
 0x233   : > { %v638_v63 = vsel %vm239_vm1, %v1416_v2, -inf  ;;  %v635_v3 = vsel %vm239_vm1, %v1420_v0, -inf  ;;  %v644_v13 = vsel %vm239_vm1, %v1428_v4, -inf  ;;  %v641_v5 = vsel %vm239_vm1, %v573_v19, -inf }
 0x234   : > { %603 = vmax.xlane.f32.xlu1 %v602_v9  ;;  %600 = vmax.xlane.f32.xlu0 %v599_v47  ;;  %v650_v22 = vsel %vm239_vm1, %v1437_v6, -inf  ;;  %v647_v20 = vsel %vm239_vm1, %v575_v7, -inf  ;;  %v656_v38 = vsel %vm239_vm1, %v1446_v12, -inf  ;;  %v653_v37 = vsel %vm239_vm1, %v577_v17, -inf }
 0x235   : > { %v580_v25 = vmul.f32 %v1316_v33, %v1243_v56  ;;  %v579_v26 = vmul.f32 %v1316_v33, %v1240_v55  ;;  %v581_v39 = vmul.f32 %v1316_v33, %v1248_v62  ;;  %v683_v30 = vsel %vm239_vm1, %v1324_v35, 0.0 }
 0x236   : > { %v689_v55 = vsel %vm239_vm1, %v1320_v34, 0.0  ;;  %v686_v56 = vsel %vm239_vm1, %v1336_v43, 0.0  ;;  %v695_v62 = vsel %vm239_vm1, %v1348_v11, 0.0  ;;  %v692_v36 = vsel %vm239_vm1, %v1332_v42, 0.0 }
 0x237   : > { %v662_v46 = vsel %vm239_vm1, %v580_v25, -inf  ;;  %v659_v28 = vsel %vm239_vm1, %v579_v26, -inf  ;;  %v665_v31 = vsel %vm239_vm1, %v581_v39, -inf  ;;  %v701_v35 = vsel %vm239_vm1, %v1360_v18, 0.0 }
 0x238   : > { %609 = vmax.xlane.f32.xlu1 %v608_v14  ;;  %606 = vmax.xlane.f32.xlu0 %v605_v49  ;;  %v698_v40 = vsel %vm239_vm1, %v1344_v44, 0.0  ;;  %v707_v34 = vsel %vm239_vm1, %v1372_v24, 0.0  ;;  %v704_v43 = vsel %vm239_vm1, %v1356_v48, 0.0  ;;  %v713_v42 = vsel %vm239_vm1, %v1384_v32, 0.0 }
 0x239   : > { %v710_v8 = vsel %vm239_vm1, %v1368_v50, 0.0  ;;  %v719_v10 = vsel %vm239_vm1, %v1396_v45, 0.0  ;;  %v716_v44 = vsel %vm239_vm1, %v1380_v52, 0.0  ;;  %v725_v11 = vsel %vm239_vm1, %v1408_v58, 0.0 }
 0x23a   : > { %v722_v9 = vsel %vm239_vm1, %v1392_v57, 0.0  ;;  %v731_v47 = vsel %vm239_vm1, %v1420_v0, 0.0  ;;  %v728_v48 = vsel %vm239_vm1, %v1404_v60, 0.0  ;;  %v737_v18 = vsel %vm239_vm1, %v573_v19, 0.0 }
 0x23b   : > { %v734_v14 = vsel %vm239_vm1, %v1416_v2, 0.0  ;;  %v743_v49 = vsel %vm239_vm1, %v575_v7, 0.0  ;;  %v740_v50 = vsel %vm239_vm1, %v1428_v4, 0.0  ;;  %v749_v24 = vsel %vm239_vm1, %v577_v17, 0.0 }
 0x23c   : > { %615 = vmax.xlane.f32.xlu1 %v614_v21  ;;  %612 = vmax.xlane.f32.xlu0 %v611_v51  ;;  %v746_v21 = vsel %vm239_vm1, %v1437_v6, 0.0  ;;  %v755_v51 = vsel %vm239_vm1, %v579_v26, 0.0  ;;  %v752_v52 = vsel %vm239_vm1, %v1446_v12, 0.0  ;;  %v761_v32 = vsel %vm239_vm1, %v581_v39, 0.0 }
 0x23d   : > { %v582_v57 = vmul.f32 %v1316_v33, %v1251_v1  ;;  %v584_v60 = vmul.f32 %v1316_v33, %v1275_v29  ;;  %v586_v1 = vmul.f32 %v1316_v33, %v1267_v16 }
 0x23f   : > { %v680_v2 = vsel %vm239_vm1, %v586_v1, -inf }
 0x240   : > { %621 = vmax.xlane.f32.xlu1 %v620_v27  ;;  %618 = vmax.xlane.f32.xlu0 %v617_v53  ;;  %v758_v27 = vsel %vm239_vm1, %v580_v25, 0.0  ;;  %v583_v53 = vmul.f32 %v1316_v33, %v1270_v23  ;;  %v770_v23 = vsel %vm239_vm1, %v584_v60, 0.0 }
 0x242   : > { %v767_v45 = vsel %vm239_vm1, %v583_v53, 0.0  ;;  %v671_v29 = vsel %vm239_vm1, %v583_v53, -inf }
 0x244   : > { %627 = vmax.xlane.f32.xlu1 %v626_v41  ;;  %624 = vmax.xlane.f32.xlu0 %v623_v59  ;;  %v764_v41 = vsel %vm239_vm1, %v582_v57, 0.0  ;;  %v585_v59 = vmul.f32 %v1316_v33, %v1264_v15  ;;  %v674_v15 = vsel %vm239_vm1, %v584_v60, -inf }
 0x246   : > { %v773_v58 = vsel %vm239_vm1, %v585_v59, 0.0  ;;  %v677_v0 = vsel %vm239_vm1, %v585_v59, -inf }
 0x248   : > { %633 = vmax.xlane.f32.xlu1 %v632_v54  ;;  %630 = vmax.xlane.f32.xlu0 %v629_v61  ;;  %v668_v54 = vsel %vm239_vm1, %v582_v57, -inf  ;;  %v776_v61 = vsel %vm239_vm1, %v586_v1, 0.0 }
 0x24c   : > { %639 = vmax.xlane.f32.xlu1 %v638_v63  ;;  %636 = vmax.xlane.f32.xlu0 %v635_v3 }
 0x250   : > { %645 = vmax.xlane.f32.xlu1 %v644_v13  ;;  %642 = vmax.xlane.f32.xlu0 %v641_v5 }
 0x254   : > { %651 = vmax.xlane.f32.xlu1 %v650_v22  ;;  %648 = vmax.xlane.f32.xlu0 %v647_v20 }
 0x258   : > { %657 = vmax.xlane.f32.xlu1 %v656_v38  ;;  %654 = vmax.xlane.f32.xlu0 %v653_v37 }
 0x25c   : > { %663 = vmax.xlane.f32.xlu1 %v662_v46  ;;  %660 = vmax.xlane.f32.xlu0 %v659_v28 }
 0x260   : > { %684 = vadd.xlane.f32.xlu1 %v683_v30  ;;  %666 = vmax.xlane.f32.xlu0 %v665_v31 }
 0x264   : > { %690 = vadd.xlane.f32.xlu1 %v689_v55  ;;  %687 = vadd.xlane.f32.xlu0 %v686_v56 }
 0x268   : > { %696 = vadd.xlane.f32.xlu1 %v695_v62  ;;  %693 = vadd.xlane.f32.xlu0 %v692_v36 }
 0x26c   : > { %702 = vadd.xlane.f32.xlu1 %v701_v35  ;;  %699 = vadd.xlane.f32.xlu0 %v698_v40 }
 0x270   : > { %708 = vadd.xlane.f32.xlu1 %v707_v34  ;;  %705 = vadd.xlane.f32.xlu0 %v704_v43 }
 0x274   : > { %714 = vadd.xlane.f32.xlu1 %v713_v42  ;;  %711 = vadd.xlane.f32.xlu0 %v710_v8 }
 0x278   : > { %720 = vadd.xlane.f32.xlu1 %v719_v10  ;;  %717 = vadd.xlane.f32.xlu0 %v716_v44 }
 0x27c   : > { %726 = vadd.xlane.f32.xlu1 %v725_v11  ;;  %723 = vadd.xlane.f32.xlu0 %v722_v9 }
 0x280   : > { %732 = vadd.xlane.f32.xlu1 %v731_v47  ;;  %729 = vadd.xlane.f32.xlu0 %v728_v48 }
 0x284   : > { %738 = vadd.xlane.f32.xlu1 %v737_v18  ;;  %735 = vadd.xlane.f32.xlu0 %v734_v14 }
 0x288   : > { %744 = vadd.xlane.f32.xlu1 %v743_v49  ;;  %741 = vadd.xlane.f32.xlu0 %v740_v50 }
 0x28c   : > { %750 = vadd.xlane.f32.xlu1 %v749_v24  ;;  %747 = vadd.xlane.f32.xlu0 %v746_v21 }
 0x290   : > { %756 = vadd.xlane.f32.xlu1 %v755_v51  ;;  %753 = vadd.xlane.f32.xlu0 %v752_v52 }
 0x294   : > { %762 = vadd.xlane.f32.xlu1 %v761_v32  ;;  %759 = vadd.xlane.f32.xlu0 %v758_v27 }
 0x298   : > { %768 = vadd.xlane.f32.xlu1 %v767_v45  ;;  %765 = vadd.xlane.f32.xlu0 %v764_v41 }
 0x29c   : > { %774 = vadd.xlane.f32.xlu1 %v773_v58  ;;  %771 = vadd.xlane.f32.xlu0 %v770_v23 }
 0x2a0   : > { %669 = vmax.xlane.f32.xlu1 %v668_v54  ;;  %777 = vadd.xlane.f32.xlu0 %v776_v61 }
 0x2a4   : > { %675 = vmax.xlane.f32.xlu1 %v674_v15  ;;  %672 = vmax.xlane.f32.xlu0 %v671_v29 }
 0x2a8   : > { %681 = vmax.xlane.f32.xlu1 %v680_v2  ;;  %678 = vmax.xlane.f32.xlu0 %v677_v0 }
 0x2b9   : > { %v595_v16 = vpop.xlane.xlu1 %594  ;;  %v589_v33 = vpop.xlane.xlu0 %588 }
 0x2bd   : > { %v598_v63 = vpop.xlane.xlu1 %597  ;;  %v592_v3 = vpop.xlane.xlu0 %591 }
 0x2c1   : > { %v604_v4 = vpop.xlane.xlu1 %603  ;;  %v601_v19 = vpop.xlane.xlu0 %600 }
 0x2c5   : > { %v610_v13 = vpop.xlane.xlu1 %609  ;;  %v607_v5 = vpop.xlane.xlu0 %606 }
 0x2c9   : > { %v1530_v6 = vpop.xlane.xlu1 %615  ;;  %v613_v7 = vpop.xlane.xlu0 %612 }
 0x2cd   : > { %v1532_v22 = vpop.xlane.xlu1 %621  ;;  %v619_v20 = vpop.xlane.xlu0 %618 }
 0x2d1   : > { %v1534_v12 = vpop.xlane.xlu1 %627  ;;  %v1536_v17 = vpop.xlane.xlu0 %624 }
 0x2d5   : > { %v1538_v38 = vpop.xlane.xlu1 %633  ;;  %v1540_v37 = vpop.xlane.xlu0 %630 }
 0x2d9   : > { %v1542_v25 = vpop.xlane.xlu1 %639  ;;  %v1544_v26 = vpop.xlane.xlu0 %636 }
 0x2dd   : > { %v1546_v46 = vpop.xlane.xlu1 %645  ;;  %v1548_v28 = vpop.xlane.xlu0 %642 }
 0x2e1   : > { %v1550_v39 = vpop.xlane.xlu1 %651  ;;  %v1552_v30 = vpop.xlane.xlu0 %648 }
 0x2e5   : > { %v1554_v31 = vpop.xlane.xlu1 %657  ;;  %v1556_v55 = vpop.xlane.xlu0 %654 }
 0x2e9   : > { %v1558_v56 = vpop.xlane.xlu1 %663  ;;  %v1560_v62 = vpop.xlane.xlu0 %660 }
 0x2ed   : > { %v685_v36 = vpop.xlane.xlu1 %684  ;;  %v1562_v35 = vpop.xlane.xlu0 %666 }
 0x2ee   : > { %v779_v40 = vmul.f32 0.03125, %v685_v36 }
 0x2f0   : > { %v812_v34 = vsel %vm811_vm6, %v589_v33, %v779_v40 }
 0x2f1   : > { %844 = vst.msk [vmem:[%s1569_s10] sm:$0xff] %vm461_vm4, %v812_v34  ;;  %v691_v43 = vpop.xlane.xlu1 %690  ;;  %v688_v42 = vpop.xlane.xlu0 %687 }
 0x2f2   : > { %v781_v8 = vmul.f32 0.03125, %v691_v43  ;;  %v780_v10 = vmul.f32 0.03125, %v688_v42 }
 0x2f4   : > { %v814_v44 = vsel %vm811_vm6, %v595_v16, %v781_v8  ;;  %v813_v11 = vsel %vm811_vm6, %v592_v3, %v780_v10 }
 0x2f5   : > { %846 = vst.msk [vmem:[%s1569_s10 + $0x10] sm:$0xff] %vm461_vm4, %v814_v44  ;;  %845 = vst.msk [vmem:[%s1569_s10 + $0x8] sm:$0xff] %vm461_vm4, %v813_v11  ;;  %v697_v9 = vpop.xlane.xlu1 %696  ;;  %v694_v47 = vpop.xlane.xlu0 %693 }
 0x2f6   : > { %v783_v48 = vmul.f32 0.03125, %v697_v9  ;;  %v782_v18 = vmul.f32 0.03125, %v694_v47 }
 0x2f8   : > { %v816_v14 = vsel %vm811_vm6, %v601_v19, %v783_v48  ;;  %v815_v49 = vsel %vm811_vm6, %v598_v63, %v782_v18 }
 0x2f9   : > { %848 = vst.msk [vmem:[%s1569_s10 + $0x20] sm:$0xff] %vm461_vm4, %v816_v14  ;;  %847 = vst.msk [vmem:[%s1569_s10 + $0x18] sm:$0xff] %vm461_vm4, %v815_v49  ;;  %v703_v50 = vpop.xlane.xlu1 %702  ;;  %v700_v24 = vpop.xlane.xlu0 %699 }
 0x2fa   : > { %v785_v21 = vmul.f32 0.03125, %v703_v50  ;;  %v784_v51 = vmul.f32 0.03125, %v700_v24 }
 0x2fc   : > { %v818_v52 = vsel %vm811_vm6, %v607_v5, %v785_v21  ;;  %v817_v32 = vsel %vm811_vm6, %v604_v4, %v784_v51 }
 0x2fd   : > { %850 = vst.msk [vmem:[%s1569_s10 + $0x30] sm:$0xff] %vm461_vm4, %v818_v52  ;;  %849 = vst.msk [vmem:[%s1569_s10 + $0x28] sm:$0xff] %vm461_vm4, %v817_v32  ;;  %v709_v27 = vpop.xlane.xlu1 %708  ;;  %v706_v53 = vpop.xlane.xlu0 %705 }
 0x2fe   : > { %v787_v57 = vmul.f32 0.03125, %v709_v27  ;;  %v786_v45 = vmul.f32 0.03125, %v706_v53 }
 0x300   : > { %v820_v41 = vsel %vm811_vm6, %v613_v7, %v787_v57  ;;  %v819_v59 = vsel %vm811_vm6, %v610_v13, %v786_v45 }
 0x301   : > { %852 = vst.msk [vmem:[%s1569_s10 + $0x40] sm:$0xff] %vm461_vm4, %v820_v41  ;;  %851 = vst.msk [vmem:[%s1569_s10 + $0x38] sm:$0xff] %vm461_vm4, %v819_v59  ;;  %v715_v60 = vpop.xlane.xlu1 %714  ;;  %v712_v58 = vpop.xlane.xlu0 %711 }
 0x302   : > { %v789_v23 = vmul.f32 0.03125, %v715_v60  ;;  %v788_v1 = vmul.f32 0.03125, %v712_v58 }
 0x304   : > { %v822_v54 = vsel %vm811_vm6, %v619_v20, %v789_v23  ;;  %v821_v61 = vsel %vm811_vm6, %v1530_v6, %v788_v1 }
 0x305   : > { %854 = vst.msk [vmem:[%s1569_s10 + $0x50] sm:$0xff] %vm461_vm4, %v822_v54  ;;  %853 = vst.msk [vmem:[%s1569_s10 + $0x48] sm:$0xff] %vm461_vm4, %v821_v61  ;;  %v721_v15 = vpop.xlane.xlu1 %720  ;;  %v718_v29 = vpop.xlane.xlu0 %717 }
 0x306   : > { %v791_v2 = vmul.f32 0.03125, %v721_v15  ;;  %v790_v0 = vmul.f32 0.03125, %v718_v29 }
 0x308   : > { %v824_v16 = vsel %vm811_vm6, %v1536_v17, %v791_v2  ;;  %v823_v33 = vsel %vm811_vm6, %v1532_v22, %v790_v0 }
 0x309   : > { %856 = vst.msk [vmem:[%s1569_s10 + $0x60] sm:$0xff] %vm461_vm4, %v824_v16  ;;  %855 = vst.msk [vmem:[%s1569_s10 + $0x58] sm:$0xff] %vm461_vm4, %v823_v33  ;;  %v727_v63 = vpop.xlane.xlu1 %726  ;;  %v724_v3 = vpop.xlane.xlu0 %723 }
 0x30a   : > { %v793_v4 = vmul.f32 0.03125, %v727_v63  ;;  %v792_v19 = vmul.f32 0.03125, %v724_v3 }
 0x30c   : > { %v826_v13 = vsel %vm811_vm6, %v1540_v37, %v793_v4  ;;  %v825_v5 = vsel %vm811_vm6, %v1534_v12, %v792_v19 }
 0x30d   : > { %858 = vst.msk [vmem:[%s1569_s10 + $0x70] sm:$0xff] %vm461_vm4, %v826_v13  ;;  %857 = vst.msk [vmem:[%s1569_s10 + $0x68] sm:$0xff] %vm461_vm4, %v825_v5  ;;  %v733_v6 = vpop.xlane.xlu1 %732  ;;  %v730_v7 = vpop.xlane.xlu0 %729 }
 0x30e   : > { %v795_v22 = vmul.f32 0.03125, %v733_v6  ;;  %v794_v20 = vmul.f32 0.03125, %v730_v7 }
 0x310   : > { %v828_v17 = vsel %vm811_vm6, %v1544_v26, %v795_v22  ;;  %v827_v36 = vsel %vm811_vm6, %v1538_v38, %v794_v20 }
 0x311   : > { %860 = vst.msk [vmem:[%s1569_s10 + $0x80] sm:$0xff] %vm461_vm4, %v828_v17  ;;  %859 = vst.msk [vmem:[%s1569_s10 + $0x78] sm:$0xff] %vm461_vm4, %v827_v36  ;;  %v739_v12 = vpop.xlane.xlu1 %738  ;;  %v736_v37 = vpop.xlane.xlu0 %735 }
 0x312   : > { %v797_v40 = vmul.f32 0.03125, %v739_v12  ;;  %v796_v34 = vmul.f32 0.03125, %v736_v37 }
 0x314   : > { %v830_v43 = vsel %vm811_vm6, %v1548_v28, %v797_v40  ;;  %v829_v42 = vsel %vm811_vm6, %v1542_v25, %v796_v34 }
 0x315   : > { %862 = vst.msk [vmem:[%s1569_s10 + $0x90] sm:$0xff] %vm461_vm4, %v830_v43  ;;  %861 = vst.msk [vmem:[%s1569_s10 + $0x88] sm:$0xff] %vm461_vm4, %v829_v42  ;;  %v745_v38 = vpop.xlane.xlu1 %744  ;;  %v742_v26 = vpop.xlane.xlu0 %741 }
 0x316   : > { %v799_v8 = vmul.f32 0.03125, %v745_v38  ;;  %v798_v10 = vmul.f32 0.03125, %v742_v26 }
 0x318   : > { %v832_v44 = vsel %vm811_vm6, %v1552_v30, %v799_v8  ;;  %v831_v11 = vsel %vm811_vm6, %v1546_v46, %v798_v10 }
 0x319   : > { %864 = vst.msk [vmem:[%s1569_s10 + $0xa0] sm:$0xff] %vm461_vm4, %v832_v44  ;;  %863 = vst.msk [vmem:[%s1569_s10 + $0x98] sm:$0xff] %vm461_vm4, %v831_v11  ;;  %v751_v25 = vpop.xlane.xlu1 %750  ;;  %v748_v28 = vpop.xlane.xlu0 %747 }
 0x31a   : > { %v801_v9 = vmul.f32 0.03125, %v751_v25  ;;  %v800_v47 = vmul.f32 0.03125, %v748_v28 }
 0x31c   : > { %v834_v48 = vsel %vm811_vm6, %v1556_v55, %v801_v9  ;;  %v833_v18 = vsel %vm811_vm6, %v1550_v39, %v800_v47 }
 0x31d   : > { %866 = vst.msk [vmem:[%s1569_s10 + $0xb0] sm:$0xff] %vm461_vm4, %v834_v48  ;;  %865 = vst.msk [vmem:[%s1569_s10 + $0xa8] sm:$0xff] %vm461_vm4, %v833_v18  ;;  %v757_v46 = vpop.xlane.xlu1 %756  ;;  %v754_v30 = vpop.xlane.xlu0 %753 }
 0x31e   : > { %v803_v14 = vmul.f32 0.03125, %v757_v46  ;;  %v802_v49 = vmul.f32 0.03125, %v754_v30 }
 0x320   : > { %v836_v50 = vsel %vm811_vm6, %v1560_v62, %v803_v14  ;;  %v835_v24 = vsel %vm811_vm6, %v1554_v31, %v802_v49 }
 0x321   : > { %868 = vst.msk [vmem:[%s1569_s10 + $0xc0] sm:$0xff] %vm461_vm4, %v836_v50  ;;  %867 = vst.msk [vmem:[%s1569_s10 + $0xb8] sm:$0xff] %vm461_vm4, %v835_v24  ;;  %v763_v39 = vpop.xlane.xlu1 %762  ;;  %v760_v55 = vpop.xlane.xlu0 %759 }
 0x322   : > { %v805_v21 = vmul.f32 0.03125, %v763_v39  ;;  %v804_v51 = vmul.f32 0.03125, %v760_v55 }
 0x324   : > { %v838_v52 = vsel %vm811_vm6, %v1562_v35, %v805_v21  ;;  %v837_v32 = vsel %vm811_vm6, %v1558_v56, %v804_v51 }
 0x325   : > { %870 = vst.msk [vmem:[%s1569_s10 + $0xd0] sm:$0xff] %vm461_vm4, %v838_v52  ;;  %869 = vst.msk [vmem:[%s1569_s10 + $0xc8] sm:$0xff] %vm461_vm4, %v837_v32  ;;  %v769_v31 = vpop.xlane.xlu1 %768  ;;  %v766_v62 = vpop.xlane.xlu0 %765 }
 0x326   : > { %v806_v57 = vmul.f32 0.03125, %v766_v62  ;;  %v807_v56 = vmul.f32 0.03125, %v769_v31 }
 0x329   : > { %v775_v27 = vpop.xlane.xlu1 %774  ;;  %v772_v53 = vpop.xlane.xlu0 %771 }
 0x32a   : > { %v808_v35 = vmul.f32 0.03125, %v772_v53  ;;  %v809_v54 = vmul.f32 0.03125, %v775_v27 }
 0x32d   : > { %v670_v45 = vpop.xlane.xlu1 %669  ;;  %v778_v41 = vpop.xlane.xlu0 %777 }
 0x32e   : > { %v839_v59 = vsel %vm811_vm6, %v670_v45, %v806_v57  ;;  %v810_v61 = vmul.f32 0.03125, %v778_v41 }
 0x32f   : > { %871 = vst.msk [vmem:[%s1569_s10 + $0xd8] sm:$0xff] %vm461_vm4, %v839_v59 }
 0x331   : > { %v676_v60 = vpop.xlane.xlu1 %675  ;;  %v673_v58 = vpop.xlane.xlu0 %672 }
 0x332   : > { %v841_v23 = vsel %vm811_vm6, %v676_v60, %v808_v35  ;;  %v840_v1 = vsel %vm811_vm6, %v673_v58, %v807_v56 }
 0x333   : > { %873 = vst.msk [vmem:[%s1569_s10 + $0xe8] sm:$0xff] %vm461_vm4, %v841_v23  ;;  %872 = vst.msk [vmem:[%s1569_s10 + $0xe0] sm:$0xff] %vm461_vm4, %v840_v1 }
 0x335   : > { %v682_v15 = vpop.xlane.xlu1 %681  ;;  %v679_v29 = vpop.xlane.xlu0 %678 }
 0x336   : > { %v843_v2 = vsel %vm811_vm6, %v682_v15, %v810_v61  ;;  %v842_v0 = vsel %vm811_vm6, %v679_v29, %v809_v54 }
 0x337   : > { %875 = vst.msk [vmem:[%s1569_s10 + $0xf8] sm:$0xff] %vm461_vm4, %v843_v2  ;;  %874 = vst.msk [vmem:[%s1569_s10 + $0xf0] sm:$0xff] %vm461_vm4, %v842_v0 }
 0x338 PF: > { %s15_s15 = sadd.s32 1, %s1023_s15  }
 0x339   : > { %p12_p4 = scmp.ge.s32.totalorder %s15_s15, 4  }
 0x33b   :  { %14 = sbr.rel (!%p12_p4) target bundleno = 1 (0x1), region = 74 }

// kernel: cbam_conv_forward.3
= control target key start
LH: loop header
LB: loop body
LE: loop exit
PB: predicated region body
PF: predicated region fallthrough
CT: control target
= control target key end

     0   :  { %s5572_s24 = smov 0   ;;  %s6363_s0 = inlined_call_operand.vmem [shape: f32[2,342,32], index: 0, kind: input, shape index: {}]   ;;  %s6364_s1 = inlined_call_operand.vmem [shape: f32[2,1,32], index: 1, kind: input, shape index: {}]   ;;  %s6365_s2 = inlined_call_operand.vmem [shape: f32[2,342,1], index: 2, kind: input, shape index: {}]   ;;  %s6366_s3 = inlined_call_operand.vmem [shape: bf16[288,128], index: 3, kind: input, shape index: {}]   ;;  %s6367_s4 = inlined_call_operand.vmem [shape: f32[1,128], index: 4, kind: input, shape index: {}]   ;;  %s6368_s5 = inlined_call_operand.vmem [shape: f32[1,128], index: 5, kind: input, shape index: {}]   ;;  %s6369_s6 = inlined_call_operand.vmem [shape: f32[1,128], index: 6, kind: input, shape index: {}]   ;;  %s6370_s7 = inlined_call_operand.vmem [shape: f32[2,288,128], index: 7, kind: output, shape index: {}]  }
   0x1 LB: > { %s4249_s25 = sadd.s32 4294967295, %s5529_s24   ;;  %p4253_p0 = scmp.ge.s32.totalorder %s5529_s24, 1  ;;  %s5529_s24 = sphi %s5572_s24, %s17_s24  }
   0x2   : > { %p255_p1 = scmp.lt.s32.totalorder %s5529_s24, 3 }
   0x4   : > { %p256_p2 = pnand %p4253_p0, %p255_p1 }
   0x5   : > { %p295_p3 = scmp.lt.s32.totalorder (!%p256_p2), %s4249_s25, 1  ;;  %v5531_v0 = vmov (!%p256_p2), 0   ;;  %vm966_vm0 = vcmask (!%p256_p2), 261120  }
   0x6   : > { %259 = sbr.rel (%p256_p2) target bundleno = 745 (0x2e9), region = 48  ;;  %5330 = vset.pattern.permute.xlu1 (!%p256_p2), %v5531_v0  ;;  %5329 = vset.pattern.permute.xlu0 (!%p256_p2), %v5531_v0 }
   0xd   : > { %s6372_s25 = smov (!%p295_p3, %s4249_s25), 1 }
   0xe   : > { %s5318_s26 = smul.u32 344, %s6372_s25  ;;  %s302_s21 = scalar_lea.vmem %s6364_s1, %s6372_s25 }
   0xf   : > { %s5319_s15 = smul.u32 288, %s6372_s25 }
  0x10   : > { %s5588_s29 = scalar_lea.vmem %s6365_s2, %s5318_s26  ;;  %s5666_s27 = scalar_lea.vmem %s6363_s0, %s5318_s26 }
  0x11   : > { %v319_v1 = vld [vmem:[%s5588_s29 + $0x20] sm:$0xff]  ;;  %v317_v2 = vld [vmem:[%s5588_s29 + $0x10] sm:$0xff]  ;;  %v320_v3 = vld [vmem:[%s5588_s29 + $0x28] sm:$0xff]  ;;  %s6210_s19 = scalar_lea.vmem %s6370_s7, %s5319_s15 }
  0x12   : > { %v4261_v4 = vmul.f32 -1.442695, %v319_v1  ;;  %v4259_v5 = vmul.f32 -1.442695, %v317_v2  ;;  %v4262_v6 = vmul.f32 -1.442695, %v320_v3 }
  0x13   : > { %v318_v7 = vld [vmem:[%s5588_s29 + $0x18] sm:$0xff]  ;;  %v321_v8 = vld [vmem:[%s5588_s29 + $0x30] sm:$0xff]  ;;  %v315_v9 = vld [vmem:[%s5588_s29] sm:$0xff] }
  0x14   : > { %5349 = vpow2.f32 %v4261_v4  ;;  %v4260_v10 = vmul.f32 -1.442695, %v318_v7  ;;  %v4263_v11 = vmul.f32 -1.442695, %v321_v8  ;;  %v4257_v12 = vmul.f32 -1.442695, %v315_v9 }
  0x15   : > { %5351 = vpow2.f32 %v4259_v5  ;;  %v316_v13 = vld [vmem:[%s5588_s29 + $0x8] sm:$0xff]  ;;  %v322_v14 = vld [vmem:[%s5588_s29 + $0x38] sm:$0xff]  ;;  %v323_v15 = vld [vmem:[%s5588_s29 + $0x40] sm:$0xff] }
  0x16   : > { %5353 = vpow2.f32 %v4262_v6  ;;  %v4258_v16 = vmul.f32 -1.442695, %v316_v13  ;;  %v4264_v17 = vmul.f32 -1.442695, %v322_v14  ;;  %v324_v18 = vld [vmem:[%s5588_s29 + $0x48] sm:$0xff]  ;;  %v325_v19 = vld [vmem:[%s5588_s29 + $0x50] sm:$0xff] }
  0x17   : > { %5355 = vpow2.f32 %v4260_v10  ;;  %v4265_v20 = vmul.f32 -1.442695, %v323_v15  ;;  %v326_v21 = vld [vmem:[%s5588_s29 + $0x58] sm:$0xff]  ;;  %v4266_v22 = vmul.f32 -1.442695, %v324_v18  ;;  %v327_v23 = vld [vmem:[%s5588_s29 + $0x60] sm:$0xff] }
  0x18   : > { %5357 = vpow2.f32 %v4263_v11  ;;  %v4267_v24 = vmul.f32 -1.442695, %v325_v19  ;;  %v4268_v25 = vmul.f32 -1.442695, %v326_v21  ;;  %v4269_v26 = vmul.f32 -1.442695, %v327_v23 }
  0x19   : > { %5359 = vpow2.f32 %v4257_v12  ;;  %v328_v40 = vld [vmem:[%s5588_s29 + $0x68] sm:$0xff]  ;;  %v329_v43 = vld [vmem:[%s5588_s29 + $0x70] sm:$0xff]  ;;  %v330_v46 = vld [vmem:[%s5588_s29 + $0x78] sm:$0xff] }
  0x1a   : > { %5361 = vpow2.f32 %v4258_v16  ;;  %v4270_v49 = vmul.f32 -1.442695, %v328_v40  ;;  %v331_v50 = vld [vmem:[%s5588_s29 + $0x80] sm:$0xff]  ;;  %v332_v51 = vld [vmem:[%s5588_s29 + $0x88] sm:$0xff]  ;;  %v4271_v54 = vmul.f32 -1.442695, %v329_v43 }
  0x1b   : > { %5363 = vpow2.f32 %v4264_v17  ;;  %v333_v55 = vld [vmem:[%s5588_s29 + $0x90] sm:$0xff]  ;;  %v334_v56 = vld [vmem:[%s5588_s29 + $0x98] sm:$0xff]  ;;  %v4272_v59 = vmul.f32 -1.442695, %v330_v46  ;;  %v335_v60 = vld [vmem:[%s5588_s29 + $0xa0] sm:$0xff] }
  0x1c   : > { %5365 = vpow2.f32 %v4265_v20  ;;  %v336_v61 = vld [vmem:[%s5588_s29 + $0xa8] sm:$0xff]  ;;  %v4273_v0 = vmul.f32 -1.442695, %v331_v50  ;;  %v4274_v1 = vmul.f32 -1.442695, %v332_v51  ;;  %v337_v9 = vld [vmem:[%s5588_s29 + $0xb0] sm:$0xff] }
  0x1d   : > { %5367 = vpow2.f32 %v4266_v22  ;;  %v4275_v4 = vmul.f32 -1.442695, %v333_v55  ;;  %v4276_v5 = vmul.f32 -1.442695, %v334_v56  ;;  %v4277_v7 = vmul.f32 -1.442695, %v335_v60 }
  0x1e   : > { %v5350_v27 = vpop.eup %5349  ;;  %5369 = vpow2.f32 %v4267_v24  ;;  %v4278_v8 = vmul.f32 -1.442695, %v336_v61  ;;  %v4279_v13 = vmul.f32 -1.442695, %v337_v9  ;;  %v338_v14 = vld [vmem:[%s5588_s29 + $0xb8] sm:$0xff]  ;;  %v339_v17 = vld [vmem:[%s5588_s29 + $0xc0] sm:$0xff] }
  0x1f   : > { %v5352_v28 = vpop.eup %5351  ;;  %v491_v29 = vadd.f32 1.0, %v5350_v27  ;;  %5371 = vpow2.f32 %v4268_v25  ;;  %v340_v20 = vld [vmem:[%s5588_s29 + $0xc8] sm:$0xff]  ;;  %v4280_v22 = vmul.f32 -1.442695, %v338_v14  ;;  %v4281_v24 = vmul.f32 -1.442695, %v339_v17 }
  0x20   : > { %v5354_v30 = vpop.eup %5353  ;;  %v489_v31 = vadd.f32 1.0, %v5352_v28  ;;  %5373 = vpow2.f32 %v4269_v26  ;;  %v4282_v26 = vmul.f32 -1.442695, %v340_v20  ;;  %v341_v50 = vld [vmem:[%s5588_s29 + $0xd0] sm:$0xff]  ;;  %v343_v56 = vld [vmem:[%s5588_s29 + $0xe0] sm:$0xff]  ;;  %v344_v61 = vld [vmem:[%s5588_s29 + $0xe8] sm:$0xff] }
  0x21   : > { %v5356_v32 = vpop.eup %5355  ;;  %5375 = vrcp.f32 %v491_v29  ;;  %v492_v33 = vadd.f32 1.0, %v5354_v30  ;;  %v4283_v60 = vmul.f32 -1.442695, %v341_v50  ;;  %v5641_v17 = vld [vmem:[%s6366_s3 + $0x50] sm:$0xff]  }
  0x22   : > { %v5358_v34 = vpop.eup %5357  ;;  %5377 = vrcp.f32 %v489_v31  ;;  %v490_v35 = vadd.f32 1.0, %v5356_v32 }
  0x23   : > { %v5360_v36 = vpop.eup %5359  ;;  %5379 = vrcp.f32 %v492_v33  ;;  %v493_v37 = vadd.f32 1.0, %v5358_v34  ;;  %v5331_v33 = vld [vmem:[%s6366_s3 + $0x40] sm:$0xff]  }
  0x24   : > { %v5362_v38 = vpop.eup %5361  ;;  %5381 = vrcp.f32 %v490_v35  ;;  %v487_v39 = vadd.f32 1.0, %v5360_v36  ;;  %4826 = vmatprep.subr.bf16.mxu0 %v5331_v33 }
  0x25   : > { %v5364_v41 = vpop.eup %5363  ;;  %5383 = vrcp.f32 %v493_v37  ;;  %v488_v42 = vadd.f32 1.0, %v5362_v38  ;;  %4827 = vmatpush3.bf16.msra.mxu0 %v5331_v33 }
  0x26   : > { %v5366_v44 = vpop.eup %5365  ;;  %5385 = vrcp.f32 %v487_v39  ;;  %v494_v45 = vadd.f32 1.0, %v5364_v41 }
  0x27   : > { %v5368_v47 = vpop.eup %5367  ;;  %5387 = vrcp.f32 %v488_v42  ;;  %v495_v48 = vadd.f32 1.0, %v5366_v44  ;;  %v5332_v42 = vld [vmem:[%s6366_s3 + $0x48] sm:$0xff]  }
  0x28   : > { %v5370_v52 = vpop.eup %5369  ;;  %5389 = vrcp.f32 %v494_v45  ;;  %v496_v53 = vadd.f32 1.0, %v5368_v47  ;;  %v5333_v45 = vld [vmem:[%s6366_s3 + $0x10] sm:$0xff]   ;;  %4828 = vmatprep.subr.bf16.mxu0 %v5332_v42 }
  0x29   : > { %v5372_v57 = vpop.eup %5371  ;;  %5391 = vrcp.f32 %v495_v48  ;;  %v497_v58 = vadd.f32 1.0, %v5370_v52  ;;  %4666 = vmatprep.subr.bf16.mxu1 %v5333_v45  ;;  %4829 = vmatpush3.bf16.msra.mxu0 %v5332_v42 }
  0x2a   : > { %v5374_v62 = vpop.eup %5373  ;;  %5393 = vrcp.f32 %v496_v53  ;;  %v498_v63 = vadd.f32 1.0, %v5372_v57  ;;  %v342_v53 = vld [vmem:[%s5588_s29 + $0xd8] sm:$0xff]  ;;  %4667 = vmatpush3.bf16.msra.mxu1 %v5333_v45  ;;  %4866 = vmatprep.subr.bf16.mxu0 %v5641_v17 }
  0x2b   : > { %v5376_v2 = vpop.eup %5375  ;;  %5395 = vrcp.f32 %v497_v58  ;;  %v499_v3 = vadd.f32 1.0, %v5374_v62  ;;  %v5334_v57 = vld [vmem:[%s6366_s3 + $0x18] sm:$0xff]  }
  0x2c   : > { %v5378_v6 = vpop.eup %5377  ;;  %644 = vperm.xlu1 %5330, %v5376_v2   ;;  %5397 = vrcp.f32 %v498_v63  ;;  %4668 = vmatprep.subr.bf16.mxu1 %v5334_v57 }
  0x2d   : > { %v5380_v10 = vpop.eup %5379  ;;  %634 = vperm.xlu0 %5329, %v5378_v6   ;;  %5399 = vrcp.f32 %v499_v3  ;;  %v4285_v3 = vmul.f32 -1.442695, %v343_v56  ;;  %v4286_v6 = vmul.f32 -1.442695, %v344_v61 }
  0x2e   : > { %v5382_v11 = vpop.eup %5381  ;;  %5401 = vpow2.f32 %v4270_v49  ;;  %4669 = vmatpush3.bf16.msra.mxu1 %v5334_v57  ;;  %v356_v57 = vld [vmem:[%s5588_s29 + $0x148] sm:$0xff] }
  0x2f   : > { %v5384_v12 = vpop.eup %5383  ;;  %5403 = vpow2.f32 %v4271_v54 }
  0x30   : > { %v5386_v15 = vpop.eup %5385  ;;  %649 = vperm.xlu1 %5330, %v5380_v10   ;;  %5405 = vpow2.f32 %v4272_v59  ;;  %v348_v10 = vld [vmem:[%s5588_s29 + $0x108] sm:$0xff] }
  0x31   : > { %v5388_v16 = vpop.eup %5387  ;;  %639 = vperm.xlu0 %5329, %v5382_v11   ;;  %5407 = vpow2.f32 %v4273_v0  ;;  %v4284_v0 = vmul.f32 -1.442695, %v342_v53  ;;  %v354_v53 = vld [vmem:[%s5588_s29 + $0x138] sm:$0xff] }
  0x32   : > { %v5390_v18 = vpop.eup %5389  ;;  %5409 = vpow2.f32 %v4274_v1  ;;  %v345_v1 = vld [vmem:[%s5588_s29 + $0xf0] sm:$0xff] }
  0x33   : > { %v5392_v19 = vpop.eup %5391  ;;  %5411 = vpow2.f32 %v4275_v4  ;;  %v346_v4 = vld [vmem:[%s5588_s29 + $0xf8] sm:$0xff]  ;;  %v4287_v9 = vmul.f32 -1.442695, %v345_v1 }
  0x34   : > { %v5394_v21 = vpop.eup %5393  ;;  %624 = vperm.xlu1 %5330, %v5386_v15   ;;  %5413 = vpow2.f32 %v4276_v5 }
  0x35   : > { %v5396_v23 = vpop.eup %5395  ;;  %654 = vperm.xlu0 %5329, %v5384_v12   ;;  %5415 = vpow2.f32 %v4277_v7  ;;  %v347_v7 = vld [vmem:[%s5588_s29 + $0x100] sm:$0xff]  ;;  %v4288_v12 = vmul.f32 -1.442695, %v346_v4 }
  0x36   : > { %v5398_v25 = vpop.eup %5397  ;;  %5417 = vpow2.f32 %v4278_v8  ;;  %v4289_v15 = vmul.f32 -1.442695, %v347_v7 }
  0x37   : > { %v5400_v27 = vpop.eup %5399  ;;  %5419 = vpow2.f32 %v4279_v13  ;;  %v349_v13 = vld [vmem:[%s5588_s29 + $0x110] sm:$0xff] }
  0x38   : > { %v5402_v28 = vpop.eup %5401  ;;  %659 = vperm.xlu1 %5330, %v5390_v18   ;;  %5421 = vpow2.f32 %v4280_v22 }
  0x39   : > { %v5404_v29 = vpop.eup %5403  ;;  %629 = vperm.xlu0 %5329, %v5388_v16   ;;  %v500_v30 = vadd.f32 1.0, %v5402_v28  ;;  %5423 = vpow2.f32 %v4281_v24  ;;  %v350_v16 = vld [vmem:[%s5588_s29 + $0x118] sm:$0xff]  ;;  %v351_v24 = vld [vmem:[%s5588_s29 + $0x120] sm:$0xff] }
  0x3a   : > { %v5406_v31 = vpop.eup %5405  ;;  %v501_v32 = vadd.f32 1.0, %v5404_v29  ;;  %5425 = vpow2.f32 %v4282_v26  ;;  %v4293_v28 = vmul.f32 -1.442695, %v351_v24  ;;  %v352_v29 = vld [vmem:[%s5588_s29 + $0x128] sm:$0xff] }
  0x3b   : > { %v5408_v34 = vpop.eup %5407  ;;  %5427 = vrcp.f32 %v500_v30  ;;  %v502_v35 = vadd.f32 1.0, %v5406_v31 }
  0x3c   : > { %v5410_v36 = vpop.eup %5409  ;;  %669 = vperm.xlu1 %5330, %v5394_v21   ;;  %5429 = vrcp.f32 %v501_v32  ;;  %v503_v37 = vadd.f32 1.0, %v5408_v34  ;;  %v4291_v21 = vmul.f32 -1.442695, %v349_v13  ;;  %v5649_v32 = vld [vmem:[%s6366_s3] sm:$0xff]  }
  0x3d   : > { %v5412_v38 = vpop.eup %5411  ;;  %664 = vperm.xlu0 %5329, %v5392_v19   ;;  %5431 = vrcp.f32 %v502_v35  ;;  %v504_v39 = vadd.f32 1.0, %v5410_v36  ;;  %v4290_v19 = vmul.f32 -1.442695, %v348_v10  ;;  %v4294_v35 = vmul.f32 -1.442695, %v352_v29  ;;  %4706 = vmatprep.subr.bf16.mxu1 %v5649_v32 }
  0x3e   : > { %v5414_v40 = vpop.eup %5413  ;;  %5433 = vrcp.f32 %v503_v37  ;;  %v505_v41 = vadd.f32 1.0, %v5412_v38  ;;  %v353_v38 = vld [vmem:[%s5588_s29 + $0x130] sm:$0xff] }
  0x3f   : > { %v5416_v43 = vpop.eup %5415  ;;  %5435 = vrcp.f32 %v504_v39  ;;  %v506_v44 = vadd.f32 1.0, %v5414_v40 }
  0x40   : > { %v5418_v46 = vpop.eup %5417  ;;  %679 = vperm.xlu1 %5330, %v5398_v25   ;;  %5437 = vrcp.f32 %v505_v41  ;;  %v507_v47 = vadd.f32 1.0, %v5416_v43 }
  0x41   : > { %v5420_v48 = vpop.eup %5419  ;;  %674 = vperm.xlu0 %5329, %v5396_v23   ;;  %5439 = vrcp.f32 %v506_v44  ;;  %v508_v49 = vadd.f32 1.0, %v5418_v46  ;;  %v4292_v23 = vmul.f32 -1.442695, %v350_v16  ;;  %v4295_v44 = vmul.f32 -1.442695, %v353_v38 }
  0x42   : > { %v5422_v51 = vpop.eup %5421  ;;  %5441 = vrcp.f32 %v507_v47  ;;  %v509_v52 = vadd.f32 1.0, %v5420_v48 }
  0x43   : > { %v5424_v54 = vpop.eup %5423  ;;  %5443 = vrcp.f32 %v508_v49  ;;  %v510_v55 = vadd.f32 1.0, %v5422_v51 }
  0x44   : > { %v5426_v58 = vpop.eup %5425  ;;  %5445 = vrcp.f32 %v509_v52  ;;  %v511_v59 = vadd.f32 1.0, %v5424_v54 }
  0x45   : > { %v5428_v62 = vpop.eup %5427  ;;  %684 = vperm.xlu0 %5329, %v5400_v27   ;;  %5447 = vrcp.f32 %v510_v55  ;;  %v512_v63 = vadd.f32 1.0, %v5426_v58  ;;  %v355_v55 = vld [vmem:[%s5588_s29 + $0x140] sm:$0xff] }
  0x46   : > { %v5430_v2 = vpop.eup %5429  ;;  %689 = vperm.xlu1 %5330, %v5428_v62   ;;  %5449 = vrcp.f32 %v511_v59  ;;  %v4296_v59 = vmul.f32 -1.442695, %v354_v53  ;;  %v4297_v62 = vmul.f32 -1.442695, %v355_v55 }
  0x47   : > { %v5432_v5 = vpop.eup %5431  ;;  %5451 = vrcp.f32 %v512_v63 }
  0x48   : > { %v5434_v8 = vpop.eup %5433  ;;  %5453 = vpow2.f32 %v4283_v60  ;;  %v357_v60 = vld [vmem:[%s5588_s29 + $0x150] sm:$0x3f] }
  0x49   : > { %v5436_v11 = vpop.eup %5435  ;;  %694 = vperm.xlu0 %5329, %v5430_v2   ;;  %5455 = vpow2.f32 %v4284_v0  ;;  %v4298_v0 = vmul.f32 -1.442695, %v356_v57  ;;  %v4299_v2 = vmul.f32 -1.442695, %v357_v60  ;;  %v881_v60 = vld [vmem:[%s5666_s27 + $0x8] sm:$0xff] }
  0x4a   : > { %v5438_v14 = vpop.eup %5437  ;;  %699 = vperm.xlu1 %5330, %v5432_v5   ;;  %5457 = vpow2.f32 %v4285_v3 }
  0x4b   : > { %v5440_v18 = vpop.eup %5439  ;;  %5459 = vpow2.f32 %v4286_v6 }
  0x4c   : > { %v5442_v20 = vpop.eup %5441  ;;  %5461 = vpow2.f32 %v4287_v9 }
  0x4d   : > { %v5444_v22 = vpop.eup %5443  ;;  %704 = vperm.xlu0 %5329, %v5434_v8   ;;  %5463 = vpow2.f32 %v4288_v12 }
  0x4e   : > { %v5446_v25 = vpop.eup %5445  ;;  %709 = vperm.xlu1 %5330, %v5436_v11   ;;  %5465 = vpow2.f32 %v4289_v15 }
  0x4f   : > { %v5448_v26 = vpop.eup %5447  ;;  %5467 = vpow2.f32 %v4290_v19 }
  0x50   : > { %v5450_v27 = vpop.eup %5449  ;;  %5469 = vpow2.f32 %v4291_v21 }
  0x51   : > { %v5452_v30 = vpop.eup %5451  ;;  %714 = vperm.xlu0 %5329, %v5438_v14   ;;  %5471 = vpow2.f32 %v4292_v23 }
  0x52   : > { %v5454_v31 = vpop.eup %5453  ;;  %719 = vperm.xlu1 %5330, %v5440_v18   ;;  %5473 = vpow2.f32 %v4293_v28 }
  0x53   : > { %v5456_v33 = vpop.eup %5455  ;;  %v513_v34 = vadd.f32 1.0, %v5454_v31  ;;  %v5668_v31 = vld [vmem:[%s302_s21] ss:$0 sm:$0xff] }
  0x54   : > { %v5458_v36 = vpop.eup %5457  ;;  %v514_v37 = vadd.f32 1.0, %v5456_v33 }
  0x55   : > { %v5460_v39 = vpop.eup %5459  ;;  %724 = vperm.xlu0 %5329, %v5442_v20   ;;  %5475 = vrcp.f32 %v513_v34  ;;  %v515_v40 = vadd.f32 1.0, %v5458_v36  ;;  %v884_v34 = vld [vmem:[%s5666_s27 + $0x20] sm:$0xff] }
  0x56   : > { %v5462_v41 = vpop.eup %5461  ;;  %729 = vperm.xlu1 %5330, %v5444_v22   ;;  %5477 = vrcp.f32 %v514_v37  ;;  %v516_v42 = vadd.f32 1.0, %v5460_v39  ;;  %v882_v37 = vld [vmem:[%s5666_s27 + $0x10] sm:$0xff] }
  0x57   : > { %v5464_v43 = vpop.eup %5463  ;;  %5479 = vpow2.f32 %v4294_v35  ;;  %v517_v46 = vadd.f32 1.0, %v5462_v41 }
  0x58   : > { %v5466_v45 = vpop.eup %5465  ;;  %5481 = vrcp.f32 %v515_v40  ;;  %v518_v48 = vadd.f32 1.0, %v5464_v43 }
  0x59   : > { %v5468_v47 = vpop.eup %5467  ;;  %734 = vperm.xlu0 %5329, %v5446_v25   ;;  %5483 = vrcp.f32 %v516_v42  ;;  %v519_v50 = vadd.f32 1.0, %v5466_v45  ;;  %v885_v42 = vld [vmem:[%s5666_s27 + $0x28] sm:$0xff]  ;;  %v883_v45 = vld [vmem:[%s5666_s27 + $0x18] sm:$0xff] }
  0x5a   : > { %v5470_v49 = vpop.eup %5469  ;;  %739 = vperm.xlu1 %5330, %v5448_v26   ;;  %v520_v52 = vadd.f32 1.0, %v5468_v47  ;;  %5485 = vpow2.f32 %v4295_v44 }
  0x5b   : > { %v5472_v51 = vpop.eup %5471  ;;  %5487 = vrcp.f32 %v517_v46  ;;  %v521_v54 = vadd.f32 1.0, %v5470_v49 }
  0x5c   : > { %5489 = vrcp.f32 %v518_v48  ;;  %v522_v56 = vadd.f32 1.0, %v5472_v51  ;;  %v5474_v58 = vpop.eup %5473 }
  0x5d   : > { %744 = vperm.xlu0 %5329, %v5450_v27   ;;  %5491 = vrcp.f32 %v519_v50  ;;  %v523_v5 = vadd.f32 1.0, %v5474_v58  ;;  %v880_v50 = vld [vmem:[%s5666_s27] sm:$0xff]  ;;  %v887_v58 = vld [vmem:[%s5666_s27 + $0x38] sm:$0xff] }
  0x5e   : > { %749 = vperm.xlu1 %5330, %v5452_v30   ;;  %5493 = vrcp.f32 %v520_v52  ;;  %v886_v52 = vld [vmem:[%s5666_s27 + $0x30] sm:$0xff] }
  0x5f   : > { %v5476_v61 = vpop.eup %5475  ;;  %5495 = vrcp.f32 %v521_v54 }
  0x60   : > { %v5478_v63 = vpop.eup %5477  ;;  %5497 = vrcp.f32 %v522_v56 }
  0x61   : > { %v5480_v1 = vpop.eup %5479  ;;  %754 = vperm.xlu0 %5329, %v5476_v61   ;;  %5499 = vpow2.f32 %v4296_v59 }
  0x62   : > { %v5482_v3 = vpop.eup %5481  ;;  %759 = vperm.xlu1 %5330, %v5478_v63   ;;  %5501 = vpow2.f32 %v4297_v62  ;;  %v524_v7 = vadd.f32 1.0, %v5480_v1 }
  0x63   : > { %v5484_v4 = vpop.eup %5483  ;;  %5503 = vpow2.f32 %v4298_v0 }
  0x64   : > { %v5486_v6 = vpop.eup %5485  ;;  %5505 = vpow2.f32 %v4299_v2  ;;  %v889_v2 = vld [vmem:[%s5666_s27 + $0x48] sm:$0xff] }
  0x65   : > { %764 = vperm.xlu0 %5329, %v5482_v3   ;;  %v5488_v8 = vpop.eup %5487  ;;  %5507 = vrcp.f32 %v523_v5  ;;  %v525_v11 = vadd.f32 1.0, %v5486_v6 }
  0x66   : > { %769 = vperm.xlu1 %5330, %v5484_v4   ;;  %v5490_v9 = vpop.eup %5489  ;;  %5509 = vrcp.f32 %v524_v7  ;;  %v888_v4 = vld [vmem:[%s5666_s27 + $0x40] sm:$0xff] }
  0x67   : > { %v5492_v10 = vpop.eup %5491  ;;  %5511 = vrcp.f32 %v525_v11 }
  0x68   : > { %v5494_v12 = vpop.eup %5493 }
  0x69   : > { %774 = vperm.xlu0 %5329, %v5488_v8   ;;  %v5496_v13 = vpop.eup %5495 }
  0x6a   : > { %779 = vperm.xlu1 %5330, %v5490_v9   ;;  %v5498_v14 = vpop.eup %5497 }
  0x6b   : > { %v5500_v15 = vpop.eup %5499 }
  0x6c   : > { %v5502_v16 = vpop.eup %5501  ;;  %v526_v18 = vadd.f32 1.0, %v5500_v15  ;;  %v890_v15 = vld [vmem:[%s5666_s27 + $0x50] sm:$0xff] }
  0x6d   : > { %784 = vperm.xlu0 %5329, %v5492_v10   ;;  %v5504_v19 = vpop.eup %5503  ;;  %v527_v20 = vadd.f32 1.0, %v5502_v16 }
  0x6e   : > { %789 = vperm.xlu1 %5330, %v5494_v12   ;;  %v5506_v21 = vpop.eup %5505  ;;  %5513 = vrcp.f32 %v526_v18  ;;  %v528_v22 = vadd.f32 1.0, %v5504_v19 }
  0x6f   : > { %5515 = vrcp.f32 %v527_v20  ;;  %v529_v23 = vadd.f32 1.0, %v5506_v21  ;;  %v5508_v24 = vpop.eup %5507 }
  0x70   : > { %5517 = vrcp.f32 %v528_v22  ;;  %v5510_v25 = vpop.eup %5509  ;;  %v5337_v22 = vld [vmem:[%s6366_s3 + $0x58] sm:$0xff]  }
  0x71   : > { %794 = vperm.xlu0 %5329, %v5496_v13   ;;  %5519 = vrcp.f32 %v529_v23  ;;  %v5512_v26 = vpop.eup %5511  ;;  %v891_v13 = vld [vmem:[%s5666_s27 + $0x58] sm:$0xff] }
  0x72   : > { %799 = vperm.xlu1 %5330, %v5498_v14  }
  0x75   : > { %804 = vperm.xlu0 %5329, %v5508_v24  }
  0x76   : > { %809 = vperm.xlu1 %5330, %v5510_v25   ;;  %v892_v25 = vld [vmem:[%s5666_s27 + $0x60] sm:$0xff] }
  0x78   : > { %v5514_v27 = vpop.eup %5513 }
  0x79   : > { %814 = vperm.xlu0 %5329, %v5512_v26   ;;  %v5516_v28 = vpop.eup %5515 }
  0x7a   : > { %819 = vperm.xlu1 %5330, %v5514_v27   ;;  %v5518_v29 = vpop.eup %5517 }
  0x7b   : > { %v5520_v30 = vpop.eup %5519 }
  0x7d   : > { %824 = vperm.xlu0 %5329, %v5516_v28  }
  0x7e   : > { %829 = vperm.xlu1 %5330, %v5518_v29  }
  0x81   : > { %834 = vperm.xlu0 %5329, %v5520_v30  }
  0xab   : > { %v645_v33 = vpop.permute.xlu1 %644 }
  0xac   : > { %v841_v35 = vmul.f32 %v5668_v31, %v645_v33  ;;  %v635_v36 = vpop.permute.xlu0 %634 }
  0xad   : > { %v839_v38 = vmul.f32 %v5668_v31, %v635_v36  ;;  %v893_v36 = vld [vmem:[%s5666_s27 + $0x68] sm:$0xff] }
  0xae   : > { %v927_v39 = vmul.f32 %v884_v34, %v841_v35 }
  0xaf   : > { %v925_v40 = vmul.f32 %v882_v37, %v839_v38  ;;  %v650_v41 = vpop.permute.xlu1 %649 }
  0xb0   : > { %971 = vst.msk [vmem:[#allocation2 + $0x20] sm:$0xff] %vm966_vm0, %v927_v39  ;;  %v842_v43 = vmul.f32 %v5668_v31, %v650_v41  ;;  %v640_v44 = vpop.permute.xlu0 %639  ;;  %v5719_v41 = vld [vmem:[%s6366_s3 + $0x60] sm:$0xff]  }
  0xb1   : > { %969 = vst.msk [vmem:[#allocation2 + $0x10] sm:$0xff] %vm966_vm0, %v925_v40  ;;  %v840_v46 = vmul.f32 %v5668_v31, %v640_v44 }
  0xb2   : > { %v928_v47 = vmul.f32 %v885_v42, %v842_v43 }
  0xb3   : > { %v926_v48 = vmul.f32 %v883_v45, %v840_v46  ;;  %v625_v49 = vpop.permute.xlu1 %624  ;;  %v894_v46 = vld [vmem:[%s5666_s27 + $0x70] sm:$0xff] }
  0xb4   : > { %972 = vst.msk [vmem:[#allocation2 + $0x28] sm:$0xff] %vm966_vm0, %v928_v47  ;;  %v655_v51 = vpop.permute.xlu0 %654  ;;  %v837_v53 = vmul.f32 %v5668_v31, %v625_v49 }
  0xb5   : > { %970 = vst.msk [vmem:[#allocation2 + $0x18] sm:$0xff] %vm966_vm0, %v926_v48  ;;  %v843_v54 = vmul.f32 %v5668_v31, %v655_v51  ;;  %v895_v51 = vld [vmem:[%s5666_s27 + $0x78] sm:$0xff] }
  0xb6   : > { %v923_v55 = vmul.f32 %v880_v50, %v837_v53 }
  0xb7   : > { %v929_v56 = vmul.f32 %v886_v52, %v843_v54  ;;  %v660_v57 = vpop.permute.xlu1 %659  ;;  %v5738_v54 = vld [vmem:[%s6366_s3 + $0x20] sm:$0xff]  }
  0xb8   : > { %967 = vst.msk [vmem:[#allocation2] sm:$0xff] %vm966_vm0, %v923_v55  ;;  %v630_v59 = vpop.permute.xlu0 %629  ;;  %v844_v61 = vmul.f32 %v5668_v31, %v660_v57 }
  0xb9   : > { %973 = vst.msk [vmem:[#allocation2 + $0x30] sm:$0xff] %vm966_vm0, %v929_v56  ;;  %v838_v62 = vmul.f32 %v5668_v31, %v630_v59  ;;  %v896_v56 = vld [vmem:[%s5666_s27 + $0x80] sm:$0xff] }
  0xba   : > { %v930_v63 = vmul.f32 %v887_v58, %v844_v61 }
  0xbb   : > { %v924_v0 = vmul.f32 %v881_v60, %v838_v62  ;;  %v670_v1 = vpop.permute.xlu1 %669  ;;  %v2289_v18 = vld [vmem:[#allocation2 + $0x23] sm:$0xff] }
  0xbc   : > { %974 = vst.msk [vmem:[#allocation2 + $0x38] sm:$0xff] %vm966_vm0, %v930_v63  ;;  %v665_v3 = vpop.permute.xlu0 %664  ;;  %v846_v5 = vmul.f32 %v5668_v31, %v670_v1  ;;  %v2287_v6 = vld [vmem:[#allocation2 + $0x13] sm:$0xff]  ;;  %v2288_v7 = vld [vmem:[#allocation2 + $0x1b] sm:$0xff] }
  0xbd   : > { %968 = vst.msk [vmem:[#allocation2 + $0x8] sm:$0xff] %vm966_vm0, %v924_v0  ;;  %v845_v8 = vmul.f32 %v5668_v31, %v665_v3  ;;  %v2323_v9 = vpack.c.bf16 %v2288_v7, %v2287_v6  ;;  %v1071_v26 = vld [vmem:[#allocation2 + $0x11] sm:$0xff]  ;;  %v1072_v27 = vld [vmem:[#allocation2 + $0x19] sm:$0xff]  ;;  %v1073_v40 = vld [vmem:[#allocation2 + $0x21] sm:$0xff] }
  0xbe   : > { %v932_v10 = vmul.f32 %v889_v2, %v846_v5  ;;  %v1106_v39 = vpack.c.bf16 %v1072_v27, %v1071_v26  ;;  %v897_v0 = vld [vmem:[%s5666_s27 + $0x88] sm:$0xff] }
  0xbf   : > { %v931_v11 = vmul.f32 %v888_v4, %v845_v8  ;;  %4830 = vmatprep.mubr.msk.bf16.mxu0 %vm966_vm0, %v2323_v9  ;;  %v680_v12 = vpop.permute.xlu1 %679 }
  0xc0   : > { %976 = vst.msk [vmem:[#allocation2 + $0x48] sm:$0xff] %vm966_vm0, %v932_v10  ;;  %v675_v14 = vpop.permute.xlu0 %674  ;;  %v848_v16 = vmul.f32 %v5668_v31, %v680_v12  ;;  %v2290_v19 = vld [vmem:[#allocation2 + $0x2b] sm:$0xff] }
  0xc1   : > { %975 = vst.msk [vmem:[#allocation2 + $0x40] sm:$0xff] %vm966_vm0, %v931_v11  ;;  %v847_v20 = vmul.f32 %v5668_v31, %v675_v14  ;;  %v2324_v21 = vpack.c.bf16 %v2290_v19, %v2289_v18  ;;  %v1074_v33 = vld [vmem:[#allocation2 + $0x29] sm:$0xff] }
  0xc2   : > { %v934_v23 = vmul.f32 %v891_v13, %v848_v16  ;;  %v1107_v43 = vpack.c.bf16 %v1074_v33, %v1073_v40  ;;  %v898_v10 = vld [vmem:[%s5666_s27 + $0x90] sm:$0xff] }
  0xc3   : > { %v933_v24 = vmul.f32 %v890_v15, %v847_v20  ;;  %4831 = vmatmul.mubr.msk.bf16.vlgmr.msra.gmra.mrb[0].mxu0 %vm966_vm0, %v2324_v21  ;;  %v2291_v47 = vld [vmem:[#allocation2 + $0x33] sm:$0xff]  ;;  %v900_v20 = vld [vmem:[%s5666_s27 + $0xa0] sm:$0xff] }
  0xc4   : > { %978 = vst.msk [vmem:[#allocation2 + $0x58] sm:$0xff] %vm966_vm0, %v934_v23  ;;  %v685_v28 = vpop.permute.xlu0 %684  ;;  %v1069_v29 = vld [vmem:[#allocation2 + $0x1] sm:$0xff]  ;;  %v1070_v30 = vld [vmem:[#allocation2 + $0x9] sm:$0xff]  ;;  %4867 = vmatpush3.bf16.msra.mxu0 %v5641_v17  ;;  %v1075_v2 = vld [vmem:[#allocation2 + $0x31] sm:$0xff] }
  0xc5   : > { %977 = vst.msk [vmem:[#allocation2 + $0x50] sm:$0xff] %vm966_vm0, %v933_v24  ;;  %v849_v34 = vmul.f32 %v5668_v31, %v685_v28  ;;  %v690_v35 = vpop.permute.xlu1 %689  ;;  %v1105_v37 = vpack.c.bf16 %v1070_v30, %v1069_v29  ;;  %4868 = vmatprep.subr.bf16.mxu0 %v5337_v22  ;;  %v5339_v17 = vld [vmem:[%s6366_s3 + $0x8] sm:$0xff]   ;;  %v899_v15 = vld [vmem:[%s5666_s27 + $0x98] sm:$0xff] }
  0xc6   : > { %v850_v38 = vmul.f32 %v5668_v31, %v690_v35  ;;  %v901_v29 = vld [vmem:[%s5666_s27 + $0xa8] sm:$0xff] }
  0xc7   : > { %v935_v42 = vmul.f32 %v892_v25, %v849_v34  ;;  %4670 = vmatprep.mubr.msk.bf16.mxu1 %vm966_vm0, %v1105_v37 }
  0xc8   : > { %v936_v44 = vmul.f32 %v893_v36, %v850_v38  ;;  %v695_v45 = vpop.permute.xlu0 %694  ;;  %4671 = vmatmul.mubr.msk.bf16.vlgmr.msra.gmra.mrb[0].mxu1 %vm966_vm0, %v1106_v39  ;;  %v2292_v48 = vld [vmem:[#allocation2 + $0x3b] sm:$0xff]  ;;  %4869 = vmatpush3.bf16.msra.mxu0 %v5337_v22  ;;  %v2293_v59 = vld [vmem:[#allocation2 + $0x43] sm:$0xff] }
  0xc9   : > { %979 = vst.msk [vmem:[#allocation2 + $0x60] sm:$0xff] %vm966_vm0, %v935_v42  ;;  %v851_v49 = vmul.f32 %v5668_v31, %v695_v45  ;;  %v700_v50 = vpop.permute.xlu1 %699  ;;  %4674 = vmatprep.mubr.msk.bf16.mxu1 %vm966_vm0, %v1107_v43  ;;  %v2325_v52 = vpack.c.bf16 %v2292_v48, %v2291_v47  ;;  %4707 = vmatpush3.bf16.msra.mxu1 %v5649_v32  ;;  %v1076_v57 = vld [vmem:[#allocation2 + $0x39] sm:$0xff]  ;;  %v1077_v5 = vld [vmem:[#allocation2 + $0x41] sm:$0xff] }
  0xca   : > { %980 = vst.msk [vmem:[#allocation2 + $0x68] sm:$0xff] %vm966_vm0, %v936_v44  ;;  %v852_v53 = vmul.f32 %v5668_v31, %v700_v50  ;;  %4906 = vmatprep.subr.bf16.mxu0 %v5719_v41  ;;  %4708 = vmatprep.subr.bf16.mxu1 %v5339_v17  ;;  %v1108_v4 = vpack.c.bf16 %v1076_v57, %v1075_v2  ;;  %v904_v50 = vld [vmem:[%s5666_s27 + $0xc0] sm:$0xff] }
  0xcb   : > { %v937_v55 = vmul.f32 %v894_v46, %v851_v49  ;;  %4834 = vmatprep.mubr.msk.bf16.mxu0 %vm966_vm0, %v2325_v52  ;;  %v903_v46 = vld [vmem:[%s5666_s27 + $0xb8] sm:$0xff] }
  0xcc   : > { %v938_v58 = vmul.f32 %v895_v51, %v852_v53  ;;  %v705_v32 = vpop.permute.xlu0 %704  ;;  %v2294_v60 = vld [vmem:[#allocation2 + $0x4b] sm:$0xff]  ;;  %v2295_v11 = vld [vmem:[#allocation2 + $0x53] sm:$0xff] }
  0xcd   : > { %v1078_v61 = vld [vmem:[#allocation2 + $0x49] sm:$0xff]  ;;  %981 = vst.msk [vmem:[#allocation2 + $0x70] sm:$0xff] %vm966_vm0, %v937_v55  ;;  %v853_v62 = vmul.f32 %v5668_v31, %v705_v32  ;;  %v710_v63 = vpop.permute.xlu1 %709  ;;  %v2326_v1 = vpack.c.bf16 %v2294_v60, %v2293_v59  ;;  %4709 = vmatpush3.bf16.msra.mxu1 %v5339_v17  ;;  %v1079_v33 = vld [vmem:[#allocation2 + $0x51] sm:$0xff] }
  0xce   : > { %982 = vst.msk [vmem:[#allocation2 + $0x78] sm:$0xff] %vm966_vm0, %v938_v58  ;;  %v854_v3 = vmul.f32 %v5668_v31, %v710_v63  ;;  %4746 = vmatprep.subr.bf16.mxu1 %v5738_v54  ;;  %v1109_v7 = vpack.c.bf16 %v1078_v61, %v1077_v5  ;;  %v902_v17 = vld [vmem:[%s5666_s27 + $0xb0] sm:$0xff]  ;;  %v905_v59 = vld [vmem:[%s5666_s27 + $0xc8] sm:$0xff] }
  0xcf   : > { %v939_v6 = vmul.f32 %v896_v56, %v853_v62  ;;  %4835 = vmatmul.mubr.msk.bf16.gmra.mrb[4].mxu0 %vm966_vm0, %v2326_v1  ;;  %v906_v5 = vld [vmem:[%s5666_s27 + $0xd0] sm:$0xff] }
  0xd0   : > { %v940_v8 = vmul.f32 %v897_v0, %v854_v3  ;;  %v715_v9 = vpop.permute.xlu0 %714  ;;  %4675 = vmatmul.mubr.msk.bf16.gmra.mrb[4].mxu1 %vm966_vm0, %v1108_v4  ;;  %v2296_v12 = vld [vmem:[#allocation2 + $0x5b] sm:$0xff] }
  0xd1   : > { %983 = vst.msk [vmem:[#allocation2 + $0x80] sm:$0xff] %vm966_vm0, %v939_v6  ;;  %v855_v13 = vmul.f32 %v5668_v31, %v715_v9  ;;  %v720_v14 = vpop.permute.xlu1 %719  ;;  %4678 = vmatprep.mubr.msk.bf16.mxu1 %vm966_vm0, %v1109_v7  ;;  %v2327_v16 = vpack.c.bf16 %v2296_v12, %v2295_v11  ;;  %v1080_v21 = vld [vmem:[#allocation2 + $0x59] sm:$0xff]  ;;  %v2297_v24 = vld [vmem:[#allocation2 + $0x63] sm:$0xff] }
  0xd2   : > { %984 = vst.msk [vmem:[#allocation2 + $0x88] sm:$0xff] %vm966_vm0, %v940_v8  ;;  %v856_v18 = vmul.f32 %v5668_v31, %v720_v14  ;;  %v1110_v35 = vpack.c.bf16 %v1080_v21, %v1079_v33  ;;  %v1081_v36 = vld [vmem:[#allocation2 + $0x61] sm:$0xff] }
  0xd3   : > { %v941_v19 = vmul.f32 %v898_v10, %v855_v13  ;;  %4838 = vmatprep.mubr.msk.bf16.mxu0 %vm966_vm0, %v2327_v16  ;;  %v907_v10 = vld [vmem:[%s5666_s27 + $0xd8] sm:$0xff]  ;;  %v908_v13 = vld [vmem:[%s5666_s27 + $0xe0] sm:$0xff] }
  0xd4   : > { %v942_v22 = vmul.f32 %v899_v15, %v856_v18  ;;  %v725_v23 = vpop.permute.xlu0 %724  ;;  %v2298_v25 = vld [vmem:[#allocation2 + $0x6b] sm:$0xff]  ;;  %v2624_v16 = vld [vmem:[#allocation2 + $0x14] sm:$0xff]  ;;  %v2625_v18 = vld [vmem:[#allocation2 + $0x1c] sm:$0xff] }
  0xd5   : > { %v1082_v26 = vld [vmem:[#allocation2 + $0x69] sm:$0xff]  ;;  %985 = vst.msk [vmem:[#allocation2 + $0x90] sm:$0xff] %vm966_vm0, %v941_v19  ;;  %v857_v27 = vmul.f32 %v5668_v31, %v725_v23  ;;  %v730_v28 = vpop.permute.xlu1 %729  ;;  %v2328_v30 = vpack.c.bf16 %v2298_v25, %v2297_v24  ;;  %v2299_v42 = vld [vmem:[#allocation2 + $0x73] sm:$0xff]  ;;  %v2660_v33 = vpack.c.bf16 %v2625_v18, %v2624_v16 }
  0xd6   : > { %986 = vst.msk [vmem:[#allocation2 + $0x98] sm:$0xff] %vm966_vm0, %v942_v22  ;;  %v858_v34 = vmul.f32 %v5668_v31, %v730_v28  ;;  %v1111_v38 = vpack.c.bf16 %v1082_v26, %v1081_v36  ;;  %v1083_v61 = vld [vmem:[#allocation2 + $0x71] sm:$0xff]  ;;  %v909_v26 = vld [vmem:[%s5666_s27 + $0xe8] sm:$0xff] }
  0xd7   : > { %v943_v37 = vmul.f32 %v900_v20, %v857_v27  ;;  %4839 = vmatmul.mubr.msk.bf16.gmra.mrb[8].mxu0 %vm966_vm0, %v2328_v30  ;;  %v2630_v16 = vld [vmem:[#allocation2 + $0x44] sm:$0xff] }
  0xd8   : > { %v944_v39 = vmul.f32 %v901_v29, %v858_v34  ;;  %v735_v40 = vpop.permute.xlu0 %734  ;;  %4679 = vmatmul.mubr.msk.bf16.gmra.mrb[8].mxu1 %vm966_vm0, %v1110_v35  ;;  %v2300_v43 = vld [vmem:[#allocation2 + $0x7b] sm:$0xff] }
  0xd9   : > { %987 = vst.msk [vmem:[#allocation2 + $0xa0] sm:$0xff] %vm966_vm0, %v943_v37  ;;  %v859_v44 = vmul.f32 %v5668_v31, %v735_v40  ;;  %v740_v45 = vpop.permute.xlu1 %739  ;;  %4682 = vmatprep.mubr.msk.bf16.mxu1 %vm966_vm0, %v1111_v38  ;;  %v2329_v47 = vpack.c.bf16 %v2300_v43, %v2299_v42  ;;  %v1084_v51 = vld [vmem:[#allocation2 + $0x79] sm:$0xff]  ;;  %v2301_v55 = vld [vmem:[#allocation2 + $0x83] sm:$0xff] }
  0xda   : > { %988 = vst.msk [vmem:[#allocation2 + $0xa8] sm:$0xff] %vm966_vm0, %v944_v39  ;;  %v860_v48 = vmul.f32 %v5668_v31, %v740_v45  ;;  %v1112_v63 = vpack.c.bf16 %v1084_v51, %v1083_v61  ;;  %v1085_v0 = vld [vmem:[#allocation2 + $0x81] sm:$0xff]  ;;  %v910_v39 = vld [vmem:[%s5666_s27 + $0xf0] sm:$0xff]  ;;  %v911_v42 = vld [vmem:[%s5666_s27 + $0xf8] sm:$0xff] }
  0xdb   : > { %v945_v49 = vmul.f32 %v902_v17, %v859_v44  ;;  %4842 = vmatprep.mubr.msk.bf16.mxu0 %vm966_vm0, %v2329_v47  ;;  %v2627_v44 = vld [vmem:[#allocation2 + $0x2c] sm:$0xff]  ;;  %v2629_v51 = vld [vmem:[#allocation2 + $0x3c] sm:$0xff] }
  0xdc   : > { %v946_v52 = vmul.f32 %v903_v46, %v860_v48  ;;  %v745_v53 = vpop.permute.xlu0 %744  ;;  %v2302_v56 = vld [vmem:[#allocation2 + $0x8b] sm:$0xff]  ;;  %v912_v46 = vld [vmem:[%s5666_s27 + $0x100] sm:$0xff] }
  0xdd   : > { %v1086_v57 = vld [vmem:[#allocation2 + $0x89] sm:$0xff]  ;;  %989 = vst.msk [vmem:[#allocation2 + $0xb0] sm:$0xff] %vm966_vm0, %v945_v49  ;;  %v861_v58 = vmul.f32 %v5668_v31, %v745_v53  ;;  %v750_v32 = vpop.permute.xlu1 %749  ;;  %v2330_v60 = vpack.c.bf16 %v2302_v56, %v2301_v55  ;;  %v2303_v6 = vld [vmem:[#allocation2 + $0x93] sm:$0xff] }
  0xde   : > { %990 = vst.msk [vmem:[#allocation2 + $0xb8] sm:$0xff] %vm966_vm0, %v946_v52  ;;  %v862_v62 = vmul.f32 %v5668_v31, %v750_v32  ;;  %v1113_v2 = vpack.c.bf16 %v1086_v57, %v1085_v0  ;;  %v1087_v28 = vld [vmem:[#allocation2 + $0x91] sm:$0xff]  ;;  %v913_v56 = vld [vmem:[%s5666_s27 + $0x108] sm:$0xff] }
  0xdf   : > { %v947_v1 = vmul.f32 %v904_v50, %v861_v58  ;;  %4843 = vmatmul.mubr.msk.bf16.gmra.mrb[12].mxu0 %vm966_vm0, %v2330_v60  ;;  %v2626_v50 = vld [vmem:[#allocation2 + $0x24] sm:$0xff]  ;;  %v2628_v60 = vld [vmem:[#allocation2 + $0x34] sm:$0xff] }
  0xe0   : > { %v948_v3 = vmul.f32 %v905_v59, %v862_v62  ;;  %v755_v4 = vpop.permute.xlu0 %754  ;;  %4683 = vmatmul.mubr.msk.bf16.gmra.mrb[12].mxu1 %vm966_vm0, %v1112_v63  ;;  %v2304_v7 = vld [vmem:[#allocation2 + $0x9b] sm:$0xff]  ;;  %v5810_v57 = vpack.c.bf16 %v2627_v44, %v2626_v50  ;;  %v5340_v62 = vld [vmem:[%s6366_s3 + $0x68] sm:$0xff]   ;;  %v5819_v0 = vpack.c.bf16 %v2629_v51, %v2628_v60 }
  0xe1   : > { %991 = vst.msk [vmem:[#allocation2 + $0xc0] sm:$0xff] %vm966_vm0, %v947_v1  ;;  %v863_v8 = vmul.f32 %v5668_v31, %v755_v4  ;;  %v760_v9 = vpop.permute.xlu1 %759  ;;  %4686 = vmatprep.mubr.msk.bf16.mxu1 %vm966_vm0, %v1113_v2  ;;  %v2331_v11 = vpack.c.bf16 %v2304_v7, %v2303_v6  ;;  %v1088_v15 = vld [vmem:[#allocation2 + $0x99] sm:$0xff]  ;;  %v2305_v21 = vld [vmem:[#allocation2 + $0xa3] sm:$0xff]  ;;  %v914_v4 = vld [vmem:[%s5666_s27 + $0x110] sm:$0xff] }
  0xe2   : > { %992 = vst.msk [vmem:[#allocation2 + $0xc8] sm:$0xff] %vm966_vm0, %v948_v3  ;;  %v864_v12 = vmul.f32 %v5668_v31, %v760_v9  ;;  %v1114_v30 = vpack.c.bf16 %v1088_v15, %v1087_v28  ;;  %v1089_v34 = vld [vmem:[#allocation2 + $0xa1] sm:$0xff]  ;;  %v915_v7 = vld [vmem:[%s5666_s27 + $0x118] sm:$0xff]  ;;  %v2631_v9 = vld [vmem:[#allocation2 + $0x4c] sm:$0xff] }
  0xe3   : > { %v949_v14 = vmul.f32 %v906_v5, %v863_v8  ;;  %4846 = vmatprep.mubr.msk.bf16.mxu0 %vm966_vm0, %v2331_v11  ;;  %v916_v15 = vld [vmem:[%s5666_s27 + $0x120] sm:$0xff] }
  0xe4   : > { %v950_v19 = vmul.f32 %v907_v10, %v864_v12  ;;  %v765_v20 = vpop.permute.xlu0 %764  ;;  %v2306_v22 = vld [vmem:[#allocation2 + $0xab] sm:$0xff]  ;;  %v2633_v12 = vld [vmem:[#allocation2 + $0x5c] sm:$0xff] }
  0xe5   : > { %v1090_v23 = vld [vmem:[#allocation2 + $0xa9] sm:$0xff]  ;;  %993 = vst.msk [vmem:[#allocation2 + $0xd0] sm:$0xff] %vm966_vm0, %v949_v14  ;;  %v865_v24 = vmul.f32 %v5668_v31, %v765_v20  ;;  %v770_v25 = vpop.permute.xlu1 %769  ;;  %v2332_v27 = vpack.c.bf16 %v2306_v22, %v2305_v21  ;;  %v1091_v58 = vld [vmem:[#allocation2 + $0xb1] sm:$0xff]  ;;  %v5841_v22 = vpack.c.bf16 %v2631_v9, %v2630_v16 }
  0xe6   : > { %994 = vst.msk [vmem:[#allocation2 + $0xd8] sm:$0xff] %vm966_vm0, %v950_v19  ;;  %v866_v29 = vmul.f32 %v5668_v31, %v770_v25  ;;  %v1115_v36 = vpack.c.bf16 %v1090_v23, %v1089_v34  ;;  %v917_v21 = vld [vmem:[%s5666_s27 + $0x128] sm:$0xff]  ;;  %v1013_v16 = vld [vmem:[#allocation2 + $0x10] sm:$0xff] }
  0xe7   : > { %v951_v35 = vmul.f32 %v908_v13, %v865_v24  ;;  %4847 = vmatmul.mubr.msk.bf16.gmra.mrb[16].mxu0 %vm966_vm0, %v2332_v27  ;;  %v2632_v24 = vld [vmem:[#allocation2 + $0x54] sm:$0xff]  ;;  %v2643_v9 = vld [vmem:[#allocation2 + $0xac] sm:$0xff] }
  0xe8   : > { %v952_v37 = vmul.f32 %v909_v26, %v866_v29  ;;  %v775_v38 = vpop.permute.xlu0 %774  ;;  %4687 = vmatmul.mubr.msk.bf16.gmra.mrb[16].mxu1 %vm966_vm0, %v1114_v30  ;;  %4870 = vmatprep.mubr.msk.bf16.mxu0 %vm966_vm0, %v2660_v33  ;;  %v1092_v47 = vld [vmem:[#allocation2 + $0xb9] sm:$0xff]  ;;  %v5846_v27 = vpack.c.bf16 %v2633_v12, %v2632_v24  ;;  %v2642_v12 = vld [vmem:[#allocation2 + $0xa4] sm:$0xff] }
  0xe9   : > { %995 = vst.msk [vmem:[#allocation2 + $0xe0] sm:$0xff] %vm966_vm0, %v951_v35  ;;  %v867_v40 = vmul.f32 %v5668_v31, %v775_v38  ;;  %v780_v17 = vpop.permute.xlu1 %779  ;;  %4690 = vmatprep.mubr.msk.bf16.mxu1 %vm966_vm0, %v1115_v36  ;;  %v1116_v59 = vpack.c.bf16 %v1092_v47, %v1091_v58  ;;  %v1093_v61 = vld [vmem:[#allocation2 + $0xc1] sm:$0xff]  ;;  %v918_v35 = vld [vmem:[%s5666_s27 + $0x130] sm:$0xff]  ;;  %v919_v38 = vld [vmem:[%s5666_s27 + $0x138] sm:$0xff] }
  0xea   : > { %996 = vst.msk [vmem:[#allocation2 + $0xe8] sm:$0xff] %vm966_vm0, %v952_v37  ;;  %v868_v43 = vmul.f32 %v5668_v31, %v780_v17  ;;  %v2634_v47 = vld [vmem:[#allocation2 + $0x64] sm:$0xff] }
  0xeb   : > { %v953_v45 = vmul.f32 %v910_v39, %v867_v40  ;;  %v2635_v40 = vld [vmem:[#allocation2 + $0x6c] sm:$0xff] }
  0xec   : > { %v954_v48 = vmul.f32 %v911_v42, %v868_v43  ;;  %v785_v49 = vpop.permute.xlu0 %784  ;;  %v1094_v52 = vld [vmem:[#allocation2 + $0xc9] sm:$0xff]  ;;  %v2637_v43 = vld [vmem:[#allocation2 + $0x7c] sm:$0xff]  ;;  %v5863_v51 = vpack.c.bf16 %v2635_v40, %v2634_v47 }
  0xed   : > { %997 = vst.msk [vmem:[#allocation2 + $0xf0] sm:$0xff] %vm966_vm0, %v953_v45  ;;  %v869_v53 = vmul.f32 %v5668_v31, %v785_v49  ;;  %v790_v55 = vpop.permute.xlu1 %789  ;;  %v1117_v1 = vpack.c.bf16 %v1094_v52, %v1093_v61  ;;  %v1095_v23 = vld [vmem:[#allocation2 + $0xd1] sm:$0xff] }
  0xee   : > { %998 = vst.msk [vmem:[#allocation2 + $0xf8] sm:$0xff] %vm966_vm0, %v954_v48  ;;  %v870_v32 = vmul.f32 %v5668_v31, %v790_v55  ;;  %v2647_v24 = vld [vmem:[#allocation2 + $0xcc] sm:$0xff] }
  0xef   : > { %v955_v63 = vmul.f32 %v912_v46, %v869_v53  ;;  %4871 = vmatmul.mubr.msk.bf16.vlgmr.msra.gmra.mrb[0].mxu0 %vm966_vm0, %v5810_v57  ;;  %v920_v46 = vld [vmem:[%s5666_s27 + $0x140] sm:$0xff]  ;;  %v2636_v53 = vld [vmem:[#allocation2 + $0x74] sm:$0xff] }
  0xf0   : > { %v956_v2 = vmul.f32 %v913_v56, %v870_v32  ;;  %4907 = vmatpush3.bf16.msra.mxu0 %v5719_v41  ;;  %v795_v3 = vpop.permute.xlu0 %794  ;;  %4691 = vmatmul.mubr.msk.bf16.gmra.mrb[20].mxu1 %vm966_vm0, %v1116_v59  ;;  %v5833_v41 = vld [vmem:[%s6366_s3 + $0x70] sm:$0xff]   ;;  %v1096_v11 = vld [vmem:[#allocation2 + $0xd9] sm:$0xff]  ;;  %v5866_v56 = vpack.c.bf16 %v2637_v43, %v2636_v53 }
  0xf1   : > { %999 = vst.msk [vmem:[#allocation2 + $0x100] sm:$0xff] %vm966_vm0, %v955_v63  ;;  %v871_v5 = vmul.f32 %v5668_v31, %v795_v3  ;;  %v800_v6 = vpop.permute.xlu1 %799  ;;  %4874 = vmatprep.mubr.msk.bf16.mxu0 %vm966_vm0, %v5819_v0  ;;  %4694 = vmatprep.mubr.msk.bf16.mxu1 %vm966_vm0, %v1117_v1  ;;  %v1118_v26 = vpack.c.bf16 %v1096_v11, %v1095_v23  ;;  %v1097_v28 = vld [vmem:[#allocation2 + $0xe1] sm:$0xff]  ;;  %v1021_v40 = vld [vmem:[#allocation2 + $0x50] sm:$0xff] }
  0xf2   : > { %1000 = vst.msk [vmem:[#allocation2 + $0x108] sm:$0xff] %vm966_vm0, %v956_v2  ;;  %v872_v8 = vmul.f32 %v5668_v31, %v800_v6  ;;  %4908 = vmatprep.subr.bf16.mxu0 %v5340_v62  ;;  %v2638_v63 = vld [vmem:[#allocation2 + $0x84] sm:$0xff]  ;;  %v2645_v11 = vld [vmem:[#allocation2 + $0xbc] sm:$0xff]  ;;  %v1025_v53 = vld [vmem:[#allocation2 + $0x70] sm:$0xff] }
  0xf3   : > { %v957_v10 = vmul.f32 %v914_v4, %v871_v5  ;;  %v1012_v1 = vld [vmem:[#allocation2 + $0x8] sm:$0xff]  ;;  %v2640_v4 = vld [vmem:[#allocation2 + $0x94] sm:$0xff] }
  0xf4   : > { %v958_v13 = vmul.f32 %v915_v7, %v872_v8  ;;  %v805_v14 = vpop.permute.xlu0 %804  ;;  %v1098_v18 = vld [vmem:[#allocation2 + $0xe9] sm:$0xff]  ;;  %4909 = vmatpush3.bf16.msra.mxu0 %v5340_v62  ;;  %v2641_v62 = vld [vmem:[#allocation2 + $0x9c] sm:$0xff] }
  0xf5   : > { %1001 = vst.msk [vmem:[#allocation2 + $0x110] sm:$0xff] %vm966_vm0, %v957_v10  ;;  %v873_v19 = vmul.f32 %v5668_v31, %v805_v14  ;;  %v810_v20 = vpop.permute.xlu1 %809  ;;  %4946 = vmatprep.subr.bf16.mxu0 %v5833_v41  ;;  %v1119_v30 = vpack.c.bf16 %v1098_v18, %v1097_v28  ;;  %v1099_v52 = vld [vmem:[#allocation2 + $0xf1] sm:$0xff]  ;;  %v5877_v6 = vpack.c.bf16 %v2641_v62, %v2640_v4  ;;  %v1011_v7 = vld [vmem:[#allocation2] sm:$0xff]  ;;  %v1016_v14 = vld [vmem:[#allocation2 + $0x28] sm:$0xff] }
  0xf6   : > { %1002 = vst.msk [vmem:[#allocation2 + $0x118] sm:$0xff] %vm966_vm0, %v958_v13  ;;  %v874_v25 = vmul.f32 %v5668_v31, %v810_v20  ;;  %v1047_v8 = vpack.c.bf16 %v1012_v1, %v1011_v7  ;;  %v1014_v10 = vld [vmem:[#allocation2 + $0x18] sm:$0xff]  ;;  %v1015_v13 = vld [vmem:[#allocation2 + $0x20] sm:$0xff]  ;;  %v1029_v4 = vld [vmem:[#allocation2 + $0x90] sm:$0xff] }
  0xf7   : > { %v959_v29 = vmul.f32 %v916_v15, %v873_v19  ;;  %4875 = vmatmul.mubr.msk.bf16.gmra.mrb[4].mxu0 %vm966_vm0, %v5841_v22  ;;  %v5885_v15 = vpack.c.bf16 %v2643_v9, %v2642_v12  ;;  %v2644_v18 = vld [vmem:[#allocation2 + $0xb4] sm:$0xff]  ;;  %v1048_v19 = vpack.c.bf16 %v1014_v10, %v1013_v16  ;;  %v1049_v23 = vpack.c.bf16 %v1016_v14, %v1015_v13  ;;  %v2649_v28 = vld [vmem:[#allocation2 + $0xdc] sm:$0xff]  ;;  %v2650_v43 = vld [vmem:[#allocation2 + $0xe4] sm:$0xff] }
  0xf8   : > { %v960_v33 = vmul.f32 %v917_v21, %v874_v25  ;;  %v815_v34 = vpop.permute.xlu0 %814  ;;  %4695 = vmatmul.mubr.msk.bf16.gmra.mrb[24].mxu1 %vm966_vm0, %v1118_v26  ;;  %4878 = vmatprep.mubr.msk.bf16.mxu0 %vm966_vm0, %v5846_v27  ;;  %v1100_v42 = vld [vmem:[#allocation2 + $0xf9] sm:$0xff]  ;;  %v5887_v20 = vpack.c.bf16 %v2645_v11, %v2644_v18  ;;  %v5343_v21 = vld [vmem:[%s6366_s3 + $0x28] sm:$0xff]   ;;  %v5902_v25 = vld [vmem:[%s6366_s3 + $0x30] sm:$0xff]  }
  0xf9   : > { %1003 = vst.msk [vmem:[#allocation2 + $0x120] sm:$0xff] %vm966_vm0, %v959_v29  ;;  %v875_v36 = vmul.f32 %v5668_v31, %v815_v34  ;;  %v820_v37 = vpop.permute.xlu1 %819  ;;  %4698 = vmatprep.mubr.msk.bf16.mxu1 %vm966_vm0, %v1119_v30  ;;  %v1120_v55 = vpack.c.bf16 %v1100_v42, %v1099_v52  ;;  %v1101_v58 = vld [vmem:[#allocation2 + $0x101] sm:$0xff]  ;;  %v1018_v26 = vld [vmem:[#allocation2 + $0x38] sm:$0xff]  ;;  %v1033_v13 = vld [vmem:[#allocation2 + $0xb0] sm:$0xff] }
  0xfa   : > { %1004 = vst.msk [vmem:[#allocation2 + $0x128] sm:$0xff] %vm966_vm0, %v960_v33  ;;  %v876_v39 = vmul.f32 %v5668_v31, %v820_v37  ;;  %v2646_v29 = vld [vmem:[#allocation2 + $0xc4] sm:$0xff]  ;;  %v2653_v42 = vld [vmem:[#allocation2 + $0xfc] sm:$0xff]  ;;  %v2652_v47 = vld [vmem:[#allocation2 + $0xf4] sm:$0xff] }
  0xfb   : > { %v961_v17 = vmul.f32 %v918_v35, %v875_v36  ;;  %v1019_v30 = vld [vmem:[#allocation2 + $0x40] sm:$0xff]  ;;  %v1020_v33 = vld [vmem:[#allocation2 + $0x48] sm:$0xff]  ;;  %v5904_v34 = vpack.c.bf16 %v2647_v24, %v2646_v29  ;;  %v1017_v35 = vld [vmem:[#allocation2 + $0x30] sm:$0xff] }
  0xfc   : > { %v962_v44 = vmul.f32 %v919_v38, %v876_v39  ;;  %v825_v45 = vpop.permute.xlu0 %824  ;;  %v1102_v48 = vld [vmem:[#allocation2 + $0x109] sm:$0xff]  ;;  %v2648_v36 = vld [vmem:[#allocation2 + $0xd4] sm:$0xff]  ;;  %v1050_v37 = vpack.c.bf16 %v1018_v26, %v1017_v35  ;;  %v1035_v16 = vld [vmem:[#allocation2 + $0xc0] sm:$0xff] }
  0xfd   : > { %1005 = vst.msk [vmem:[#allocation2 + $0x130] sm:$0xff] %vm966_vm0, %v961_v17  ;;  %v877_v49 = vmul.f32 %v5668_v31, %v825_v45  ;;  %v830_v50 = vpop.permute.xlu1 %829  ;;  %v1121_v59 = vpack.c.bf16 %v1102_v48, %v1101_v58  ;;  %v2639_v31 = vld [vmem:[#allocation2 + $0x8c] sm:$0xff]  ;;  %v5906_v38 = vpack.c.bf16 %v2649_v28, %v2648_v36  ;;  %v1022_v17 = vld [vmem:[#allocation2 + $0x58] sm:$0xff]  ;;  %v1039_v28 = vld [vmem:[#allocation2 + $0xe0] sm:$0xff] }
  0xfe   : > { %1006 = vst.msk [vmem:[#allocation2 + $0x138] sm:$0xff] %vm966_vm0, %v962_v44  ;;  %v5875_v2 = vpack.c.bf16 %v2639_v31, %v2638_v63  ;;  %v1103_v3 = vld [vmem:[#allocation2 + $0x111] sm:$0xff]  ;;  %v1023_v44 = vld [vmem:[#allocation2 + $0x60] sm:$0xff]  ;;  %v1024_v45 = vld [vmem:[#allocation2 + $0x68] sm:$0xff]  ;;  %v1052_v48 = vpack.c.bf16 %v1022_v17, %v1021_v40 }
  0xff   : > { %v963_v32 = vmul.f32 %v920_v46, %v877_v49  ;;  %4879 = vmatmul.mubr.msk.bf16.gmra.mrb[8].mxu0 %vm966_vm0, %v5863_v51  ;;  %v2651_v39 = vld [vmem:[#allocation2 + $0xec] sm:$0xff]  ;;  %v5917_v49 = vpack.c.bf16 %v2653_v42, %v2652_v47  ;;  %v1053_v50 = vpack.c.bf16 %v1024_v45, %v1023_v44  ;;  %v1034_v14 = vld [vmem:[#allocation2 + $0xb8] sm:$0xff]  ;;  %v1617_v44 = vld [vmem:[#allocation2 + $0x22] sm:$0xff] }
 0x100   : > { %v835_v60 = vpop.permute.xlu0 %834  ;;  %4699 = vmatmul.mubr.msk.bf16.gmra.mrb[28].mxu1 %vm966_vm0, %v1120_v55  ;;  %4882 = vmatprep.mubr.msk.bf16.mxu0 %vm966_vm0, %v5866_v56  ;;  %v1104_v61 = vld [vmem:[#allocation2 + $0x119] sm:$0xff]  ;;  %v5915_v46 = vpack.c.bf16 %v2651_v39, %v2650_v43  ;;  %v2655_v52 = vld [vmem:[#allocation2 + $0x10c] sm:$0xff] }
 0x101   : > { %1007 = vst.msk [vmem:[#allocation2 + $0x140] sm:$0xff] %vm966_vm0, %v963_v32  ;;  %4702 = vmatprep.mubr.msk.bf16.mxu1 %vm966_vm0, %v1121_v59  ;;  %v1122_v5 = vpack.c.bf16 %v1104_v61, %v1103_v3  ;;  %v1026_v55 = vld [vmem:[#allocation2 + $0x78] sm:$0xff]  ;;  %v2654_v32 = vld [vmem:[#allocation2 + $0x104] sm:$0xff]  ;;  %v1037_v24 = vld [vmem:[#allocation2 + $0xd0] sm:$0xff] }
 0x102   : > { %v2657_v58 = vld [vmem:[#allocation2 + $0x11c] sm:$0xff]  ;;  %v1028_v60 = vld [vmem:[#allocation2 + $0x88] sm:$0xff]  ;;  %v5925_v31 = vpack.c.bf16 %v2655_v52, %v2654_v32  ;;  %v2656_v61 = vld [vmem:[#allocation2 + $0x114] sm:$0xff]  ;;  %v1054_v62 = vpack.c.bf16 %v1026_v55, %v1025_v53 }
 0x103   : > { %v1027_v59 = vld [vmem:[#allocation2 + $0x80] sm:$0xff]  ;;  %v5927_v63 = vpack.c.bf16 %v2657_v58, %v2656_v61  ;;  %v1032_v9 = vld [vmem:[#allocation2 + $0xa8] sm:$0xff]  ;;  %v1038_v26 = vld [vmem:[#allocation2 + $0xd8] sm:$0xff] }
 0x104   : > { %v1055_v1 = vpack.c.bf16 %v1028_v60, %v1027_v59  ;;  %v2659_v3 = vld [vmem:[#allocation2 + $0x12c] sm:$0xff]  ;;  %v2658_v7 = vld [vmem:[#allocation2 + $0x124] sm:$0xff]  ;;  %v5347_v45 = vld [vmem:[%s6366_s3 + $0x38] sm:$0xff]  }
 0x105   : > { %v5935_v10 = vpack.c.bf16 %v2659_v3, %v2658_v7  ;;  %v1036_v18 = vld [vmem:[#allocation2 + $0xc8] sm:$0xff]  ;;  %v1041_v29 = vld [vmem:[#allocation2 + $0xf0] sm:$0xff]  ;;  %v5998_v52 = vld [vmem:[%s6366_s3 + $0x40] sm:$0xff]  }
 0x106   : > { %v1044_v35 = vld [vmem:[#allocation2 + $0x108] sm:$0xff]  ;;  %v1623_v55 = vld [vmem:[#allocation2 + $0x52] sm:$0xff] }
 0x107   : > { %4883 = vmatmul.mubr.msk.bf16.gmra.mrb[12].mxu0 %vm966_vm0, %v5875_v2  ;;  %v1614_v39 = vld [vmem:[#allocation2 + $0xa] sm:$0xff]  ;;  %v1625_v32 = vld [vmem:[#allocation2 + $0x62] sm:$0xff]  ;;  %v1627_v60 = vld [vmem:[#allocation2 + $0x72] sm:$0xff] }
 0x108   : > { %4703 = vmatmul.mubr.msk.bf16.gmra.mrb[32].mxu1 %vm966_vm0, %v1122_v5  ;;  %4886 = vmatprep.mubr.msk.bf16.mxu0 %vm966_vm0, %v5877_v6  ;;  %v1030_v5 = vld [vmem:[#allocation2 + $0x98] sm:$0xff]  ;;  %v1618_v42 = vld [vmem:[#allocation2 + $0x2a] sm:$0xff] }
 0x109   : > { %4710 = vmatprep.mubr.msk.bf16.mxu1 %vm966_vm0, %v1047_v8  ;;  %v1031_v8 = vld [vmem:[#allocation2 + $0xa0] sm:$0xff]  ;;  %v1056_v11 = vpack.c.bf16 %v1030_v5, %v1029_v4  ;;  %v1622_v47 = vld [vmem:[#allocation2 + $0x4a] sm:$0xff]  ;;  %v2995_v4 = vld [vmem:[#allocation2 + $0x134] sm:$0xff] }
 0x10a   : > { %v1057_v12 = vpack.c.bf16 %v1032_v9, %v1031_v8  ;;  %v1626_v53 = vld [vmem:[#allocation2 + $0x6a] sm:$0xff]  ;;  %v1631_v8 = vld [vmem:[#allocation2 + $0x92] sm:$0xff] }
 0x10b   : > { %v1630_v59 = vld [vmem:[#allocation2 + $0x8a] sm:$0xff] }
 0x10c   : > { %v3299_v3 = vld [vmem:[#allocation2 + $0x2d] sm:$0xff]  ;;  %v3298_v9 = vld [vmem:[#allocation2 + $0x25] sm:$0xff] }
 0x10d   : > { %v1634_v5 = vld [vmem:[#allocation2 + $0xaa] sm:$0xff] }
 0x10f   : > { %4887 = vmatmul.mubr.msk.bf16.gmra.mrb[16].mxu0 %vm966_vm0, %v5885_v15 }
 0x110   : > { %4711 = vmatmul.mubr.msk.bf16.vlgmr.msra.gmra.mrb[0].mxu1 %vm966_vm0, %v1048_v19  ;;  %4890 = vmatprep.mubr.msk.bf16.mxu0 %vm966_vm0, %v5887_v20  ;;  %v1058_v19 = vpack.c.bf16 %v1034_v14, %v1033_v13  ;;  %v1636_v14 = vld [vmem:[#allocation2 + $0xba] sm:$0xff] }
 0x111   : > { %4714 = vmatprep.mubr.msk.bf16.mxu1 %vm966_vm0, %v1049_v23  ;;  %4747 = vmatpush3.bf16.msra.mxu1 %v5738_v54  ;;  %v1051_v54 = vpack.c.bf16 %v1020_v33, %v1019_v30  ;;  %v1059_v23 = vpack.c.bf16 %v1036_v18, %v1035_v16  ;;  %v1042_v30 = vld [vmem:[#allocation2 + $0xf8] sm:$0xff]  ;;  %v1043_v33 = vld [vmem:[#allocation2 + $0x100] sm:$0xff]  ;;  %v3303_v18 = vld [vmem:[#allocation2 + $0x4d] sm:$0xff] }
 0x112   : > { %4748 = vmatprep.subr.bf16.mxu1 %v5343_v21  ;;  %v1062_v36 = vpack.c.bf16 %v1042_v30, %v1041_v29  ;;  %v3300_v16 = vld [vmem:[#allocation2 + $0x35] sm:$0xff]  ;;  %v3305_v29 = vld [vmem:[#allocation2 + $0x5d] sm:$0xff] }
 0x113   : > { %v1640_v30 = vld [vmem:[#allocation2 + $0xda] sm:$0xff] }
 0x115   : > { %4749 = vmatpush3.bf16.msra.mxu1 %v5343_v21  ;;  %v5344_v21 = vld [vmem:[%s6366_s3 + $0x78] sm:$0xff]  }
 0x116   : > { %4786 = vmatprep.subr.bf16.mxu1 %v5902_v25 }
 0x117   : > { %4891 = vmatmul.mubr.msk.bf16.gmra.mrb[20].mxu0 %vm966_vm0, %v5904_v34 }
 0x118   : > { %4715 = vmatmul.mubr.msk.bf16.gmra.mrb[4].mxu1 %vm966_vm0, %v1050_v37  ;;  %4894 = vmatprep.mubr.msk.bf16.mxu0 %vm966_vm0, %v5906_v38  ;;  %v1063_v37 = vpack.c.bf16 %v1044_v35, %v1043_v33  ;;  %v3307_v33 = vld [vmem:[#allocation2 + $0x6d] sm:$0xff]  ;;  %v3304_v35 = vld [vmem:[#allocation2 + $0x55] sm:$0xff] }
 0x119   : > { %4718 = vmatprep.mubr.msk.bf16.mxu1 %vm966_vm0, %v1051_v54  ;;  %v1613_v54 = vld [vmem:[#allocation2 + $0x2] sm:$0xff] }
 0x11a   : > { %v1649_v17 = vpack.c.bf16 %v1614_v39, %v1613_v54  ;;  %v1641_v39 = vld [vmem:[#allocation2 + $0xe2] sm:$0xff] }
 0x11f   : > { %4895 = vmatmul.mubr.msk.bf16.gmra.mrb[24].mxu0 %vm966_vm0, %v5915_v46 }
 0x120   : > { %4719 = vmatmul.mubr.msk.bf16.gmra.mrb[8].mxu1 %vm966_vm0, %v1052_v48  ;;  %4898 = vmatprep.mubr.msk.bf16.mxu0 %vm966_vm0, %v5917_v49  ;;  %v1619_v48 = vld [vmem:[#allocation2 + $0x32] sm:$0xff] }
 0x121   : > { %4722 = vmatprep.mubr.msk.bf16.mxu1 %vm966_vm0, %v1053_v50 }
 0x127   : > { %4899 = vmatmul.mubr.msk.bf16.gmra.mrb[28].mxu0 %vm966_vm0, %v5925_v31 }
 0x128   : > { %4723 = vmatmul.mubr.msk.bf16.gmra.mrb[12].mxu1 %vm966_vm0, %v1054_v62  ;;  %4902 = vmatprep.mubr.msk.bf16.mxu0 %vm966_vm0, %v5927_v63  ;;  %v1629_v62 = vld [vmem:[#allocation2 + $0x82] sm:$0xff] }
 0x129   : > { %4726 = vmatprep.mubr.msk.bf16.mxu1 %vm966_vm0, %v1055_v1  ;;  %v1632_v1 = vld [vmem:[#allocation2 + $0x9a] sm:$0xff] }
 0x12f   : > { %4903 = vmatmul.mubr.msk.bf16.gmra.mrb[32].mxu0 %vm966_vm0, %v5935_v10 }
 0x130   : > { %4727 = vmatmul.mubr.msk.bf16.gmra.mrb[16].mxu1 %vm966_vm0, %v1056_v11  ;;  %4910 = vmatprep.mubr.msk.bf16.mxu0 %vm966_vm0, %v5810_v57  ;;  %v5956_v57 = vld [vmem:[%s6366_s3 + $0x80] sm:$0xff]   ;;  %v3334_v11 = vpack.c.bf16 %v3299_v3, %v3298_v9 }
 0x131   : > { %4730 = vmatprep.mubr.msk.bf16.mxu1 %vm966_vm0, %v1057_v12  ;;  %v1633_v12 = vld [vmem:[#allocation2 + $0xa2] sm:$0xff] }
 0x132   : > { %v6038_v13 = vpack.c.bf16 %v1634_v5, %v1633_v12  ;;  %v3319_v5 = vld [vmem:[#allocation2 + $0xcd] sm:$0xff]  ;;  %v3318_v9 = vld [vmem:[#allocation2 + $0xc5] sm:$0xff]  ;;  %v3321_v12 = vld [vmem:[#allocation2 + $0xdd] sm:$0xff] }
 0x137   : > { %4911 = vmatmul.mubr.msk.bf16.vlgmr.msra.gmra.mrb[0].mxu0 %vm966_vm0, %v5819_v0  ;;  %v1040_v0 = vld [vmem:[#allocation2 + $0xe8] sm:$0xff] }
 0x138   : > { %4947 = vmatpush3.bf16.msra.mxu0 %v5833_v41  ;;  %4731 = vmatmul.mubr.msk.bf16.gmra.mrb[20].mxu1 %vm966_vm0, %v1058_v19  ;;  %v1060_v41 = vpack.c.bf16 %v1038_v26, %v1037_v24  ;;  %v1638_v19 = vld [vmem:[#allocation2 + $0xca] sm:$0xff] }
 0x139   : > { %4914 = vmatprep.mubr.msk.bf16.mxu0 %vm966_vm0, %v5841_v22  ;;  %4734 = vmatprep.mubr.msk.bf16.mxu1 %vm966_vm0, %v1059_v23  ;;  %v1061_v22 = vpack.c.bf16 %v1040_v0, %v1039_v28  ;;  %v1635_v23 = vld [vmem:[#allocation2 + $0xb2] sm:$0xff]  ;;  %v3302_v26 = vld [vmem:[#allocation2 + $0x45] sm:$0xff] }
 0x13a   : > { %4948 = vmatprep.subr.bf16.mxu0 %v5344_v21  ;;  %v6045_v24 = vpack.c.bf16 %v1636_v14, %v1635_v23  ;;  %v1637_v28 = vld [vmem:[#allocation2 + $0xc2] sm:$0xff]  ;;  %v3320_v14 = vld [vmem:[#allocation2 + $0xd5] sm:$0xff] }
 0x13b   : > { %v5348_v0 = vld [vmem:[%s6366_s3 + $0x88] sm:$0xff]  }
 0x13c   : > { %4949 = vmatpush3.bf16.msra.mxu0 %v5344_v21  ;;  %v3326_v23 = vld [vmem:[#allocation2 + $0x105] sm:$0xff] }
 0x13d   : > { %4986 = vmatprep.subr.bf16.mxu0 %v5956_v57 }
 0x13f   : > { %4915 = vmatmul.mubr.msk.bf16.gmra.mrb[4].mxu0 %vm966_vm0, %v5846_v27  ;;  %v1045_v27 = vld [vmem:[#allocation2 + $0x110] sm:$0xff] }
 0x140   : > { %4735 = vmatmul.mubr.msk.bf16.gmra.mrb[24].mxu1 %vm966_vm0, %v1060_v41  ;;  %4918 = vmatprep.mubr.msk.bf16.mxu0 %vm966_vm0, %v5863_v51  ;;  %v1046_v51 = vld [vmem:[#allocation2 + $0x118] sm:$0xff]  ;;  %v3336_v41 = vpack.c.bf16 %v3303_v18, %v3302_v26  ;;  %v3322_v18 = vld [vmem:[#allocation2 + $0xe5] sm:$0xff] }
 0x141   : > { %4738 = vmatprep.mubr.msk.bf16.mxu1 %vm966_vm0, %v1061_v22  ;;  %v1064_v40 = vpack.c.bf16 %v1046_v51, %v1045_v27  ;;  %v6051_v22 = vpack.c.bf16 %v1638_v19, %v1637_v28  ;;  %v1639_v27 = vld [vmem:[#allocation2 + $0xd2] sm:$0xff]  ;;  %v3306_v51 = vld [vmem:[#allocation2 + $0x65] sm:$0xff] }
 0x142   : > { %v6059_v54 = vpack.c.bf16 %v1640_v30, %v1639_v27  ;;  %v3331_v28 = vld [vmem:[#allocation2 + $0x12d] sm:$0xff]  ;;  %v3637_v27 = vld [vmem:[#allocation2 + $0x36] sm:$0xff] }
 0x143   : > { %v3636_v30 = vld [vmem:[#allocation2 + $0x2e] sm:$0xff] }
 0x147   : > { %4919 = vmatmul.mubr.msk.bf16.gmra.mrb[8].mxu0 %vm966_vm0, %v5866_v56  ;;  %v1615_v56 = vld [vmem:[#allocation2 + $0x12] sm:$0xff] }
 0x148   : > { %4739 = vmatmul.mubr.msk.bf16.gmra.mrb[28].mxu1 %vm966_vm0, %v1062_v36  ;;  %4922 = vmatprep.mubr.msk.bf16.mxu0 %vm966_vm0, %v5875_v2  ;;  %v1616_v2 = vld [vmem:[#allocation2 + $0x1a] sm:$0xff]  ;;  %v1642_v36 = vld [vmem:[#allocation2 + $0xea] sm:$0xff] }
 0x149   : > { %4742 = vmatprep.mubr.msk.bf16.mxu1 %vm966_vm0, %v1063_v37  ;;  %v5977_v43 = vpack.c.bf16 %v1616_v2, %v1615_v56  ;;  %v3337_v37 = vpack.c.bf16 %v3305_v29, %v3304_v35  ;;  %v1644_v56 = vld [vmem:[#allocation2 + $0xfa] sm:$0xff]  ;;  %v3311_v2 = vld [vmem:[#allocation2 + $0x8d] sm:$0xff] }
 0x14a   : > { %v3635_v35 = vld [vmem:[#allocation2 + $0x26] sm:$0xff] }
 0x14f   : > { %4923 = vmatmul.mubr.msk.bf16.gmra.mrb[12].mxu0 %vm966_vm0, %v5877_v6  ;;  %v5984_v6 = vpack.c.bf16 %v1618_v42, %v1617_v44  ;;  %v3308_v42 = vld [vmem:[#allocation2 + $0x75] sm:$0xff]  ;;  %v1646_v44 = vld [vmem:[#allocation2 + $0x10a] sm:$0xff] }
 0x150   : > { %4743 = vmatmul.mubr.msk.bf16.gmra.mrb[32].mxu1 %vm966_vm0, %v1064_v40  ;;  %4926 = vmatprep.mubr.msk.bf16.mxu0 %vm966_vm0, %v5885_v15  ;;  %v1620_v15 = vld [vmem:[#allocation2 + $0x3a] sm:$0xff]  ;;  %v6062_v40 = vpack.c.bf16 %v1642_v36, %v1641_v39  ;;  %v3671_v36 = vpack.c.bf16 %v3636_v30, %v3635_v35  ;;  %v3644_v39 = vld [vmem:[#allocation2 + $0x6e] sm:$0xff] }
 0x151   : > { %4750 = vmatprep.mubr.msk.bf16.mxu1 %vm966_vm0, %v1649_v17  ;;  %v5993_v50 = vpack.c.bf16 %v1620_v15, %v1619_v48  ;;  %v3309_v17 = vld [vmem:[#allocation2 + $0x7d] sm:$0xff]  ;;  %v1643_v15 = vld [vmem:[#allocation2 + $0xf2] sm:$0xff] }
 0x152   : > { %v6069_v48 = vpack.c.bf16 %v1644_v56, %v1643_v15  ;;  %v3643_v56 = vld [vmem:[#allocation2 + $0x66] sm:$0xff] }
 0x157   : > { %4927 = vmatmul.mubr.msk.bf16.gmra.mrb[16].mxu0 %vm966_vm0, %v5887_v20  ;;  %v1621_v20 = vld [vmem:[#allocation2 + $0x42] sm:$0xff] }
 0x158   : > { %4751 = vmatmul.mubr.msk.bf16.vlgmr.msra.gmra.mrb[0].mxu1 %vm966_vm0, %v5977_v43  ;;  %4930 = vmatprep.mubr.msk.bf16.mxu0 %vm966_vm0, %v5904_v34  ;;  %v6003_v34 = vpack.c.bf16 %v1622_v47, %v1621_v20  ;;  %v3310_v47 = vld [vmem:[#allocation2 + $0x85] sm:$0xff] }
 0x159   : > { %4754 = vmatprep.mubr.msk.bf16.mxu1 %vm966_vm0, %v5984_v6  ;;  %4787 = vmatpush3.bf16.msra.mxu1 %v5902_v25  ;;  %v1624_v25 = vld [vmem:[#allocation2 + $0x5a] sm:$0xff]  ;;  %v3340_v20 = vpack.c.bf16 %v3311_v2, %v3310_v47  ;;  %v3675_v2 = vpack.c.bf16 %v3644_v39, %v3643_v56  ;;  %v1985_v47 = vld [vmem:[#allocation2 + $0x12a] sm:$0xff] }
 0x15a   : > { %4788 = vmatprep.subr.bf16.mxu1 %v5347_v45  ;;  %v6011_v58 = vpack.c.bf16 %v1624_v25, %v1623_v55  ;;  %v1645_v25 = vld [vmem:[#allocation2 + $0x102] sm:$0xff] }
 0x15b   : > { %v3313_v55 = vld [vmem:[#allocation2 + $0x9d] sm:$0xff] }
 0x15c   : > { %v2321_v39 = vld [vmem:[#allocation2 + $0x123] sm:$0xff] }
 0x15d   : > { %4789 = vmatpush3.bf16.msra.mxu1 %v5347_v45  ;;  %v3339_v45 = vpack.c.bf16 %v3309_v17, %v3308_v42  ;;  %v3641_v17 = vld [vmem:[#allocation2 + $0x56] sm:$0xff]  ;;  %v3648_v42 = vld [vmem:[#allocation2 + $0x8e] sm:$0xff] }
 0x15e   : > { %5026 = vmatprep.subr.bf16.mxu1 %v5998_v52 }
 0x15f   : > { %4931 = vmatmul.mubr.msk.bf16.gmra.mrb[20].mxu0 %vm966_vm0, %v5906_v38  ;;  %v6015_v38 = vpack.c.bf16 %v1626_v53, %v1625_v32  ;;  %v6072_v53 = vpack.c.bf16 %v1646_v44, %v1645_v25  ;;  %v1648_v32 = vld [vmem:[#allocation2 + $0x11a] sm:$0xff] }
 0x160   : > { %4755 = vmatmul.mubr.msk.bf16.gmra.mrb[4].mxu1 %vm966_vm0, %v5993_v50  ;;  %4934 = vmatprep.mubr.msk.bf16.mxu0 %vm966_vm0, %v5915_v46  ;;  %v1628_v46 = vld [vmem:[#allocation2 + $0x7a] sm:$0xff] }
 0x161   : > { %4758 = vmatprep.mubr.msk.bf16.mxu1 %vm966_vm0, %v6003_v34  ;;  %v6023_v61 = vpack.c.bf16 %v1628_v46, %v1627_v60  ;;  %v3315_v46 = vld [vmem:[#allocation2 + $0xad] sm:$0xff]  ;;  %v3645_v44 = vld [vmem:[#allocation2 + $0x76] sm:$0xff] }
 0x162   : > { %v2308_v25 = vld [vmem:[#allocation2 + $0xbb] sm:$0xff] }
 0x167   : > { %4935 = vmatmul.mubr.msk.bf16.gmra.mrb[24].mxu0 %vm966_vm0, %v5917_v49  ;;  %v6027_v49 = vpack.c.bf16 %v1630_v59, %v1629_v62  ;;  %v3312_v59 = vld [vmem:[#allocation2 + $0x95] sm:$0xff] }
 0x168   : > { %4759 = vmatmul.mubr.msk.bf16.gmra.mrb[8].mxu1 %vm966_vm0, %v6011_v58  ;;  %4938 = vmatprep.mubr.msk.bf16.mxu0 %vm966_vm0, %v5925_v31  ;;  %v2996_v31 = vld [vmem:[#allocation2 + $0x13c] sm:$0xff]  ;;  %v3341_v60 = vpack.c.bf16 %v3313_v55, %v3312_v59  ;;  %v1647_v62 = vld [vmem:[#allocation2 + $0x112] sm:$0xff] }
 0x169   : > { %4762 = vmatprep.mubr.msk.bf16.mxu1 %vm966_vm0, %v6015_v38  ;;  %v3014_v7 = vpack.c.bf16 %v2996_v31, %v2995_v4  ;;  %v3314_v31 = vld [vmem:[#allocation2 + $0xa5] sm:$0xff]  ;;  %v3317_v4 = vld [vmem:[#allocation2 + $0xbd] sm:$0xff] }
 0x16a   : > { %v3342_v3 = vpack.c.bf16 %v3315_v46, %v3314_v31  ;;  %v3651_v46 = vld [vmem:[#allocation2 + $0xa6] sm:$0xff] }
 0x16f   : > { %4939 = vmatmul.mubr.msk.bf16.gmra.mrb[28].mxu0 %vm966_vm0, %v5927_v63  ;;  %v6035_v63 = vpack.c.bf16 %v1632_v1, %v1631_v8  ;;  %v6079_v1 = vpack.c.bf16 %v1648_v32, %v1647_v62  ;;  %v1984_v32 = vld [vmem:[#allocation2 + $0x122] sm:$0xff]  ;;  %v2307_v62 = vld [vmem:[#allocation2 + $0xb3] sm:$0xff] }
 0x170   : > { %4763 = vmatmul.mubr.msk.bf16.gmra.mrb[12].mxu1 %vm966_vm0, %v6023_v61  ;;  %4942 = vmatprep.mubr.msk.bf16.mxu0 %vm966_vm0, %v5935_v10  ;;  %v3301_v10 = vld [vmem:[#allocation2 + $0x3d] sm:$0xff]  ;;  %v2003_v59 = vpack.c.bf16 %v1985_v47, %v1984_v32  ;;  %v2333_v31 = vpack.c.bf16 %v2308_v25, %v2307_v62 }
 0x171   : > { %4766 = vmatprep.mubr.msk.bf16.mxu1 %vm966_vm0, %v6027_v49  ;;  %v3335_v21 = vpack.c.bf16 %v3301_v10, %v3300_v16  ;;  %v3323_v10 = vld [vmem:[#allocation2 + $0xed] sm:$0xff]  ;;  %v3345_v16 = vpack.c.bf16 %v3321_v12, %v3320_v14  ;;  %v3658_v14 = vld [vmem:[#allocation2 + $0xde] sm:$0xff] }
 0x172   : > { %v3346_v19 = vpack.c.bf16 %v3323_v10, %v3322_v18  ;;  %v3660_v18 = vld [vmem:[#allocation2 + $0xee] sm:$0xff] }
 0x177   : > { %4943 = vmatmul.mubr.msk.bf16.gmra.mrb[32].mxu0 %vm966_vm0, %v3014_v7  ;;  %v3316_v7 = vld [vmem:[#allocation2 + $0xb5] sm:$0xff] }
 0x178   : > { %4767 = vmatmul.mubr.msk.bf16.gmra.mrb[16].mxu1 %vm966_vm0, %v6035_v63  ;;  %4950 = vmatprep.mubr.msk.bf16.mxu0 %vm966_vm0, %v3334_v11  ;;  %v3343_v8 = vpack.c.bf16 %v3317_v4, %v3316_v7  ;;  %v3344_v11 = vpack.c.bf16 %v3319_v5, %v3318_v9  ;;  %v3653_v4 = vld [vmem:[#allocation2 + $0xb6] sm:$0xff]  ;;  %v3655_v9 = vld [vmem:[#allocation2 + $0xc6] sm:$0xff] }
 0x179   : > { %4770 = vmatprep.mubr.msk.bf16.mxu1 %vm966_vm0, %v6038_v13  ;;  %v2312_v5 = vld [vmem:[#allocation2 + $0xdb] sm:$0xff] }
 0x17f   : > { %4951 = vmatmul.mubr.msk.bf16.vlgmr.msra.gmra.mrb[0].mxu0 %vm966_vm0, %v3335_v21 }
 0x180   : > { %4987 = vmatpush3.bf16.msra.mxu0 %v5956_v57  ;;  %4771 = vmatmul.mubr.msk.bf16.gmra.mrb[20].mxu1 %vm966_vm0, %v6045_v24  ;;  %v3338_v57 = vpack.c.bf16 %v3307_v33, %v3306_v51  ;;  %v3332_v33 = vld [vmem:[#allocation2 + $0x135] sm:$0xff]  ;;  %v3639_v51 = vld [vmem:[#allocation2 + $0x46] sm:$0xff] }
 0x181   : > { %4954 = vmatprep.mubr.msk.bf16.mxu0 %vm966_vm0, %v3336_v41  ;;  %4774 = vmatprep.mubr.msk.bf16.mxu1 %vm966_vm0, %v6051_v22  ;;  %v3330_v41 = vld [vmem:[#allocation2 + $0x125] sm:$0xff] }
 0x182   : > { %4988 = vmatprep.subr.bf16.mxu0 %v5348_v0  ;;  %v3350_v29 = vpack.c.bf16 %v3331_v28, %v3330_v41  ;;  %v3664_v41 = vld [vmem:[#allocation2 + $0x10e] sm:$0xff] }
 0x184   : > { %4989 = vmatpush3.bf16.msra.mxu0 %v5348_v0  ;;  %v3328_v0 = vld [vmem:[#allocation2 + $0x115] sm:$0xff] }
 0x187   : > { %4955 = vmatmul.mubr.msk.bf16.gmra.mrb[4].mxu0 %vm966_vm0, %v3337_v37  ;;  %v3640_v37 = vld [vmem:[#allocation2 + $0x4e] sm:$0xff] }
 0x188   : > { %4775 = vmatmul.mubr.msk.bf16.gmra.mrb[24].mxu1 %vm966_vm0, %v6059_v54  ;;  %4958 = vmatprep.mubr.msk.bf16.mxu0 %vm966_vm0, %v3338_v57  ;;  %v3673_v57 = vpack.c.bf16 %v3640_v37, %v3639_v51  ;;  %v3668_v51 = vld [vmem:[#allocation2 + $0x12e] sm:$0xff] }
 0x189   : > { %4778 = vmatprep.mubr.msk.bf16.mxu1 %vm966_vm0, %v6062_v40 }
 0x18f   : > { %4959 = vmatmul.mubr.msk.bf16.gmra.mrb[8].mxu0 %vm966_vm0, %v3339_v45  ;;  %v3647_v45 = vld [vmem:[#allocation2 + $0x86] sm:$0xff] }
 0x190   : > { %4779 = vmatmul.mubr.msk.bf16.gmra.mrb[28].mxu1 %vm966_vm0, %v6069_v48  ;;  %4962 = vmatprep.mubr.msk.bf16.mxu0 %vm966_vm0, %v3340_v20  ;;  %v3677_v15 = vpack.c.bf16 %v3648_v42, %v3647_v45  ;;  %v3652_v20 = vld [vmem:[#allocation2 + $0xae] sm:$0xff] }
 0x191   : > { %4782 = vmatprep.mubr.msk.bf16.mxu1 %vm966_vm0, %v6072_v53 }
 0x197   : > { %4963 = vmatmul.mubr.msk.bf16.gmra.mrb[12].mxu0 %vm966_vm0, %v3341_v60  ;;  %v3679_v60 = vpack.c.bf16 %v3652_v20, %v3651_v46 }
 0x198   : > { %4783 = vmatmul.mubr.msk.bf16.gmra.mrb[32].mxu1 %vm966_vm0, %v6079_v1  ;;  %4966 = vmatprep.mubr.msk.bf16.mxu0 %vm966_vm0, %v3342_v3  ;;  %v3656_v3 = vld [vmem:[#allocation2 + $0xce] sm:$0xff] }
 0x199   : > { %4790 = vmatprep.mubr.msk.bf16.mxu1 %vm966_vm0, %v5977_v43  ;;  %v5522_v43 = vld [vmem:[%s6366_s3 + $0x48] sm:$0xff]   ;;  %v3681_v12 = vpack.c.bf16 %v3656_v3, %v3655_v9 }
 0x19f   : > { %4967 = vmatmul.mubr.msk.bf16.gmra.mrb[16].mxu0 %vm966_vm0, %v3343_v8  ;;  %v2309_v8 = vld [vmem:[#allocation2 + $0xc3] sm:$0xff] }
 0x1a0   : > { %4791 = vmatmul.mubr.msk.bf16.vlgmr.msra.gmra.mrb[0].mxu1 %vm966_vm0, %v5984_v6  ;;  %4970 = vmatprep.mubr.msk.bf16.mxu0 %vm966_vm0, %v3344_v11  ;;  %v3325_v6 = vld [vmem:[#allocation2 + $0xfd] sm:$0xff] }
 0x1a1   : > { %4794 = vmatprep.mubr.msk.bf16.mxu1 %vm966_vm0, %v5993_v50  ;;  %5028 = vmatpush3.bf16.msra.mxu1 %v5998_v52  ;;  %v3327_v50 = vld [vmem:[#allocation2 + $0x10d] sm:$0xff]  ;;  %v3324_v52 = vld [vmem:[#allocation2 + $0xf5] sm:$0xff] }
 0x1a2   : > { %5027 = vmatprep.subr.bf16.mxu1 %v5522_v43  ;;  %v3347_v21 = vpack.c.bf16 %v3325_v6, %v3324_v52  ;;  %v3348_v26 = vpack.c.bf16 %v3327_v50, %v3326_v23  ;;  %v2316_v6 = vld [vmem:[#allocation2 + $0xfb] sm:$0xff]  ;;  %v2313_v52 = vld [vmem:[#allocation2 + $0xe3] sm:$0xff] }
 0x1a5   : > { %5029 = vmatpush3.bf16.msra.mxu1 %v5522_v43  ;;  %v2311_v43 = vld [vmem:[#allocation2 + $0xd3] sm:$0xff] }
 0x1a6   : > { %v2335_v10 = vpack.c.bf16 %v2312_v5, %v2311_v43 }
 0x1a7   : > { %4971 = vmatmul.mubr.msk.bf16.gmra.mrb[20].mxu0 %vm966_vm0, %v3345_v16  ;;  %v2314_v16 = vld [vmem:[#allocation2 + $0xeb] sm:$0xff] }
 0x1a8   : > { %4795 = vmatmul.mubr.msk.bf16.gmra.mrb[4].mxu1 %vm966_vm0, %v6003_v34  ;;  %4974 = vmatprep.mubr.msk.bf16.mxu0 %vm966_vm0, %v3346_v19  ;;  %v3329_v34 = vld [vmem:[#allocation2 + $0x11d] sm:$0xff]  ;;  %v2336_v23 = vpack.c.bf16 %v2314_v16, %v2313_v52 }
 0x1a9   : > { %4798 = vmatprep.mubr.msk.bf16.mxu1 %vm966_vm0, %v6011_v58  ;;  %v3349_v58 = vpack.c.bf16 %v3329_v34, %v3328_v0  ;;  %v3657_v19 = vld [vmem:[#allocation2 + $0xd6] sm:$0xff]  ;;  %v3662_v0 = vld [vmem:[#allocation2 + $0xfe] sm:$0xff] }
 0x1aa   : > { %v3682_v50 = vpack.c.bf16 %v3658_v14, %v3657_v19  ;;  %v2315_v34 = vld [vmem:[#allocation2 + $0xf3] sm:$0xff] }
 0x1ab   : > { %v2337_v28 = vpack.c.bf16 %v2316_v6, %v2315_v34 }
 0x1af   : > { %4975 = vmatmul.mubr.msk.bf16.gmra.mrb[24].mxu0 %vm966_vm0, %v3347_v21  ;;  %v3659_v21 = vld [vmem:[#allocation2 + $0xe6] sm:$0xff] }
 0x1b0   : > { %4799 = vmatmul.mubr.msk.bf16.gmra.mrb[8].mxu1 %vm966_vm0, %v6015_v38  ;;  %4978 = vmatprep.mubr.msk.bf16.mxu0 %vm966_vm0, %v3348_v26  ;;  %v3333_v38 = vld [vmem:[#allocation2 + $0x13d] sm:$0xff]  ;;  %v3683_v26 = vpack.c.bf16 %v3660_v18, %v3659_v21 }
 0x1b1   : > { %4802 = vmatprep.mubr.msk.bf16.mxu1 %vm966_vm0, %v6023_v61  ;;  %v3351_v61 = vpack.c.bf16 %v3333_v38, %v3332_v33  ;;  %v2320_v38 = vld [vmem:[#allocation2 + $0x11b] sm:$0xff]  ;;  %v2317_v33 = vld [vmem:[#allocation2 + $0x103] sm:$0xff] }
 0x1b2   : > { %v6198_v18 = vld [vmem:[%s6369_s6] ss:$0 sm:$0xff] }
 0x1b7   : > { %4979 = vmatmul.mubr.msk.bf16.gmra.mrb[28].mxu0 %vm966_vm0, %v3349_v58  ;;  %v2318_v58 = vld [vmem:[#allocation2 + $0x10b] sm:$0xff] }
 0x1b8   : > { %4803 = vmatmul.mubr.msk.bf16.gmra.mrb[12].mxu1 %vm966_vm0, %v6027_v49  ;;  %4982 = vmatprep.mubr.msk.bf16.mxu0 %vm966_vm0, %v3350_v29  ;;  %v3638_v49 = vld [vmem:[#allocation2 + $0x3e] sm:$0xff]  ;;  %v3661_v29 = vld [vmem:[#allocation2 + $0xf6] sm:$0xff]  ;;  %v2338_v35 = vpack.c.bf16 %v2318_v58, %v2317_v33 }
 0x1b9   : > { %4806 = vmatprep.mubr.msk.bf16.mxu1 %vm966_vm0, %v6035_v63  ;;  %v3672_v63 = vpack.c.bf16 %v3638_v49, %v3637_v27  ;;  %v3684_v30 = vpack.c.bf16 %v3662_v0, %v3661_v29  ;;  %v2319_v49 = vld [vmem:[#allocation2 + $0x113] sm:$0xff]  ;;  %v3666_v27 = vld [vmem:[#allocation2 + $0x11e] sm:$0xff] }
 0x1ba   : > { %v2339_v37 = vpack.c.bf16 %v2320_v38, %v2319_v49 }
 0x1bf   : > { %4983 = vmatmul.mubr.msk.bf16.gmra.mrb[32].mxu0 %vm966_vm0, %v3351_v61  ;;  %v3663_v61 = vld [vmem:[#allocation2 + $0x106] sm:$0xff] }
 0x1c0   : > { %4807 = vmatmul.mubr.msk.bf16.gmra.mrb[16].mxu1 %vm966_vm0, %v6038_v13  ;;  %4990 = vmatprep.mubr.msk.bf16.mxu0 %vm966_vm0, %v3671_v36  ;;  %v3642_v13 = vld [vmem:[#allocation2 + $0x5e] sm:$0xff]  ;;  %v3685_v36 = vpack.c.bf16 %v3664_v41, %v3663_v61 }
 0x1c1   : > { %4810 = vmatprep.mubr.msk.bf16.mxu1 %vm966_vm0, %v6045_v24  ;;  %v3674_v24 = vpack.c.bf16 %v3642_v13, %v3641_v17  ;;  %v3667_v17 = vld [vmem:[#allocation2 + $0x126] sm:$0xff] }
 0x1c2   : > { %v3687_v56 = vpack.c.bf16 %v3668_v51, %v3667_v17 }
 0x1c7   : > { %4991 = vmatmul.mubr.msk.bf16.vlgmr.msra.gmra.mrb[0].mxu0 %vm966_vm0, %v3672_v63  ;;  %v2322_v63 = vld [vmem:[#allocation2 + $0x12b] sm:$0xff] }
 0x1c8   : > { %4811 = vmatmul.mubr.msk.bf16.gmra.mrb[20].mxu1 %vm966_vm0, %v6051_v22  ;;  %4994 = vmatprep.mubr.msk.bf16.mxu0 %vm966_vm0, %v3673_v57  ;;  %v3646_v22 = vld [vmem:[#allocation2 + $0x7e] sm:$0xff]  ;;  %v3665_v57 = vld [vmem:[#allocation2 + $0x116] sm:$0xff] }
 0x1c9   : > { %4814 = vmatprep.mubr.msk.bf16.mxu1 %vm966_vm0, %v6059_v54  ;;  %v3676_v54 = vpack.c.bf16 %v3646_v22, %v3645_v44  ;;  %v3686_v13 = vpack.c.bf16 %v3666_v27, %v3665_v57  ;;  %v3669_v22 = vld [vmem:[#allocation2 + $0x136] sm:$0xff] }
 0x1cf   : > { %4995 = vmatmul.mubr.msk.bf16.gmra.mrb[4].mxu0 %vm966_vm0, %v3674_v24  ;;  %v2340_v24 = vpack.c.bf16 %v2322_v63, %v2321_v39 }
 0x1d0   : > { %4815 = vmatmul.mubr.msk.bf16.gmra.mrb[24].mxu1 %vm966_vm0, %v6062_v40  ;;  %4998 = vmatprep.mubr.msk.bf16.mxu0 %vm966_vm0, %v3675_v2  ;;  %v3650_v40 = vld [vmem:[#allocation2 + $0x9e] sm:$0xff] }
 0x1d1   : > { %4818 = vmatprep.mubr.msk.bf16.mxu1 %vm966_vm0, %v6069_v48  ;;  %v3649_v48 = vld [vmem:[#allocation2 + $0x96] sm:$0xff]  ;;  %v3670_v2 = vld [vmem:[#allocation2 + $0x13e] sm:$0xff] }
 0x1d2   : > { %v3678_v55 = vpack.c.bf16 %v3650_v40, %v3649_v48  ;;  %v3688_v42 = vpack.c.bf16 %v3670_v2, %v3669_v22 }
 0x1d7   : > { %4999 = vmatmul.mubr.msk.bf16.gmra.mrb[8].mxu0 %vm966_vm0, %v3676_v54 }
 0x1d8   : > { %4819 = vmatmul.mubr.msk.bf16.gmra.mrb[28].mxu1 %vm966_vm0, %v6072_v53  ;;  %5002 = vmatprep.mubr.msk.bf16.mxu0 %vm966_vm0, %v3677_v15  ;;  %v3654_v53 = vld [vmem:[#allocation2 + $0xbe] sm:$0xff] }
 0x1d9   : > { %4822 = vmatprep.mubr.msk.bf16.mxu1 %vm966_vm0, %v6079_v1  ;;  %v2310_v1 = vld [vmem:[#allocation2 + $0xcb] sm:$0xff]  ;;  %v3680_v7 = vpack.c.bf16 %v3654_v53, %v3653_v4 }
 0x1da   : > { %v2334_v11 = vpack.c.bf16 %v2310_v1, %v2309_v8 }
 0x1df   : > { %5003 = vmatmul.mubr.msk.bf16.gmra.mrb[12].mxu0 %vm966_vm0, %v3678_v55 }
 0x1e0   : > { %4823 = vmatmul.mubr.msk.bf16.gmra.mrb[32].mxu1 %vm966_vm0, %v2003_v59  ;;  %5006 = vmatprep.mubr.msk.bf16.mxu0 %vm966_vm0, %v3679_v60 }
 0x1e1   : > { %4850 = vmatprep.mubr.msk.bf16.mxu1 %vm966_vm0, %v2333_v31 }
 0x1e7   : > { %5007 = vmatmul.mubr.msk.bf16.gmra.mrb[16].mxu0 %vm966_vm0, %v3680_v7  ;;  %v6186_v7 = vld [vmem:[%s6367_s4] ss:$0 sm:$0xff] }
 0x1e8   : > { %4851 = vmatmul.mubr.msk.bf16.vlgmr.msra.gmra.mrb[20].mxu1 %vm966_vm0, %v2334_v11  ;;  %5010 = vmatprep.mubr.msk.bf16.mxu0 %vm966_vm0, %v3681_v12  ;;  %v6191_v11 = vld [vmem:[%s6368_s5] ss:$0 sm:$0xff] }
 0x1e9   : > { %4854 = vmatprep.mubr.msk.bf16.mxu1 %vm966_vm0, %v2335_v10 }
 0x1ef   : > { %5011 = vmatmul.mubr.msk.bf16.gmra.mrb[20].mxu0 %vm966_vm0, %v3682_v50 }
 0x1f0   : > { %4855 = vmatmul.mubr.msk.bf16.gmra.mrb[24].mxu1 %vm966_vm0, %v2336_v23  ;;  %5014 = vmatprep.mubr.msk.bf16.mxu0 %vm966_vm0, %v3683_v26 }
 0x1f1   : > { %4858 = vmatprep.mubr.msk.bf16.mxu1 %vm966_vm0, %v2337_v28 }
 0x1f7   : > { %5015 = vmatmul.mubr.msk.bf16.gmra.mrb[24].mxu0 %vm966_vm0, %v3684_v30 }
 0x1f8   : > { %4859 = vmatmul.mubr.msk.bf16.gmra.mrb[28].mxu1 %vm966_vm0, %v2338_v35  ;;  %5018 = vmatprep.mubr.msk.bf16.mxu0 %vm966_vm0, %v3685_v36 }
 0x1f9   : > { %4862 = vmatprep.mubr.msk.bf16.mxu1 %vm966_vm0, %v2339_v37 }
 0x1ff   : > { %5019 = vmatmul.mubr.msk.bf16.gmra.mrb[28].mxu0 %vm966_vm0, %v3686_v13 }
 0x200   : > { %4863 = vmatmul.mubr.msk.bf16.gmra.mrb[32].mxu1 %vm966_vm0, %v2340_v24  ;;  %5022 = vmatprep.mubr.msk.bf16.mxu0 %vm966_vm0, %v3687_v56 }
 0x207   : > { %5023 = vmatmul.mubr.msk.bf16.gmra.mrb[32].mxu0 %vm966_vm0, %v3688_v42 }
 0x273   : > { %v4792_v44 = vpop.f32.mrb[0].mxu1 }
 0x274   : > { %v2108_v54 = vpop.f32.mrb[1].mxu1 }
 0x275   : > { %v4793_v45 = vpop.f32.mrb[2].mxu1 }
 0x276   : > { %v2111_v15 = vpop.f32.mrb[3].mxu1 }
 0x27b   : > { %v4796_v40 = vpop.f32.mrb[4].mxu1 }
 0x27c   : > { %v2124_v47 = vpop.f32.mrb[5].mxu1 }
 0x27d   : > { %v4797_v20 = vpop.f32.mrb[6].mxu1 }
 0x27e   : > { %v2127_v48 = vpop.f32.mrb[7].mxu1 }
 0x283   : > { %v6159_v25 = vpop.f32.mrb[8].mxu1 }
 0x284   : > { %v6161_v55 = vpop.f32.mrb[9].mxu1 }
 0x285   : > { %v6163_v32 = vpop.f32.mrb[10].mxu1 }
 0x286   : > { %v6165_v46 = vpop.f32.mrb[11].mxu1 }
 0x28b   : > { %v6167_v59 = vpop.f32.mrb[12].mxu1 }
 0x28c   : > { %v6169_v60 = vpop.f32.mrb[13].mxu1 }
 0x28d   : > { %v6171_v62 = vpop.f32.mrb[14].mxu1 }
 0x28e   : > { %v6173_v31 = vpop.f32.mrb[15].mxu1 }
 0x293   : > { %v6175_v53 = vpop.f32.mrb[16].mxu1 }
 0x294   : > { %v6177_v1 = vpop.f32.mrb[17].mxu1 }
 0x295   : > { %v6179_v3 = vpop.f32.mrb[18].mxu1 }
 0x296   : > { %v6181_v4 = vpop.f32.mrb[19].mxu1 }
 0x29a   : > { %v4992_v5 = vpop.f32.mrb[0].mxu0 }
 0x29b   : > { %v5030_v8 = vadd.f32 %v4992_v5, %v4792_v44  ;;  %v3793_v9 = vpop.f32.mrb[1].mxu0 }
 0x29c   : > { %v5031_v12 = vadd.f32 %v3793_v9, %v2108_v54  ;;  %v4993_v43 = vpop.f32.mrb[2].mxu0 }
 0x29d   : > { %v3981_v10 = vadd.f32 %v5030_v8, %v6186_v7  ;;  %v5032_v14 = vadd.f32 %v4993_v43, %v4793_v45  ;;  %v3796_v16 = vpop.f32.mrb[3].mxu0 }
 0x29e   : > { %v3979_v19 = vadd.f32 %v5031_v12, %v6186_v7  ;;  %v5033_v6 = vadd.f32 %v3796_v16, %v2111_v15 }
 0x29f   : > { %v4024_v50 = vmul.f32 %v6191_v11, %v3981_v10  ;;  %v3982_v52 = vadd.f32 %v5032_v14, %v6186_v7 }
 0x2a0   : > { %v4022_v21 = vmul.f32 %v6191_v11, %v3979_v19  ;;  %v3980_v23 = vadd.f32 %v5033_v6, %v6186_v7 }
 0x2a1   : > { %v4067_v26 = vadd.f32 %v6198_v18, %v4024_v50  ;;  %v4025_v34 = vmul.f32 %v6191_v11, %v3982_v52 }
 0x2a2   : > { %v4065_v28 = vadd.f32 %v6198_v18, %v4022_v21  ;;  %v4023_v0 = vmul.f32 %v6191_v11, %v3980_v23  ;;  %v4996_v58 = vpop.f32.mrb[4].mxu0 }
 0x2a3   : > { %v4103_v41 = vmax.f32 %v4067_v26, 0.0  ;;  %v4068_v29 = vadd.f32 %v6198_v18, %v4025_v34  ;;  %v5034_v38 = vadd.f32 %v4996_v58, %v4796_v40  ;;  %v3809_v30 = vpop.f32.mrb[5].mxu0 }
 0x2a4   : > { %v4101_v33 = vmax.f32 %v4065_v28, 0.0  ;;  %v4066_v61 = vadd.f32 %v6198_v18, %v4023_v0  ;;  %v5035_v35 = vadd.f32 %v3809_v30, %v2124_v47  ;;  %v4997_v36 = vpop.f32.mrb[6].mxu0 }
 0x2a5   : > { %4139 = vst [vmem:[%s6210_s19 + $0x10] sm:$0xff] %v4103_v41  ;;  %v4104_v49 = vmax.f32 %v4068_v29, 0.0  ;;  %v3985_v37 = vadd.f32 %v5034_v38, %v6186_v7  ;;  %v5036_v27 = vadd.f32 %v4997_v36, %v4797_v20  ;;  %v3812_v63 = vpop.f32.mrb[7].mxu0 }
 0x2a6   : > { %4137 = vst [vmem:[%s6210_s19] sm:$0xff] %v4101_v33  ;;  %v4102_v51 = vmax.f32 %v4066_v61, 0.0  ;;  %v3983_v57 = vadd.f32 %v5035_v35, %v6186_v7  ;;  %v5037_v13 = vadd.f32 %v3812_v63, %v2127_v48 }
 0x2a7   : > { %4140 = vst [vmem:[%s6210_s19 + $0x18] sm:$0xff] %v4104_v49  ;;  %v4028_v39 = vmul.f32 %v6191_v11, %v3985_v37  ;;  %v3986_v17 = vadd.f32 %v5036_v27, %v6186_v7 }
 0x2a8   : > { %4138 = vst [vmem:[%s6210_s19 + $0x8] sm:$0xff] %v4102_v51  ;;  %v4026_v24 = vmul.f32 %v6191_v11, %v3983_v57  ;;  %v3984_v56 = vadd.f32 %v5037_v13, %v6186_v7 }
 0x2a9   : > { %v4071_v2 = vadd.f32 %v6198_v18, %v4028_v39  ;;  %v4029_v22 = vmul.f32 %v6191_v11, %v3986_v17 }
 0x2aa   : > { %v4069_v42 = vadd.f32 %v6198_v18, %v4026_v24  ;;  %v4027_v44 = vmul.f32 %v6191_v11, %v3984_v56  ;;  %v5000_v54 = vpop.f32.mrb[8].mxu0 }
 0x2ab   : > { %v4107_v45 = vmax.f32 %v4071_v2, 0.0  ;;  %v4072_v15 = vadd.f32 %v6198_v18, %v4029_v22  ;;  %v5038_v40 = vadd.f32 %v5000_v54, %v6159_v25  ;;  %v3825_v47 = vpop.f32.mrb[9].mxu0 }
 0x2ac   : > { %v4105_v20 = vmax.f32 %v4069_v42, 0.0  ;;  %v4070_v48 = vadd.f32 %v6198_v18, %v4027_v44  ;;  %v5039_v5 = vadd.f32 %v3825_v47, %v6161_v55  ;;  %v5001_v8 = vpop.f32.mrb[10].mxu0 }
 0x2ad   : > { %4143 = vst [vmem:[%s6210_s19 + $0x30] sm:$0xff] %v4107_v45  ;;  %v4108_v9 = vmax.f32 %v4072_v15, 0.0  ;;  %v3989_v12 = vadd.f32 %v5038_v40, %v6186_v7  ;;  %v5040_v43 = vadd.f32 %v5001_v8, %v6163_v32  ;;  %v3828_v10 = vpop.f32.mrb[11].mxu0 }
 0x2ae   : > { %4141 = vst [vmem:[%s6210_s19 + $0x20] sm:$0xff] %v4105_v20  ;;  %v4106_v14 = vmax.f32 %v4070_v48, 0.0  ;;  %v3987_v16 = vadd.f32 %v5039_v5, %v6186_v7  ;;  %v5041_v25 = vadd.f32 %v3828_v10, %v6165_v46 }
 0x2af   : > { %4144 = vst [vmem:[%s6210_s19 + $0x38] sm:$0xff] %v4108_v9  ;;  %v4032_v19 = vmul.f32 %v6191_v11, %v3989_v12  ;;  %v3990_v6 = vadd.f32 %v5040_v43, %v6186_v7 }
 0x2b0   : > { %4142 = vst [vmem:[%s6210_s19 + $0x28] sm:$0xff] %v4106_v14  ;;  %v4030_v55 = vmul.f32 %v6191_v11, %v3987_v16  ;;  %v3988_v50 = vadd.f32 %v5041_v25, %v6186_v7 }
 0x2b1   : > { %v4075_v32 = vadd.f32 %v6198_v18, %v4032_v19  ;;  %v4033_v52 = vmul.f32 %v6191_v11, %v3990_v6 }
 0x2b2   : > { %v4073_v21 = vadd.f32 %v6198_v18, %v4030_v55  ;;  %v4031_v46 = vmul.f32 %v6191_v11, %v3988_v50  ;;  %v5004_v23 = vpop.f32.mrb[12].mxu0 }
 0x2b3   : > { %v4111_v26 = vmax.f32 %v4075_v32, 0.0  ;;  %v4076_v34 = vadd.f32 %v6198_v18, %v4033_v52  ;;  %v5042_v28 = vadd.f32 %v5004_v23, %v6167_v59  ;;  %v3841_v0 = vpop.f32.mrb[13].mxu0 }
 0x2b4   : > { %v4109_v58 = vmax.f32 %v4073_v21, 0.0  ;;  %v4074_v41 = vadd.f32 %v6198_v18, %v4031_v46  ;;  %v5043_v29 = vadd.f32 %v3841_v0, %v6169_v60  ;;  %v5005_v38 = vpop.f32.mrb[14].mxu0 }
 0x2b5   : > { %4147 = vst [vmem:[%s6210_s19 + $0x50] sm:$0xff] %v4111_v26  ;;  %v4112_v30 = vmax.f32 %v4076_v34, 0.0  ;;  %v3993_v33 = vadd.f32 %v5042_v28, %v6186_v7  ;;  %v5044_v61 = vadd.f32 %v5005_v38, %v6171_v62  ;;  %v3844_v35 = vpop.f32.mrb[15].mxu0 }
 0x2b6   : > { %4145 = vst [vmem:[%s6210_s19 + $0x40] sm:$0xff] %v4109_v58  ;;  %v4110_v36 = vmax.f32 %v4074_v41, 0.0  ;;  %v3991_v49 = vadd.f32 %v5043_v29, %v6186_v7  ;;  %v5045_v59 = vadd.f32 %v3844_v35, %v6173_v31 }
 0x2b7   : > { %4148 = vst [vmem:[%s6210_s19 + $0x58] sm:$0xff] %v4112_v30  ;;  %v4036_v37 = vmul.f32 %v6191_v11, %v3993_v33  ;;  %v3994_v27 = vadd.f32 %v5044_v61, %v6186_v7 }
 0x2b8   : > { %4146 = vst [vmem:[%s6210_s19 + $0x48] sm:$0xff] %v4110_v36  ;;  %v4034_v60 = vmul.f32 %v6191_v11, %v3991_v49  ;;  %v3992_v63 = vadd.f32 %v5045_v59, %v6186_v7 }
 0x2b9   : > { %v4079_v62 = vadd.f32 %v6198_v18, %v4036_v37  ;;  %v4037_v51 = vmul.f32 %v6191_v11, %v3994_v27 }
 0x2ba   : > { %v4077_v57 = vadd.f32 %v6198_v18, %v4034_v60  ;;  %v4035_v13 = vmul.f32 %v6191_v11, %v3992_v63  ;;  %v5008_v31 = vpop.f32.mrb[16].mxu0 }
 0x2bb   : > { %v4115_v39 = vmax.f32 %v4079_v62, 0.0  ;;  %v4080_v17 = vadd.f32 %v6198_v18, %v4037_v51  ;;  %v5046_v24 = vadd.f32 %v5008_v31, %v6175_v53  ;;  %v4852_v56 = vpop.f32.mrb[20].mxu1  ;;  %v3857_v2 = vpop.f32.mrb[17].mxu0 }
 0x2bc   : > { %v4113_v22 = vmax.f32 %v4077_v57, 0.0  ;;  %v4078_v42 = vadd.f32 %v6198_v18, %v4035_v13  ;;  %v5047_v44 = vadd.f32 %v3857_v2, %v6177_v1  ;;  %v2525_v54 = vpop.f32.mrb[21].mxu1  ;;  %v5009_v45 = vpop.f32.mrb[18].mxu0 }
 0x2bd   : > { %4151 = vst [vmem:[%s6210_s19 + $0x70] sm:$0xff] %v4115_v39  ;;  %v4116_v15 = vmax.f32 %v4080_v17, 0.0  ;;  %v3997_v40 = vadd.f32 %v5046_v24, %v6186_v7  ;;  %v5048_v47 = vadd.f32 %v5009_v45, %v6179_v3  ;;  %v4853_v20 = vpop.f32.mrb[22].mxu1  ;;  %v3860_v48 = vpop.f32.mrb[19].mxu0 }
 0x2be   : > { %4149 = vst [vmem:[%s6210_s19 + $0x60] sm:$0xff] %v4113_v22  ;;  %v4114_v53 = vmax.f32 %v4078_v42, 0.0  ;;  %v3995_v5 = vadd.f32 %v5047_v44, %v6186_v7  ;;  %v5049_v8 = vadd.f32 %v3860_v48, %v6181_v4  ;;  %v2528_v9 = vpop.f32.mrb[23].mxu1 }
 0x2bf   : > { %4152 = vst [vmem:[%s6210_s19 + $0x78] sm:$0xff] %v4116_v15  ;;  %v4040_v1 = vmul.f32 %v6191_v11, %v3997_v40  ;;  %v3998_v12 = vadd.f32 %v5048_v47, %v6186_v7 }
 0x2c0   : > { %4150 = vst [vmem:[%s6210_s19 + $0x68] sm:$0xff] %v4114_v53  ;;  %v4038_v43 = vmul.f32 %v6191_v11, %v3995_v5  ;;  %v3996_v10 = vadd.f32 %v5049_v8, %v6186_v7 }
 0x2c1   : > { %v4083_v3 = vadd.f32 %v6198_v18, %v4040_v1  ;;  %v4041_v14 = vmul.f32 %v6191_v11, %v3998_v12 }
 0x2c2   : > { %v4081_v16 = vadd.f32 %v6198_v18, %v4038_v43  ;;  %v4039_v4 = vmul.f32 %v6191_v11, %v3996_v10  ;;  %v5012_v25 = vpop.f32.mrb[20].mxu0 }
 0x2c3   : > { %v4119_v19 = vmax.f32 %v4083_v3, 0.0  ;;  %v4084_v6 = vadd.f32 %v6198_v18, %v4041_v14  ;;  %v5050_v55 = vadd.f32 %v5012_v25, %v4852_v56  ;;  %v4856_v50 = vpop.f32.mrb[24].mxu1  ;;  %v3873_v32 = vpop.f32.mrb[21].mxu0 }
 0x2c4   : > { %v4117_v52 = vmax.f32 %v4081_v16, 0.0  ;;  %v4082_v21 = vadd.f32 %v6198_v18, %v4039_v4  ;;  %v5051_v46 = vadd.f32 %v3873_v32, %v2525_v54  ;;  %v2541_v23 = vpop.f32.mrb[25].mxu1  ;;  %v5013_v26 = vpop.f32.mrb[22].mxu0 }
 0x2c5   : > { %4155 = vst [vmem:[%s6210_s19 + $0x90] sm:$0xff] %v4119_v19  ;;  %v4120_v34 = vmax.f32 %v4084_v6, 0.0  ;;  %v4001_v28 = vadd.f32 %v5050_v55, %v6186_v7  ;;  %v5052_v0 = vadd.f32 %v5013_v26, %v4853_v20  ;;  %v4857_v58 = vpop.f32.mrb[26].mxu1  ;;  %v3876_v41 = vpop.f32.mrb[23].mxu0 }
 0x2c6   : > { %4153 = vst [vmem:[%s6210_s19 + $0x80] sm:$0xff] %v4117_v52  ;;  %v4118_v29 = vmax.f32 %v4082_v21, 0.0  ;;  %v3999_v38 = vadd.f32 %v5051_v46, %v6186_v7  ;;  %v5053_v30 = vadd.f32 %v3876_v41, %v2528_v9  ;;  %v2544_v33 = vpop.f32.mrb[27].mxu1 }
 0x2c7   : > { %4156 = vst [vmem:[%s6210_s19 + $0x98] sm:$0xff] %v4120_v34  ;;  %v4044_v61 = vmul.f32 %v6191_v11, %v4001_v28  ;;  %v4002_v35 = vadd.f32 %v5052_v0, %v6186_v7 }
 0x2c8   : > { %4154 = vst [vmem:[%s6210_s19 + $0x88] sm:$0xff] %v4118_v29  ;;  %v4042_v36 = vmul.f32 %v6191_v11, %v3999_v38  ;;  %v4000_v49 = vadd.f32 %v5053_v30, %v6186_v7 }
 0x2c9   : > { %v4087_v59 = vadd.f32 %v6198_v18, %v4044_v61  ;;  %v4045_v37 = vmul.f32 %v6191_v11, %v4002_v35 }
 0x2ca   : > { %v4085_v27 = vadd.f32 %v6198_v18, %v4042_v36  ;;  %v4043_v60 = vmul.f32 %v6191_v11, %v4000_v49  ;;  %v5016_v63 = vpop.f32.mrb[24].mxu0 }
 0x2cb   : > { %v4123_v62 = vmax.f32 %v4087_v59, 0.0  ;;  %v4088_v51 = vadd.f32 %v6198_v18, %v4045_v37  ;;  %v5054_v57 = vadd.f32 %v5016_v63, %v4856_v50  ;;  %v4860_v13 = vpop.f32.mrb[28].mxu1  ;;  %v3889_v31 = vpop.f32.mrb[25].mxu0 }
 0x2cc   : > { %v4121_v39 = vmax.f32 %v4085_v27, 0.0  ;;  %v4086_v17 = vadd.f32 %v6198_v18, %v4043_v60  ;;  %v5055_v24 = vadd.f32 %v3889_v31, %v2541_v23  ;;  %v2557_v56 = vpop.f32.mrb[29].mxu1  ;;  %v5017_v2 = vpop.f32.mrb[26].mxu0 }
 0x2cd   : > { %4159 = vst [vmem:[%s6210_s19 + $0xb0] sm:$0xff] %v4123_v62  ;;  %v4124_v22 = vmax.f32 %v4088_v51, 0.0  ;;  %v4005_v42 = vadd.f32 %v5054_v57, %v6186_v7  ;;  %v5056_v44 = vadd.f32 %v5017_v2, %v4857_v58  ;;  %v4861_v54 = vpop.f32.mrb[30].mxu1  ;;  %v3892_v45 = vpop.f32.mrb[27].mxu0 }
 0x2ce   : > { %4157 = vst [vmem:[%s6210_s19 + $0xa0] sm:$0xff] %v4121_v39  ;;  %v4122_v15 = vmax.f32 %v4086_v17, 0.0  ;;  %v4003_v40 = vadd.f32 %v5055_v24, %v6186_v7  ;;  %v5057_v47 = vadd.f32 %v3892_v45, %v2544_v33  ;;  %v2560_v20 = vpop.f32.mrb[31].mxu1 }
 0x2cf   : > { %4160 = vst [vmem:[%s6210_s19 + $0xb8] sm:$0xff] %v4124_v22  ;;  %v4048_v48 = vmul.f32 %v6191_v11, %v4005_v42  ;;  %v4006_v53 = vadd.f32 %v5056_v44, %v6186_v7 }
 0x2d0   : > { %4158 = vst [vmem:[%s6210_s19 + $0xa8] sm:$0xff] %v4122_v15  ;;  %v4046_v5 = vmul.f32 %v6191_v11, %v4003_v40  ;;  %v4004_v8 = vadd.f32 %v5057_v47, %v6186_v7 }
 0x2d1   : > { %v4091_v9 = vadd.f32 %v6198_v18, %v4048_v48  ;;  %v4049_v1 = vmul.f32 %v6191_v11, %v4006_v53 }
 0x2d2   : > { %v4089_v12 = vadd.f32 %v6198_v18, %v4046_v5  ;;  %v4047_v43 = vmul.f32 %v6191_v11, %v4004_v8  ;;  %v5020_v10 = vpop.f32.mrb[28].mxu0 }
 0x2d3   : > { %v4127_v3 = vmax.f32 %v4091_v9, 0.0  ;;  %v4092_v14 = vadd.f32 %v6198_v18, %v4049_v1  ;;  %v5058_v16 = vadd.f32 %v5020_v10, %v4860_v13  ;;  %v4864_v4 = vpop.f32.mrb[32].mxu1  ;;  %v3905_v25 = vpop.f32.mrb[29].mxu0 }
 0x2d4   : > { %v4125_v19 = vmax.f32 %v4089_v12, 0.0  ;;  %v4090_v6 = vadd.f32 %v6198_v18, %v4047_v43  ;;  %v5059_v55 = vadd.f32 %v3905_v25, %v2557_v56  ;;  %v2573_v50 = vpop.f32.mrb[33].mxu1  ;;  %v5021_v32 = vpop.f32.mrb[30].mxu0 }
 0x2d5   : > { %4163 = vst [vmem:[%s6210_s19 + $0xd0] sm:$0xff] %v4127_v3  ;;  %v4128_v52 = vmax.f32 %v4092_v14, 0.0  ;;  %v4009_v21 = vadd.f32 %v5058_v16, %v6186_v7  ;;  %v5060_v46 = vadd.f32 %v5021_v32, %v4861_v54  ;;  %v4865_v23 = vpop.f32.mrb[34].mxu1  ;;  %v3908_v26 = vpop.f32.mrb[31].mxu0 }
 0x2d6   : > { %4161 = vst [vmem:[%s6210_s19 + $0xc0] sm:$0xff] %v4125_v19  ;;  %v4126_v34 = vmax.f32 %v4090_v6, 0.0  ;;  %v4007_v28 = vadd.f32 %v5059_v55, %v6186_v7  ;;  %v5061_v0 = vadd.f32 %v3908_v26, %v2560_v20  ;;  %v2576_v58 = vpop.f32.mrb[35].mxu1 }
 0x2d7   : > { %4164 = vst [vmem:[%s6210_s19 + $0xd8] sm:$0xff] %v4128_v52  ;;  %v4052_v41 = vmul.f32 %v6191_v11, %v4009_v21  ;;  %v4010_v29 = vadd.f32 %v5060_v46, %v6186_v7 }
 0x2d8   : > { %4162 = vst [vmem:[%s6210_s19 + $0xc8] sm:$0xff] %v4126_v34  ;;  %v4050_v38 = vmul.f32 %v6191_v11, %v4007_v28  ;;  %v4008_v30 = vadd.f32 %v5061_v0, %v6186_v7 }
 0x2d9   : > { %v4095_v33 = vadd.f32 %v6198_v18, %v4052_v41  ;;  %v4053_v61 = vmul.f32 %v6191_v11, %v4010_v29 }
 0x2da   : > { %v4093_v35 = vadd.f32 %v6198_v18, %v4050_v38  ;;  %v4051_v36 = vmul.f32 %v6191_v11, %v4008_v30  ;;  %v5024_v49 = vpop.f32.mrb[32].mxu0 }
 0x2db   : > { %v4131_v59 = vmax.f32 %v4095_v33, 0.0  ;;  %v4096_v37 = vadd.f32 %v6198_v18, %v4053_v61  ;;  %v5062_v27 = vadd.f32 %v5024_v49, %v4864_v4  ;;  %v3921_v60 = vpop.f32.mrb[33].mxu0 }
 0x2dc   : > { %v4129_v63 = vmax.f32 %v4093_v35, 0.0  ;;  %v4094_v62 = vadd.f32 %v6198_v18, %v4051_v36  ;;  %v5063_v51 = vadd.f32 %v3921_v60, %v2573_v50  ;;  %v5025_v57 = vpop.f32.mrb[34].mxu0 }
 0x2dd   : > { %4167 = vst [vmem:[%s6210_s19 + $0xf0] sm:$0xff] %v4131_v59  ;;  %v4132_v13 = vmax.f32 %v4096_v37, 0.0  ;;  %v4013_v31 = vadd.f32 %v5062_v27, %v6186_v7  ;;  %v5064_v39 = vadd.f32 %v5025_v57, %v4865_v23  ;;  %v3924_v17 = vpop.f32.mrb[35].mxu0 }
 0x2de   : > { %4165 = vst [vmem:[%s6210_s19 + $0xe0] sm:$0xff] %v4129_v63  ;;  %v4130_v24 = vmax.f32 %v4094_v62, 0.0  ;;  %v4011_v56 = vadd.f32 %v5063_v51, %v6186_v7  ;;  %v5065_v2 = vadd.f32 %v3924_v17, %v2576_v58 }
 0x2df   : > { %4168 = vst [vmem:[%s6210_s19 + $0xf8] sm:$0xff] %v4132_v13  ;;  %v4056_v22 = vmul.f32 %v6191_v11, %v4013_v31  ;;  %v4014_v42 = vadd.f32 %v5064_v39, %v6186_v7 }
 0x2e0   : > { %4166 = vst [vmem:[%s6210_s19 + $0xe8] sm:$0xff] %v4130_v24  ;;  %v4054_v44 = vmul.f32 %v6191_v11, %v4011_v56  ;;  %v4012_v54 = vadd.f32 %v5065_v2, %v6186_v7 }
 0x2e1   : > { %v4099_v45 = vadd.f32 %v6198_v18, %v4056_v22  ;;  %v4057_v15 = vmul.f32 %v6191_v11, %v4014_v42 }
 0x2e2   : > { %v4097_v40 = vadd.f32 %v6198_v18, %v4054_v44  ;;  %v4055_v47 = vmul.f32 %v6191_v11, %v4012_v54 }
 0x2e3   : > { %v4135_v20 = vmax.f32 %v4099_v45, 0.0  ;;  %v4100_v48 = vadd.f32 %v6198_v18, %v4057_v15 }
 0x2e4   : > { %v4133_v53 = vmax.f32 %v4097_v40, 0.0  ;;  %v4098_v5 = vadd.f32 %v6198_v18, %v4055_v47 }
 0x2e5   : > { %4171 = vst [vmem:[%s6210_s19 + $0x110] sm:$0xff] %v4135_v20  ;;  %v4136_v8 = vmax.f32 %v4100_v48, 0.0 }
 0x2e6   : > { %4169 = vst [vmem:[%s6210_s19 + $0x100] sm:$0xff] %v4133_v53  ;;  %v4134_v9 = vmax.f32 %v4098_v5, 0.0 }
 0x2e7   : > { %4172 = vst [vmem:[%s6210_s19 + $0x118] sm:$0xff] %v4136_v8 }
 0x2e8   : > { %4170 = vst [vmem:[%s6210_s19 + $0x108] sm:$0xff] %v4134_v9 }
 0x2e9 PF: > { %s17_s24 = sadd.s32 1, %s5529_s24  }
 0x2ea   : > { %p14_p4 = scmp.ge.s32.totalorder %s17_s24, 4  }
 0x2ec   :  { %16 = sbr.rel (!%p14_p4) target bundleno = 1 (0x1), region = 84 }

</bundles_post_ra>
